<compile_context>
chip_gen: v5e
topology: v5e:2x2
jax: 0.10.0
libtpu: 0.0.40
codegen_flags: <defaults>
</compile_context>

<pallas_src>
import jax
import jax.numpy as jnp
from jax.experimental import pallas as pl
from jax.experimental.pallas import tpu as pltpu


# ----------------------------------------------------------------------------
# Shared LSTM cell math (PyTorch gate order: i, f, g, o)
# Full-width activations on the (B, 4H) gates vreg + lane-mask blend.
# ----------------------------------------------------------------------------
def _lstm_activations(gates, c_prev, H, g_mask):
    act = jnp.where(g_mask, jnp.tanh(gates), jax.nn.sigmoid(gates))
    i_g = act[:, 0:H]
    f_g = act[:, H:2 * H]
    g_g = act[:, 2 * H:3 * H]
    o_g = act[:, 3 * H:4 * H]
    c_new = f_g * c_prev + i_g * g_g
    h_new = o_g * jnp.tanh(c_new)
    return h_new, c_new


def _make_g_mask(B, H):
    lane = jax.lax.broadcasted_iota(jnp.int32, (B, 4 * H), 1)
    return jnp.logical_and(lane >= 2 * H, lane < 3 * H)


# ----------------------------------------------------------------------------
# Encoder kernel: fused multi-layer LSTM over the whole sequence, one invocation
# ----------------------------------------------------------------------------
def _make_encoder_kernel(L, T, H):
    def kernel(*refs):
        xp0_ref = refs[0]                 # (T, B, 4H): x @ W_ih0 + b0 (hoisted GEMM)
        whh0_ref = refs[1]                # (H, 4H)
        wcat_refs, b_refs = [], []
        idx = 2
        for _ in range(1, L):
            wcat_refs.append(refs[idx])   # (2H, 4H) fused [W_ih; W_hh]
            b_refs.append(refs[idx + 1])  # (1, 4H)
            idx += 2
        hN_ref, cN_ref = refs[idx], refs[idx + 1]   # (L, B, H) each
        B = hN_ref.shape[1]

        g_mask = _make_g_mask(B, H)       # hoisted out of the recurrence

        def step(t, carry):
            hs, cs = carry
            new_hs, new_cs = [], []
            # Layer 0: input projection already hoisted; one dot on the serial path.
            gates = xp0_ref[t] + jnp.dot(hs[0], whh0_ref[...],
                                         preferred_element_type=jnp.float32)
            h_new, c_new = _lstm_activations(gates, cs[0], H, g_mask)
            new_hs.append(h_new)
            new_cs.append(c_new)
            below = h_new
            for l in range(1, L):
                op = jnp.concatenate([below, hs[l]], axis=1)        # (B, 2H)
                gates = jnp.dot(op, wcat_refs[l - 1][...],
                                preferred_element_type=jnp.float32) + b_refs[l - 1][...]
                h_new, c_new = _lstm_activations(gates, cs[l], H, g_mask)
                new_hs.append(h_new)
                new_cs.append(c_new)
                below = h_new
            return tuple(new_hs), tuple(new_cs)

        zero = jnp.zeros((B, H), jnp.float32)       # nn.LSTM default zero state
        hs, cs = jax.lax.fori_loop(
            0, T, step,
            (tuple(zero for _ in range(L)), tuple(zero for _ in range(L))),
            unroll=True)

        # Final states written exactly once.
        for l in range(L):
            hN_ref[l] = hs[l]
            cN_ref[l] = cs[l]

    return kernel


def encoder_pallas(X_btf, enc_params):
    """Multi-layer LSTM encoder. Returns final (h, c) stacks of shape (L, B, H)."""
    B, T, F = X_btf.shape
    L = len(enc_params)
    H = enc_params[0][1].shape[0]
    x_tm = jnp.transpose(X_btf, (1, 0, 2))                       # (T, B, F)

    w_ih0, w_hh0, b0 = enc_params[0]
    # Hoist the layer-0 input projection: one (T*B, F)x(F, 4H) GEMM outside the kernel.
    xp0 = jnp.einsum('tbf,fg->tbg', x_tm, w_ih0,
                     precision=jax.lax.Precision.HIGHEST) + b0   # (T, B, 4H)

    args = [xp0, w_hh0]
    for l in range(1, L):
        w_ih, w_hh, b = enc_params[l]
        args += [jnp.concatenate([w_ih, w_hh], axis=0), b]       # fused (2H, 4H)

    vmem = pl.BlockSpec(memory_space=pltpu.MemorySpace.VMEM)
    hN, cN = pl.pallas_call(
        _make_encoder_kernel(L, T, H),
        out_shape=(jax.ShapeDtypeStruct((L, B, H), jnp.float32),
                   jax.ShapeDtypeStruct((L, B, H), jnp.float32)),
        in_specs=[vmem] * len(args),
        out_specs=(vmem, vmem),
    )(*args)
    return hN, cN


# ----------------------------------------------------------------------------
# Decoder kernel: pred_len steps x L LSTM cells + FC head + teacher forcing, fused
# ----------------------------------------------------------------------------
def _make_decoder_kernel(L, P, H, OUT, IN0):
    def kernel(*refs):
        idx = 0
        tfw_ref = refs[idx]; idx += 1          # (P, 1) teacher-forcing blend weights
        y_ref = refs[idx]; idx += 1            # (P, B, OUT) time-major targets
        h0_ref = refs[idx]; idx += 1           # (L, B, H)
        c0_ref = refs[idx]; idx += 1           # (L, B, H)
        if IN0 == 1:
            wih0_ref = refs[idx]               # (1, 4H)  -> VPU broadcast, no K=1 matmul
            whh0_ref = refs[idx + 1]           # (H, 4H)
            b0_ref = refs[idx + 2]             # (1, 4H)
            idx += 3
        else:
            wcat0_ref = refs[idx]              # (IN0+H, 4H)
            b0_ref = refs[idx + 1]
            idx += 2
        wcat_refs, b_refs = [], []
        for _ in range(1, L):
            wcat_refs.append(refs[idx])        # (2H, 4H)
            b_refs.append(refs[idx + 1])       # (1, 4H)
            idx += 2
        fcw_ref = refs[idx]                    # OUT==1: (1, H), else (H, OUT)
        fcb_ref = refs[idx + 1]                # OUT==1: (1, 1), else (1, OUT)
        out_ref = refs[idx + 2]                # (B, P*OUT) lane-dense slab

        B = out_ref.shape[0]
        g_mask = _make_g_mask(B, H)

        hs = [h0_ref[l] for l in range(L)]
        cs = [c0_ref[l] for l in range(L)]
        inp = y_ref[0]
        outs = []
        for t in range(P):                     # fully unrolled, P is static
            below = inp
            for l in range(L):
                if l == 0:
                    if IN0 == 1:
                        gates = (below * wih0_ref[...]                       # (B,1)*(1,4H)
                                 + jnp.dot(hs[0], whh0_ref[...],
                                           preferred_element_type=jnp.float32)
                                 + b0_ref[...])
                    else:
                        op = jnp.concatenate([below, hs[0]], axis=1)
                        gates = jnp.dot(op, wcat0_ref[...],
                                        preferred_element_type=jnp.float32) + b0_ref[...]
                else:
                    op = jnp.concatenate([below, hs[l]], axis=1)
                    gates = jnp.dot(op, wcat_refs[l - 1][...],
                                    preferred_element_type=jnp.float32) + b_refs[l - 1][...]
                h_new, c_new = _lstm_activations(gates, cs[l], H, g_mask)
                hs[l] = h_new
                cs[l] = c_new
                below = h_new
            # FC head: OUT==1 -> VPU multiply + lane reduction, no N=1 matmul.
            if OUT == 1:
                o1 = jnp.sum(below * fcw_ref[...], axis=-1, keepdims=True) + fcb_ref[...]
            else:
                o1 = jnp.dot(below, fcw_ref[...],
                             preferred_element_type=jnp.float32) + fcb_ref[...]
            outs.append(o1)
            # Teacher forcing: blend weight (0/1, with the t < P-1 gate pre-folded).
            if t < P - 1:
                w = tfw_ref[t]                                   # (1,) from VMEM
                inp = w * y_ref[t + 1] + (1.0 - w) * o1
            else:
                inp = o1

        # Single lane-dense writeback.
        out_ref[...] = jnp.concatenate(outs, axis=1)

    return kernel


def decoder_pallas(y_bpo, h0, c0, dec_params, fc_w, fc_b, tf_flags_i32):
    """Fused pred_len-step decoder loop. Returns (B, pred_len, OUT)."""
    B, _, OUT = y_bpo.shape
    L, _, H = h0.shape
    P = tf_flags_i32.shape[0]                     # pred_len
    IN0 = dec_params[0][0].shape[0]               # decoder layer-0 input size
    y_tm = jnp.transpose(y_bpo, (1, 0, 2))[:P]    # (P, B, OUT) time-major

    # Teacher-forcing blend weights with the (t < P-1) gate folded in.
    step_idx = jnp.arange(P, dtype=jnp.int32)
    tfw = jnp.logical_and(tf_flags_i32 != 0, step_idx < P - 1)
    tfw = tfw.astype(jnp.float32).reshape(P, 1)

    args = [tfw, y_tm, h0, c0]
    w_ih0, w_hh0, b0 = dec_params[0]
    if IN0 == 1:
        args += [w_ih0.reshape(1, 4 * H), w_hh0, b0]
    else:
        args += [jnp.concatenate([w_ih0, w_hh0], axis=0), b0]
    for l in range(1, L):
        w_ih, w_hh, b = dec_params[l]
        args += [jnp.concatenate([w_ih, w_hh], axis=0), b]
    if OUT == 1:
        args += [fc_w.reshape(1, H), fc_b.reshape(1, 1)]
    else:
        args += [fc_w, fc_b.reshape(1, OUT)]

    vmem = pl.BlockSpec(memory_space=pltpu.MemorySpace.VMEM)
    out = pl.pallas_call(
        _make_decoder_kernel(L, P, H, OUT, IN0),
        out_shape=jax.ShapeDtypeStruct((B, P * OUT), jnp.float32),
        in_specs=[vmem] * len(args),
        out_specs=vmem,
    )(*args)
    return out.reshape(B, P, OUT)


# ----------------------------------------------------------------------------
# Full model forward (Pallas path): exactly 2 pallas_calls total
# ----------------------------------------------------------------------------
def seq2seq_forward_pallas(X, y, enc_params, dec_params, fc_w, fc_b, tf_flags_i32):
    B = X.shape[0]
    # Pad the batch to a multiple of 8 sublanes; padded rows are sliced off at the end.
    B_pad = ((B + 7) // 8) * 8
    if B_pad != B:
        X = jnp.pad(X, ((0, B_pad - B), (0, 0), (0, 0)))
        y = jnp.pad(y, ((0, B_pad - B), (0, 0), (0, 0)))
    # encoder_out = outputs[:, -1, :] is unused by LSTM_Seq2Seq.forward -> not materialized.
    h, c = encoder_pallas(X, enc_params)
    out = decoder_pallas(y, h, c, dec_params, fc_w, fc_b, tf_flags_i32)
    return out[:B]


# ----------------------------------------------------------------------------
# Pure-JAX reference (same semantics, for correctness check)
# ----------------------------------------------------------------------------
def lstm_layer_ref(x_tbf, h0, c0, w_ih, w_hh, b):
    T = x_tbf.shape[0]
    H = h0.shape[-1]
    h, c = h0, c0
    outs = []
    for t in range(T):
        gates = x_tbf[t] @ w_ih + h @ w_hh + b
        i = jax.nn.sigmoid(gates[:, :H])
        f = jax.nn.sigmoid(gates[:, H:2 * H])
        g = jnp.tanh(gates[:, 2 * H:3 * H])
        o = jax.nn.sigmoid(gates[:, 3 * H:])
        c = f * c + i * g
        h = o * jnp.tanh(c)
        outs.append(h)
    return jnp.stack(outs, 0), h, c


def _lstm_multi_ref(x_btf, params, h0_stack, c0_stack):
    seq = jnp.transpose(x_btf, (1, 0, 2))
    h_fin, c_fin = [], []
    for l, (w_ih, w_hh, b) in enumerate(params):
        seq, hN, cN = lstm_layer_ref(seq, h0_stack[l], c0_stack[l], w_ih, w_hh, b)
        h_fin.append(hN)
        c_fin.append(cN)
    return jnp.transpose(seq, (1, 0, 2)), jnp.stack(h_fin), jnp.stack(c_fin)


def seq2seq_forward_ref(X, y, enc_params, dec_params, fc_w, fc_b,
                        num_layers, hidden, pred_len, tf_flags):
    B = X.shape[0]
    h0 = jnp.zeros((num_layers, B, hidden), jnp.float32)
    c0 = jnp.zeros_like(h0)
    _enc_out, h, c = _lstm_multi_ref(X, enc_params, h0, c0)
    inp = y[:, 0, :]
    outs = []
    for t in range(pred_len):
        dec_seq, h, c = _lstm_multi_ref(inp[:, None, :], dec_params, h, c)
        o1 = dec_seq[:, 0, :] @ fc_w + fc_b.reshape(1, -1)
        outs.append(o1)
        if t < pred_len - 1:
            inp = y[:, t + 1, :] if tf_flags[t] else o1
        else:
            inp = o1
    return jnp.stack(outs, axis=1)


# ----------------------------------------------------------------------------
# Deterministic parameter init (PyTorch-style uniform(-1/sqrt(H), 1/sqrt(H)))
# ----------------------------------------------------------------------------
def init_lstm_params(key, num_layers, input_size, hidden_size):
    params = []
    bound = 1.0 / float(hidden_size) ** 0.5
    for l in range(num_layers):
        in_sz = input_size if l == 0 else hidden_size
        key, k1, k2, k3, k4 = jax.random.split(key, 5)
        w_ih = jax.random.uniform(k1, (in_sz, 4 * hidden_size), jnp.float32, -bound, bound)
        w_hh = jax.random.uniform(k2, (hidden_size, 4 * hidden_size), jnp.float32, -bound, bound)
        b_ih = jax.random.uniform(k3, (4 * hidden_size,), jnp.float32, -bound, bound)
        b_hh = jax.random.uniform(k4, (4 * hidden_size,), jnp.float32, -bound, bound)
        params.append((w_ih, w_hh, (b_ih + b_hh).reshape(1, 4 * hidden_size)))
    return params, key


if __name__ == "__main__":
    # Full f32 matmuls in the JAX wrapper/reference so the 1e-3 check is tight.
    jax.config.update("jax_default_matmul_precision", "highest")

    # encoder: input_size=4, neural_size=32, layers=2
    # decoder: input_size=1 (=output_size), neural_size=32, layers=2, output_size=1
    # pred_len=4, teacher_forcing_ratio=0.5
    B, T_enc, F_enc = 2, 8, 4
    H, L = 32, 2
    OUT, PRED_LEN = 1, 4
    TFR = 0.5

    key = jax.random.PRNGKey(0)
    key, kx, ky, ktf = jax.random.split(key, 4)
    X = jax.random.normal(kx, (B, T_enc, F_enc), jnp.float32)
    y = jax.random.normal(ky, (B, PRED_LEN, OUT), jnp.float32)

    enc_params, key = init_lstm_params(key, L, F_enc, H)
    dec_params, key = init_lstm_params(key, L, OUT, H)
    key, kfw, kfb = jax.random.split(key, 3)
    fc_bound = 1.0 / float(H) ** 0.5
    fc_w = jax.random.uniform(kfw, (H, OUT), jnp.float32, -fc_bound, fc_bound)
    fc_b = jax.random.uniform(kfb, (OUT,), jnp.float32, -fc_bound, fc_bound)

    # Teacher-forcing draws (PyTorch does torch.rand(1).item() per step on host);
    # precomputed with a fixed seed and fed to the kernel as an int32 vector.
    tf_bools = [bool(v) for v in (jax.random.uniform(ktf, (PRED_LEN,)) < TFR)]
    tf_flags = jnp.asarray(tf_bools, jnp.int32)

    fwd = jax.jit(seq2seq_forward_pallas)
    out = fwd(X, y, enc_params, dec_params, fc_w, fc_b, tf_flags)
    out = jax.block_until_ready(out)
    assert out.shape == (B, PRED_LEN, OUT), out.shape

    # Pure-JAX reference (same teacher-forcing decisions) for correctness.
    ref = seq2seq_forward_ref(X, y, enc_params, dec_params, fc_w, fc_b,
                              L, H, PRED_LEN, tf_bools)
    ref = jax.block_until_ready(ref)
    err = float(jnp.max(jnp.abs(out - ref)))
    assert err < 1e-3, err

    print("KERNEL_OK")
</pallas_src>

<mosaic_0001>
module attributes {stable_mosaic.version = 11 : i64} {
  func.func @kernel(%arg0: memref<8x8x128xf32, #tpu.memory_space<vmem>>, %arg1: memref<32x128xf32, #tpu.memory_space<vmem>>, %arg2: memref<64x128xf32, #tpu.memory_space<vmem>>, %arg3: memref<1x128xf32, #tpu.memory_space<vmem>>, %arg4: memref<2x8x32xf32, #tpu.memory_space<vmem>>, %arg5: memref<2x8x32xf32, #tpu.memory_space<vmem>>) attributes {dimension_semantics = [], scalar_prefetch = 0 : i64, scratch_operands = 0 : i64, tpu.core_type = #tpu.core_type<tc>} {
    %0 = tpu.iota {dimensions = array<i32: 1>} : vector<8x128xi32>
    %c64_i32 = arith.constant 64 : i32
    %1 = vector.broadcast %c64_i32 : i32 to vector<8x128xi32>
    %2 = arith.cmpi sge, %0, %1 : vector<8x128xi32>
    %c96_i32 = arith.constant 96 : i32
    %3 = vector.broadcast %c96_i32 : i32 to vector<8x128xi32>
    %4 = arith.cmpi slt, %0, %3 : vector<8x128xi32>
    %5 = arith.andi %2, %4 : vector<8x128xi1>
    %cst = arith.constant 0.000000e+00 : f32
    %6 = vector.broadcast %cst : f32 to vector<8x32xf32>
    %c0_i32 = arith.constant 0 : i32
    %7 = arith.index_cast %c0_i32 : i32 to index
    %c0 = arith.constant 0 : index
    %c0_0 = arith.constant 0 : index
    %8 = vector.load %arg0[%7, %c0, %c0_0] : memref<8x8x128xf32, #tpu.memory_space<vmem>>, vector<1x8x128xf32>
    %9 = vector.shape_cast %8 : vector<1x8x128xf32> to vector<8x128xf32>
    %c0_1 = arith.constant 0 : index
    %c0_2 = arith.constant 0 : index
    %10 = vector.load %arg1[%c0_1, %c0_2] : memref<32x128xf32, #tpu.memory_space<vmem>>, vector<32x128xf32>
    %cst_3 = arith.constant dense<0.000000e+00> : vector<8x128xf32>
    %11 = tpu.matmul %6, %10, %cst_3 {dimension_numbers = #tpu.dot_dimension_numbers<[1], [0], [0], [1], [0, 0, 1, 1], [], []>, precision = #tpu.contract_precision<fp32>} : vector<8x32xf32>, vector<32x128xf32>, vector<8x128xf32> -> vector<8x128xf32>
    %12 = arith.addf %9, %11 : vector<8x128xf32>
    %13 = math.tanh %12 : vector<8x128xf32>
    %14 = arith.negf %12 : vector<8x128xf32>
    %15 = math.exp %14 : vector<8x128xf32>
    %cst_4 = arith.constant 1.000000e+00 : f32
    %16 = vector.broadcast %cst_4 : f32 to vector<8x128xf32>
    %17 = arith.addf %16, %15 : vector<8x128xf32>
    %18 = arith.divf %16, %17 : vector<8x128xf32>
    %19 = arith.select %5, %13, %18 : vector<8x128xi1>, vector<8x128xf32>
    %20 = vector.extract_strided_slice %19 {offsets = [0, 0], sizes = [8, 32], strides = [1, 1]} : vector<8x128xf32> to vector<8x32xf32>
    %21 = vector.extract_strided_slice %19 {offsets = [0, 32], sizes = [8, 32], strides = [1, 1]} : vector<8x128xf32> to vector<8x32xf32>
    %22 = vector.extract_strided_slice %19 {offsets = [0, 64], sizes = [8, 32], strides = [1, 1]} : vector<8x128xf32> to vector<8x32xf32>
    %23 = vector.extract_strided_slice %19 {offsets = [0, 96], sizes = [8, 32], strides = [1, 1]} : vector<8x128xf32> to vector<8x32xf32>
    %24 = arith.mulf %21, %6 : vector<8x32xf32>
    %25 = arith.mulf %20, %22 : vector<8x32xf32>
    %26 = arith.addf %24, %25 : vector<8x32xf32>
    %27 = math.tanh %26 : vector<8x32xf32>
    %28 = arith.mulf %23, %27 : vector<8x32xf32>
    %29 = tpu.concatenate %28, %6 in 1 : vector<8x32xf32>, vector<8x32xf32> -> vector<8x64xf32>
    %c0_5 = arith.constant 0 : index
    %c0_6 = arith.constant 0 : index
    %30 = vector.load %arg2[%c0_5, %c0_6] : memref<64x128xf32, #tpu.memory_space<vmem>>, vector<64x128xf32>
    %cst_7 = arith.constant dense<0.000000e+00> : vector<8x128xf32>
    %31 = tpu.matmul %29, %30, %cst_7 {dimension_numbers = #tpu.dot_dimension_numbers<[1], [0], [0], [1], [0, 0, 1, 1], [], []>, precision = #tpu.contract_precision<fp32>} : vector<8x64xf32>, vector<64x128xf32>, vector<8x128xf32> -> vector<8x128xf32>
    %c0_8 = arith.constant 0 : index
    %c0_9 = arith.constant 0 : index
    %32 = vector.load %arg3[%c0_8, %c0_9] : memref<1x128xf32, #tpu.memory_space<vmem>>, vector<1x128xf32>
    %33 = vector.broadcast %32 : vector<1x128xf32> to vector<8x128xf32>
    %34 = arith.addf %31, %33 : vector<8x128xf32>
    %35 = math.tanh %34 : vector<8x128xf32>
    %36 = arith.negf %34 : vector<8x128xf32>
    %37 = math.exp %36 : vector<8x128xf32>
    %cst_10 = arith.constant 1.000000e+00 : f32
    %38 = vector.broadcast %cst_10 : f32 to vector<8x128xf32>
    %39 = arith.addf %38, %37 : vector<8x128xf32>
    %40 = arith.divf %38, %39 : vector<8x128xf32>
    %41 = arith.select %5, %35, %40 : vector<8x128xi1>, vector<8x128xf32>
    %42 = vector.extract_strided_slice %41 {offsets = [0, 0], sizes = [8, 32], strides = [1, 1]} : vector<8x128xf32> to vector<8x32xf32>
    %43 = vector.extract_strided_slice %41 {offsets = [0, 32], sizes = [8, 32], strides = [1, 1]} : vector<8x128xf32> to vector<8x32xf32>
    %44 = vector.extract_strided_slice %41 {offsets = [0, 64], sizes = [8, 32], strides = [1, 1]} : vector<8x128xf32> to vector<8x32xf32>
    %45 = vector.extract_strided_slice %41 {offsets = [0, 96], sizes = [8, 32], strides = [1, 1]} : vector<8x128xf32> to vector<8x32xf32>
    %46 = arith.mulf %43, %6 : vector<8x32xf32>
    %47 = arith.mulf %42, %44 : vector<8x32xf32>
    %48 = arith.addf %46, %47 : vector<8x32xf32>
    %49 = math.tanh %48 : vector<8x32xf32>
    %50 = arith.mulf %45, %49 : vector<8x32xf32>
    %c1_i32 = arith.constant 1 : i32
    %51 = arith.index_cast %c1_i32 : i32 to index
    %c0_11 = arith.constant 0 : index
    %c0_12 = arith.constant 0 : index
    %52 = vector.load %arg0[%51, %c0_11, %c0_12] : memref<8x8x128xf32, #tpu.memory_space<vmem>>, vector<1x8x128xf32>
    %53 = vector.shape_cast %52 : vector<1x8x128xf32> to vector<8x128xf32>
    %c0_13 = arith.constant 0 : index
    %c0_14 = arith.constant 0 : index
    %54 = vector.load %arg1[%c0_13, %c0_14] : memref<32x128xf32, #tpu.memory_space<vmem>>, vector<32x128xf32>
    %cst_15 = arith.constant dense<0.000000e+00> : vector<8x128xf32>
    %55 = tpu.matmul %28, %54, %cst_15 {dimension_numbers = #tpu.dot_dimension_numbers<[1], [0], [0], [1], [0, 0, 1, 1], [], []>, precision = #tpu.contract_precision<fp32>} : vector<8x32xf32>, vector<32x128xf32>, vector<8x128xf32> -> vector<8x128xf32>
    %56 = arith.addf %53, %55 : vector<8x128xf32>
    %57 = math.tanh %56 : vector<8x128xf32>
    %58 = arith.negf %56 : vector<8x128xf32>
    %59 = math.exp %58 : vector<8x128xf32>
    %cst_16 = arith.constant 1.000000e+00 : f32
    %60 = vector.broadcast %cst_16 : f32 to vector<8x128xf32>
    %61 = arith.addf %60, %59 : vector<8x128xf32>
    %62 = arith.divf %60, %61 : vector<8x128xf32>
    %63 = arith.select %5, %57, %62 : vector<8x128xi1>, vector<8x128xf32>
    %64 = vector.extract_strided_slice %63 {offsets = [0, 0], sizes = [8, 32], strides = [1, 1]} : vector<8x128xf32> to vector<8x32xf32>
    %65 = vector.extract_strided_slice %63 {offsets = [0, 32], sizes = [8, 32], strides = [1, 1]} : vector<8x128xf32> to vector<8x32xf32>
    %66 = vector.extract_strided_slice %63 {offsets = [0, 64], sizes = [8, 32], strides = [1, 1]} : vector<8x128xf32> to vector<8x32xf32>
    %67 = vector.extract_strided_slice %63 {offsets = [0, 96], sizes = [8, 32], strides = [1, 1]} : vector<8x128xf32> to vector<8x32xf32>
    %68 = arith.mulf %65, %26 : vector<8x32xf32>
    %69 = arith.mulf %64, %66 : vector<8x32xf32>
    %70 = arith.addf %68, %69 : vector<8x32xf32>
    %71 = math.tanh %70 : vector<8x32xf32>
    %72 = arith.mulf %67, %71 : vector<8x32xf32>
    %73 = tpu.concatenate %72, %50 in 1 : vector<8x32xf32>, vector<8x32xf32> -> vector<8x64xf32>
    %c0_17 = arith.constant 0 : index
    %c0_18 = arith.constant 0 : index
    %74 = vector.load %arg2[%c0_17, %c0_18] : memref<64x128xf32, #tpu.memory_space<vmem>>, vector<64x128xf32>
    %cst_19 = arith.constant dense<0.000000e+00> : vector<8x128xf32>
    %75 = tpu.matmul %73, %74, %cst_19 {dimension_numbers = #tpu.dot_dimension_numbers<[1], [0], [0], [1], [0, 0, 1, 1], [], []>, precision = #tpu.contract_precision<fp32>} : vector<8x64xf32>, vector<64x128xf32>, vector<8x128xf32> -> vector<8x128xf32>
    %c0_20 = arith.constant 0 : index
    %c0_21 = arith.constant 0 : index
    %76 = vector.load %arg3[%c0_20, %c0_21] : memref<1x128xf32, #tpu.memory_space<vmem>>, vector<1x128xf32>
    %77 = vector.broadcast %76 : vector<1x128xf32> to vector<8x128xf32>
    %78 = arith.addf %75, %77 : vector<8x128xf32>
    %79 = math.tanh %78 : vector<8x128xf32>
    %80 = arith.negf %78 : vector<8x128xf32>
    %81 = math.exp %80 : vector<8x128xf32>
    %cst_22 = arith.constant 1.000000e+00 : f32
    %82 = vector.broadcast %cst_22 : f32 to vector<8x128xf32>
    %83 = arith.addf %82, %81 : vector<8x128xf32>
    %84 = arith.divf %82, %83 : vector<8x128xf32>
    %85 = arith.select %5, %79, %84 : vector<8x128xi1>, vector<8x128xf32>
    %86 = vector.extract_strided_slice %85 {offsets = [0, 0], sizes = [8, 32], strides = [1, 1]} : vector<8x128xf32> to vector<8x32xf32>
    %87 = vector.extract_strided_slice %85 {offsets = [0, 32], sizes = [8, 32], strides = [1, 1]} : vector<8x128xf32> to vector<8x32xf32>
    %88 = vector.extract_strided_slice %85 {offsets = [0, 64], sizes = [8, 32], strides = [1, 1]} : vector<8x128xf32> to vector<8x32xf32>
    %89 = vector.extract_strided_slice %85 {offsets = [0, 96], sizes = [8, 32], strides = [1, 1]} : vector<8x128xf32> to vector<8x32xf32>
    %90 = arith.mulf %87, %48 : vector<8x32xf32>
    %91 = arith.mulf %86, %88 : vector<8x32xf32>
    %92 = arith.addf %90, %91 : vector<8x32xf32>
    %93 = math.tanh %92 : vector<8x32xf32>
    %94 = arith.mulf %89, %93 : vector<8x32xf32>
    %c2_i32 = arith.constant 2 : i32
    %95 = arith.index_cast %c2_i32 : i32 to index
    %c0_23 = arith.constant 0 : index
    %c0_24 = arith.constant 0 : index
    %96 = vector.load %arg0[%95, %c0_23, %c0_24] : memref<8x8x128xf32, #tpu.memory_space<vmem>>, vector<1x8x128xf32>
    %97 = vector.shape_cast %96 : vector<1x8x128xf32> to vector<8x128xf32>
    %c0_25 = arith.constant 0 : index
    %c0_26 = arith.constant 0 : index
    %98 = vector.load %arg1[%c0_25, %c0_26] : memref<32x128xf32, #tpu.memory_space<vmem>>, vector<32x128xf32>
    %cst_27 = arith.constant dense<0.000000e+00> : vector<8x128xf32>
    %99 = tpu.matmul %72, %98, %cst_27 {dimension_numbers = #tpu.dot_dimension_numbers<[1], [0], [0], [1], [0, 0, 1, 1], [], []>, precision = #tpu.contract_precision<fp32>} : vector<8x32xf32>, vector<32x128xf32>, vector<8x128xf32> -> vector<8x128xf32>
    %100 = arith.addf %97, %99 : vector<8x128xf32>
    %101 = math.tanh %100 : vector<8x128xf32>
    %102 = arith.negf %100 : vector<8x128xf32>
    %103 = math.exp %102 : vector<8x128xf32>
    %cst_28 = arith.constant 1.000000e+00 : f32
    %104 = vector.broadcast %cst_28 : f32 to vector<8x128xf32>
    %105 = arith.addf %104, %103 : vector<8x128xf32>
    %106 = arith.divf %104, %105 : vector<8x128xf32>
    %107 = arith.select %5, %101, %106 : vector<8x128xi1>, vector<8x128xf32>
    %108 = vector.extract_strided_slice %107 {offsets = [0, 0], sizes = [8, 32], strides = [1, 1]} : vector<8x128xf32> to vector<8x32xf32>
    %109 = vector.extract_strided_slice %107 {offsets = [0, 32], sizes = [8, 32], strides = [1, 1]} : vector<8x128xf32> to vector<8x32xf32>
    %110 = vector.extract_strided_slice %107 {offsets = [0, 64], sizes = [8, 32], strides = [1, 1]} : vector<8x128xf32> to vector<8x32xf32>
    %111 = vector.extract_strided_slice %107 {offsets = [0, 96], sizes = [8, 32], strides = [1, 1]} : vector<8x128xf32> to vector<8x32xf32>
    %112 = arith.mulf %109, %70 : vector<8x32xf32>
    %113 = arith.mulf %108, %110 : vector<8x32xf32>
    %114 = arith.addf %112, %113 : vector<8x32xf32>
    %115 = math.tanh %114 : vector<8x32xf32>
    %116 = arith.mulf %111, %115 : vector<8x32xf32>
    %117 = tpu.concatenate %116, %94 in 1 : vector<8x32xf32>, vector<8x32xf32> -> vector<8x64xf32>
    %c0_29 = arith.constant 0 : index
    %c0_30 = arith.constant 0 : index
    %118 = vector.load %arg2[%c0_29, %c0_30] : memref<64x128xf32, #tpu.memory_space<vmem>>, vector<64x128xf32>
    %cst_31 = arith.constant dense<0.000000e+00> : vector<8x128xf32>
    %119 = tpu.matmul %117, %118, %cst_31 {dimension_numbers = #tpu.dot_dimension_numbers<[1], [0], [0], [1], [0, 0, 1, 1], [], []>, precision = #tpu.contract_precision<fp32>} : vector<8x64xf32>, vector<64x128xf32>, vector<8x128xf32> -> vector<8x128xf32>
    %c0_32 = arith.constant 0 : index
    %c0_33 = arith.constant 0 : index
    %120 = vector.load %arg3[%c0_32, %c0_33] : memref<1x128xf32, #tpu.memory_space<vmem>>, vector<1x128xf32>
    %121 = vector.broadcast %120 : vector<1x128xf32> to vector<8x128xf32>
    %122 = arith.addf %119, %121 : vector<8x128xf32>
    %123 = math.tanh %122 : vector<8x128xf32>
    %124 = arith.negf %122 : vector<8x128xf32>
    %125 = math.exp %124 : vector<8x128xf32>
    %cst_34 = arith.constant 1.000000e+00 : f32
    %126 = vector.broadcast %cst_34 : f32 to vector<8x128xf32>
    %127 = arith.addf %126, %125 : vector<8x128xf32>
    %128 = arith.divf %126, %127 : vector<8x128xf32>
    %129 = arith.select %5, %123, %128 : vector<8x128xi1>, vector<8x128xf32>
    %130 = vector.extract_strided_slice %129 {offsets = [0, 0], sizes = [8, 32], strides = [1, 1]} : vector<8x128xf32> to vector<8x32xf32>
    %131 = vector.extract_strided_slice %129 {offsets = [0, 32], sizes = [8, 32], strides = [1, 1]} : vector<8x128xf32> to vector<8x32xf32>
    %132 = vector.extract_strided_slice %129 {offsets = [0, 64], sizes = [8, 32], strides = [1, 1]} : vector<8x128xf32> to vector<8x32xf32>
    %133 = vector.extract_strided_slice %129 {offsets = [0, 96], sizes = [8, 32], strides = [1, 1]} : vector<8x128xf32> to vector<8x32xf32>
    %134 = arith.mulf %131, %92 : vector<8x32xf32>
    %135 = arith.mulf %130, %132 : vector<8x32xf32>
    %136 = arith.addf %134, %135 : vector<8x32xf32>
    %137 = math.tanh %136 : vector<8x32xf32>
    %138 = arith.mulf %133, %137 : vector<8x32xf32>
    %c3_i32 = arith.constant 3 : i32
    %139 = arith.index_cast %c3_i32 : i32 to index
    %c0_35 = arith.constant 0 : index
    %c0_36 = arith.constant 0 : index
    %140 = vector.load %arg0[%139, %c0_35, %c0_36] : memref<8x8x128xf32, #tpu.memory_space<vmem>>, vector<1x8x128xf32>
    %141 = vector.shape_cast %140 : vector<1x8x128xf32> to vector<8x128xf32>
    %c0_37 = arith.constant 0 : index
    %c0_38 = arith.constant 0 : index
    %142 = vector.load %arg1[%c0_37, %c0_38] : memref<32x128xf32, #tpu.memory_space<vmem>>, vector<32x128xf32>
    %cst_39 = arith.constant dense<0.000000e+00> : vector<8x128xf32>
    %143 = tpu.matmul %116, %142, %cst_39 {dimension_numbers = #tpu.dot_dimension_numbers<[1], [0], [0], [1], [0, 0, 1, 1], [], []>, precision = #tpu.contract_precision<fp32>} : vector<8x32xf32>, vector<32x128xf32>, vector<8x128xf32> -> vector<8x128xf32>
    %144 = arith.addf %141, %143 : vector<8x128xf32>
    %145 = math.tanh %144 : vector<8x128xf32>
    %146 = arith.negf %144 : vector<8x128xf32>
    %147 = math.exp %146 : vector<8x128xf32>
    %cst_40 = arith.constant 1.000000e+00 : f32
    %148 = vector.broadcast %cst_40 : f32 to vector<8x128xf32>
    %149 = arith.addf %148, %147 : vector<8x128xf32>
    %150 = arith.divf %148, %149 : vector<8x128xf32>
    %151 = arith.select %5, %145, %150 : vector<8x128xi1>, vector<8x128xf32>
    %152 = vector.extract_strided_slice %151 {offsets = [0, 0], sizes = [8, 32], strides = [1, 1]} : vector<8x128xf32> to vector<8x32xf32>
    %153 = vector.extract_strided_slice %151 {offsets = [0, 32], sizes = [8, 32], strides = [1, 1]} : vector<8x128xf32> to vector<8x32xf32>
    %154 = vector.extract_strided_slice %151 {offsets = [0, 64], sizes = [8, 32], strides = [1, 1]} : vector<8x128xf32> to vector<8x32xf32>
    %155 = vector.extract_strided_slice %151 {offsets = [0, 96], sizes = [8, 32], strides = [1, 1]} : vector<8x128xf32> to vector<8x32xf32>
    %156 = arith.mulf %153, %114 : vector<8x32xf32>
    %157 = arith.mulf %152, %154 : vector<8x32xf32>
    %158 = arith.addf %156, %157 : vector<8x32xf32>
    %159 = math.tanh %158 : vector<8x32xf32>
    %160 = arith.mulf %155, %159 : vector<8x32xf32>
    %161 = tpu.concatenate %160, %138 in 1 : vector<8x32xf32>, vector<8x32xf32> -> vector<8x64xf32>
    %c0_41 = arith.constant 0 : index
    %c0_42 = arith.constant 0 : index
    %162 = vector.load %arg2[%c0_41, %c0_42] : memref<64x128xf32, #tpu.memory_space<vmem>>, vector<64x128xf32>
    %cst_43 = arith.constant dense<0.000000e+00> : vector<8x128xf32>
    %163 = tpu.matmul %161, %162, %cst_43 {dimension_numbers = #tpu.dot_dimension_numbers<[1], [0], [0], [1], [0, 0, 1, 1], [], []>, precision = #tpu.contract_precision<fp32>} : vector<8x64xf32>, vector<64x128xf32>, vector<8x128xf32> -> vector<8x128xf32>
    %c0_44 = arith.constant 0 : index
    %c0_45 = arith.constant 0 : index
    %164 = vector.load %arg3[%c0_44, %c0_45] : memref<1x128xf32, #tpu.memory_space<vmem>>, vector<1x128xf32>
    %165 = vector.broadcast %164 : vector<1x128xf32> to vector<8x128xf32>
    %166 = arith.addf %163, %165 : vector<8x128xf32>
    %167 = math.tanh %166 : vector<8x128xf32>
    %168 = arith.negf %166 : vector<8x128xf32>
    %169 = math.exp %168 : vector<8x128xf32>
    %cst_46 = arith.constant 1.000000e+00 : f32
    %170 = vector.broadcast %cst_46 : f32 to vector<8x128xf32>
    %171 = arith.addf %170, %169 : vector<8x128xf32>
    %172 = arith.divf %170, %171 : vector<8x128xf32>
    %173 = arith.select %5, %167, %172 : vector<8x128xi1>, vector<8x128xf32>
    %174 = vector.extract_strided_slice %173 {offsets = [0, 0], sizes = [8, 32], strides = [1, 1]} : vector<8x128xf32> to vector<8x32xf32>
    %175 = vector.extract_strided_slice %173 {offsets = [0, 32], sizes = [8, 32], strides = [1, 1]} : vector<8x128xf32> to vector<8x32xf32>
    %176 = vector.extract_strided_slice %173 {offsets = [0, 64], sizes = [8, 32], strides = [1, 1]} : vector<8x128xf32> to vector<8x32xf32>
    %177 = vector.extract_strided_slice %173 {offsets = [0, 96], sizes = [8, 32], strides = [1, 1]} : vector<8x128xf32> to vector<8x32xf32>
    %178 = arith.mulf %175, %136 : vector<8x32xf32>
    %179 = arith.mulf %174, %176 : vector<8x32xf32>
    %180 = arith.addf %178, %179 : vector<8x32xf32>
    %181 = math.tanh %180 : vector<8x32xf32>
    %182 = arith.mulf %177, %181 : vector<8x32xf32>
    %c4_i32 = arith.constant 4 : i32
    %183 = arith.index_cast %c4_i32 : i32 to index
    %c0_47 = arith.constant 0 : index
    %c0_48 = arith.constant 0 : index
    %184 = vector.load %arg0[%183, %c0_47, %c0_48] : memref<8x8x128xf32, #tpu.memory_space<vmem>>, vector<1x8x128xf32>
    %185 = vector.shape_cast %184 : vector<1x8x128xf32> to vector<8x128xf32>
    %c0_49 = arith.constant 0 : index
    %c0_50 = arith.constant 0 : index
    %186 = vector.load %arg1[%c0_49, %c0_50] : memref<32x128xf32, #tpu.memory_space<vmem>>, vector<32x128xf32>
    %cst_51 = arith.constant dense<0.000000e+00> : vector<8x128xf32>
    %187 = tpu.matmul %160, %186, %cst_51 {dimension_numbers = #tpu.dot_dimension_numbers<[1], [0], [0], [1], [0, 0, 1, 1], [], []>, precision = #tpu.contract_precision<fp32>} : vector<8x32xf32>, vector<32x128xf32>, vector<8x128xf32> -> vector<8x128xf32>
    %188 = arith.addf %185, %187 : vector<8x128xf32>
    %189 = math.tanh %188 : vector<8x128xf32>
    %190 = arith.negf %188 : vector<8x128xf32>
    %191 = math.exp %190 : vector<8x128xf32>
    %cst_52 = arith.constant 1.000000e+00 : f32
    %192 = vector.broadcast %cst_52 : f32 to vector<8x128xf32>
    %193 = arith.addf %192, %191 : vector<8x128xf32>
    %194 = arith.divf %192, %193 : vector<8x128xf32>
    %195 = arith.select %5, %189, %194 : vector<8x128xi1>, vector<8x128xf32>
    %196 = vector.extract_strided_slice %195 {offsets = [0, 0], sizes = [8, 32], strides = [1, 1]} : vector<8x128xf32> to vector<8x32xf32>
    %197 = vector.extract_strided_slice %195 {offsets = [0, 32], sizes = [8, 32], strides = [1, 1]} : vector<8x128xf32> to vector<8x32xf32>
    %198 = vector.extract_strided_slice %195 {offsets = [0, 64], sizes = [8, 32], strides = [1, 1]} : vector<8x128xf32> to vector<8x32xf32>
    %199 = vector.extract_strided_slice %195 {offsets = [0, 96], sizes = [8, 32], strides = [1, 1]} : vector<8x128xf32> to vector<8x32xf32>
    %200 = arith.mulf %197, %158 : vector<8x32xf32>
    %201 = arith.mulf %196, %198 : vector<8x32xf32>
    %202 = arith.addf %200, %201 : vector<8x32xf32>
    %203 = math.tanh %202 : vector<8x32xf32>
    %204 = arith.mulf %199, %203 : vector<8x32xf32>
    %205 = tpu.concatenate %204, %182 in 1 : vector<8x32xf32>, vector<8x32xf32> -> vector<8x64xf32>
    %c0_53 = arith.constant 0 : index
    %c0_54 = arith.constant 0 : index
    %206 = vector.load %arg2[%c0_53, %c0_54] : memref<64x128xf32, #tpu.memory_space<vmem>>, vector<64x128xf32>
    %cst_55 = arith.constant dense<0.000000e+00> : vector<8x128xf32>
    %207 = tpu.matmul %205, %206, %cst_55 {dimension_numbers = #tpu.dot_dimension_numbers<[1], [0], [0], [1], [0, 0, 1, 1], [], []>, precision = #tpu.contract_precision<fp32>} : vector<8x64xf32>, vector<64x128xf32>, vector<8x128xf32> -> vector<8x128xf32>
    %c0_56 = arith.constant 0 : index
    %c0_57 = arith.constant 0 : index
    %208 = vector.load %arg3[%c0_56, %c0_57] : memref<1x128xf32, #tpu.memory_space<vmem>>, vector<1x128xf32>
    %209 = vector.broadcast %208 : vector<1x128xf32> to vector<8x128xf32>
    %210 = arith.addf %207, %209 : vector<8x128xf32>
    %211 = math.tanh %210 : vector<8x128xf32>
    %212 = arith.negf %210 : vector<8x128xf32>
    %213 = math.exp %212 : vector<8x128xf32>
    %cst_58 = arith.constant 1.000000e+00 : f32
    %214 = vector.broadcast %cst_58 : f32 to vector<8x128xf32>
    %215 = arith.addf %214, %213 : vector<8x128xf32>
    %216 = arith.divf %214, %215 : vector<8x128xf32>
    %217 = arith.select %5, %211, %216 : vector<8x128xi1>, vector<8x128xf32>
    %218 = vector.extract_strided_slice %217 {offsets = [0, 0], sizes = [8, 32], strides = [1, 1]} : vector<8x128xf32> to vector<8x32xf32>
    %219 = vector.extract_strided_slice %217 {offsets = [0, 32], sizes = [8, 32], strides = [1, 1]} : vector<8x128xf32> to vector<8x32xf32>
    %220 = vector.extract_strided_slice %217 {offsets = [0, 64], sizes = [8, 32], strides = [1, 1]} : vector<8x128xf32> to vector<8x32xf32>
    %221 = vector.extract_strided_slice %217 {offsets = [0, 96], sizes = [8, 32], strides = [1, 1]} : vector<8x128xf32> to vector<8x32xf32>
    %222 = arith.mulf %219, %180 : vector<8x32xf32>
    %223 = arith.mulf %218, %220 : vector<8x32xf32>
    %224 = arith.addf %222, %223 : vector<8x32xf32>
    %225 = math.tanh %224 : vector<8x32xf32>
    %226 = arith.mulf %221, %225 : vector<8x32xf32>
    %c5_i32 = arith.constant 5 : i32
    %227 = arith.index_cast %c5_i32 : i32 to index
    %c0_59 = arith.constant 0 : index
    %c0_60 = arith.constant 0 : index
    %228 = vector.load %arg0[%227, %c0_59, %c0_60] : memref<8x8x128xf32, #tpu.memory_space<vmem>>, vector<1x8x128xf32>
    %229 = vector.shape_cast %228 : vector<1x8x128xf32> to vector<8x128xf32>
    %c0_61 = arith.constant 0 : index
    %c0_62 = arith.constant 0 : index
    %230 = vector.load %arg1[%c0_61, %c0_62] : memref<32x128xf32, #tpu.memory_space<vmem>>, vector<32x128xf32>
    %cst_63 = arith.constant dense<0.000000e+00> : vector<8x128xf32>
    %231 = tpu.matmul %204, %230, %cst_63 {dimension_numbers = #tpu.dot_dimension_numbers<[1], [0], [0], [1], [0, 0, 1, 1], [], []>, precision = #tpu.contract_precision<fp32>} : vector<8x32xf32>, vector<32x128xf32>, vector<8x128xf32> -> vector<8x128xf32>
    %232 = arith.addf %229, %231 : vector<8x128xf32>
    %233 = math.tanh %232 : vector<8x128xf32>
    %234 = arith.negf %232 : vector<8x128xf32>
    %235 = math.exp %234 : vector<8x128xf32>
    %cst_64 = arith.constant 1.000000e+00 : f32
    %236 = vector.broadcast %cst_64 : f32 to vector<8x128xf32>
    %237 = arith.addf %236, %235 : vector<8x128xf32>
    %238 = arith.divf %236, %237 : vector<8x128xf32>
    %239 = arith.select %5, %233, %238 : vector<8x128xi1>, vector<8x128xf32>
    %240 = vector.extract_strided_slice %239 {offsets = [0, 0], sizes = [8, 32], strides = [1, 1]} : vector<8x128xf32> to vector<8x32xf32>
    %241 = vector.extract_strided_slice %239 {offsets = [0, 32], sizes = [8, 32], strides = [1, 1]} : vector<8x128xf32> to vector<8x32xf32>
    %242 = vector.extract_strided_slice %239 {offsets = [0, 64], sizes = [8, 32], strides = [1, 1]} : vector<8x128xf32> to vector<8x32xf32>
    %243 = vector.extract_strided_slice %239 {offsets = [0, 96], sizes = [8, 32], strides = [1, 1]} : vector<8x128xf32> to vector<8x32xf32>
    %244 = arith.mulf %241, %202 : vector<8x32xf32>
    %245 = arith.mulf %240, %242 : vector<8x32xf32>
    %246 = arith.addf %244, %245 : vector<8x32xf32>
    %247 = math.tanh %246 : vector<8x32xf32>
    %248 = arith.mulf %243, %247 : vector<8x32xf32>
    %249 = tpu.concatenate %248, %226 in 1 : vector<8x32xf32>, vector<8x32xf32> -> vector<8x64xf32>
    %c0_65 = arith.constant 0 : index
    %c0_66 = arith.constant 0 : index
    %250 = vector.load %arg2[%c0_65, %c0_66] : memref<64x128xf32, #tpu.memory_space<vmem>>, vector<64x128xf32>
    %cst_67 = arith.constant dense<0.000000e+00> : vector<8x128xf32>
    %251 = tpu.matmul %249, %250, %cst_67 {dimension_numbers = #tpu.dot_dimension_numbers<[1], [0], [0], [1], [0, 0, 1, 1], [], []>, precision = #tpu.contract_precision<fp32>} : vector<8x64xf32>, vector<64x128xf32>, vector<8x128xf32> -> vector<8x128xf32>
    %c0_68 = arith.constant 0 : index
    %c0_69 = arith.constant 0 : index
    %252 = vector.load %arg3[%c0_68, %c0_69] : memref<1x128xf32, #tpu.memory_space<vmem>>, vector<1x128xf32>
    %253 = vector.broadcast %252 : vector<1x128xf32> to vector<8x128xf32>
    %254 = arith.addf %251, %253 : vector<8x128xf32>
    %255 = math.tanh %254 : vector<8x128xf32>
    %256 = arith.negf %254 : vector<8x128xf32>
    %257 = math.exp %256 : vector<8x128xf32>
    %cst_70 = arith.constant 1.000000e+00 : f32
    %258 = vector.broadcast %cst_70 : f32 to vector<8x128xf32>
    %259 = arith.addf %258, %257 : vector<8x128xf32>
    %260 = arith.divf %258, %259 : vector<8x128xf32>
    %261 = arith.select %5, %255, %260 : vector<8x128xi1>, vector<8x128xf32>
    %262 = vector.extract_strided_slice %261 {offsets = [0, 0], sizes = [8, 32], strides = [1, 1]} : vector<8x128xf32> to vector<8x32xf32>
    %263 = vector.extract_strided_slice %261 {offsets = [0, 32], sizes = [8, 32], strides = [1, 1]} : vector<8x128xf32> to vector<8x32xf32>
    %264 = vector.extract_strided_slice %261 {offsets = [0, 64], sizes = [8, 32], strides = [1, 1]} : vector<8x128xf32> to vector<8x32xf32>
    %265 = vector.extract_strided_slice %261 {offsets = [0, 96], sizes = [8, 32], strides = [1, 1]} : vector<8x128xf32> to vector<8x32xf32>
    %266 = arith.mulf %263, %224 : vector<8x32xf32>
    %267 = arith.mulf %262, %264 : vector<8x32xf32>
    %268 = arith.addf %266, %267 : vector<8x32xf32>
    %269 = math.tanh %268 : vector<8x32xf32>
    %270 = arith.mulf %265, %269 : vector<8x32xf32>
    %c6_i32 = arith.constant 6 : i32
    %271 = arith.index_cast %c6_i32 : i32 to index
    %c0_71 = arith.constant 0 : index
    %c0_72 = arith.constant 0 : index
    %272 = vector.load %arg0[%271, %c0_71, %c0_72] : memref<8x8x128xf32, #tpu.memory_space<vmem>>, vector<1x8x128xf32>
    %273 = vector.shape_cast %272 : vector<1x8x128xf32> to vector<8x128xf32>
    %c0_73 = arith.constant 0 : index
    %c0_74 = arith.constant 0 : index
    %274 = vector.load %arg1[%c0_73, %c0_74] : memref<32x128xf32, #tpu.memory_space<vmem>>, vector<32x128xf32>
    %cst_75 = arith.constant dense<0.000000e+00> : vector<8x128xf32>
    %275 = tpu.matmul %248, %274, %cst_75 {dimension_numbers = #tpu.dot_dimension_numbers<[1], [0], [0], [1], [0, 0, 1, 1], [], []>, precision = #tpu.contract_precision<fp32>} : vector<8x32xf32>, vector<32x128xf32>, vector<8x128xf32> -> vector<8x128xf32>
    %276 = arith.addf %273, %275 : vector<8x128xf32>
    %277 = math.tanh %276 : vector<8x128xf32>
    %278 = arith.negf %276 : vector<8x128xf32>
    %279 = math.exp %278 : vector<8x128xf32>
    %cst_76 = arith.constant 1.000000e+00 : f32
    %280 = vector.broadcast %cst_76 : f32 to vector<8x128xf32>
    %281 = arith.addf %280, %279 : vector<8x128xf32>
    %282 = arith.divf %280, %281 : vector<8x128xf32>
    %283 = arith.select %5, %277, %282 : vector<8x128xi1>, vector<8x128xf32>
    %284 = vector.extract_strided_slice %283 {offsets = [0, 0], sizes = [8, 32], strides = [1, 1]} : vector<8x128xf32> to vector<8x32xf32>
    %285 = vector.extract_strided_slice %283 {offsets = [0, 32], sizes = [8, 32], strides = [1, 1]} : vector<8x128xf32> to vector<8x32xf32>
    %286 = vector.extract_strided_slice %283 {offsets = [0, 64], sizes = [8, 32], strides = [1, 1]} : vector<8x128xf32> to vector<8x32xf32>
    %287 = vector.extract_strided_slice %283 {offsets = [0, 96], sizes = [8, 32], strides = [1, 1]} : vector<8x128xf32> to vector<8x32xf32>
    %288 = arith.mulf %285, %246 : vector<8x32xf32>
    %289 = arith.mulf %284, %286 : vector<8x32xf32>
    %290 = arith.addf %288, %289 : vector<8x32xf32>
    %291 = math.tanh %290 : vector<8x32xf32>
    %292 = arith.mulf %287, %291 : vector<8x32xf32>
    %293 = tpu.concatenate %292, %270 in 1 : vector<8x32xf32>, vector<8x32xf32> -> vector<8x64xf32>
    %c0_77 = arith.constant 0 : index
    %c0_78 = arith.constant 0 : index
    %294 = vector.load %arg2[%c0_77, %c0_78] : memref<64x128xf32, #tpu.memory_space<vmem>>, vector<64x128xf32>
    %cst_79 = arith.constant dense<0.000000e+00> : vector<8x128xf32>
    %295 = tpu.matmul %293, %294, %cst_79 {dimension_numbers = #tpu.dot_dimension_numbers<[1], [0], [0], [1], [0, 0, 1, 1], [], []>, precision = #tpu.contract_precision<fp32>} : vector<8x64xf32>, vector<64x128xf32>, vector<8x128xf32> -> vector<8x128xf32>
    %c0_80 = arith.constant 0 : index
    %c0_81 = arith.constant 0 : index
    %296 = vector.load %arg3[%c0_80, %c0_81] : memref<1x128xf32, #tpu.memory_space<vmem>>, vector<1x128xf32>
    %297 = vector.broadcast %296 : vector<1x128xf32> to vector<8x128xf32>
    %298 = arith.addf %295, %297 : vector<8x128xf32>
    %299 = math.tanh %298 : vector<8x128xf32>
    %300 = arith.negf %298 : vector<8x128xf32>
    %301 = math.exp %300 : vector<8x128xf32>
    %cst_82 = arith.constant 1.000000e+00 : f32
    %302 = vector.broadcast %cst_82 : f32 to vector<8x128xf32>
    %303 = arith.addf %302, %301 : vector<8x128xf32>
    %304 = arith.divf %302, %303 : vector<8x128xf32>
    %305 = arith.select %5, %299, %304 : vector<8x128xi1>, vector<8x128xf32>
    %306 = vector.extract_strided_slice %305 {offsets = [0, 0], sizes = [8, 32], strides = [1, 1]} : vector<8x128xf32> to vector<8x32xf32>
    %307 = vector.extract_strided_slice %305 {offsets = [0, 32], sizes = [8, 32], strides = [1, 1]} : vector<8x128xf32> to vector<8x32xf32>
    %308 = vector.extract_strided_slice %305 {offsets = [0, 64], sizes = [8, 32], strides = [1, 1]} : vector<8x128xf32> to vector<8x32xf32>
    %309 = vector.extract_strided_slice %305 {offsets = [0, 96], sizes = [8, 32], strides = [1, 1]} : vector<8x128xf32> to vector<8x32xf32>
    %310 = arith.mulf %307, %268 : vector<8x32xf32>
    %311 = arith.mulf %306, %308 : vector<8x32xf32>
    %312 = arith.addf %310, %311 : vector<8x32xf32>
    %313 = math.tanh %312 : vector<8x32xf32>
    %314 = arith.mulf %309, %313 : vector<8x32xf32>
    %c7_i32 = arith.constant 7 : i32
    %315 = arith.index_cast %c7_i32 : i32 to index
    %c0_83 = arith.constant 0 : index
    %c0_84 = arith.constant 0 : index
    %316 = vector.load %arg0[%315, %c0_83, %c0_84] : memref<8x8x128xf32, #tpu.memory_space<vmem>>, vector<1x8x128xf32>
    %317 = vector.shape_cast %316 : vector<1x8x128xf32> to vector<8x128xf32>
    %c0_85 = arith.constant 0 : index
    %c0_86 = arith.constant 0 : index
    %318 = vector.load %arg1[%c0_85, %c0_86] : memref<32x128xf32, #tpu.memory_space<vmem>>, vector<32x128xf32>
    %cst_87 = arith.constant dense<0.000000e+00> : vector<8x128xf32>
    %319 = tpu.matmul %292, %318, %cst_87 {dimension_numbers = #tpu.dot_dimension_numbers<[1], [0], [0], [1], [0, 0, 1, 1], [], []>, precision = #tpu.contract_precision<fp32>} : vector<8x32xf32>, vector<32x128xf32>, vector<8x128xf32> -> vector<8x128xf32>
    %320 = arith.addf %317, %319 : vector<8x128xf32>
    %321 = math.tanh %320 : vector<8x128xf32>
    %322 = arith.negf %320 : vector<8x128xf32>
    %323 = math.exp %322 : vector<8x128xf32>
    %cst_88 = arith.constant 1.000000e+00 : f32
    %324 = vector.broadcast %cst_88 : f32 to vector<8x128xf32>
    %325 = arith.addf %324, %323 : vector<8x128xf32>
    %326 = arith.divf %324, %325 : vector<8x128xf32>
    %327 = arith.select %5, %321, %326 : vector<8x128xi1>, vector<8x128xf32>
    %328 = vector.extract_strided_slice %327 {offsets = [0, 0], sizes = [8, 32], strides = [1, 1]} : vector<8x128xf32> to vector<8x32xf32>
    %329 = vector.extract_strided_slice %327 {offsets = [0, 32], sizes = [8, 32], strides = [1, 1]} : vector<8x128xf32> to vector<8x32xf32>
    %330 = vector.extract_strided_slice %327 {offsets = [0, 64], sizes = [8, 32], strides = [1, 1]} : vector<8x128xf32> to vector<8x32xf32>
    %331 = vector.extract_strided_slice %327 {offsets = [0, 96], sizes = [8, 32], strides = [1, 1]} : vector<8x128xf32> to vector<8x32xf32>
    %332 = arith.mulf %329, %290 : vector<8x32xf32>
    %333 = arith.mulf %328, %330 : vector<8x32xf32>
    %334 = arith.addf %332, %333 : vector<8x32xf32>
    %335 = math.tanh %334 : vector<8x32xf32>
    %336 = arith.mulf %331, %335 : vector<8x32xf32>
    %337 = tpu.concatenate %336, %314 in 1 : vector<8x32xf32>, vector<8x32xf32> -> vector<8x64xf32>
    %c0_89 = arith.constant 0 : index
    %c0_90 = arith.constant 0 : index
    %338 = vector.load %arg2[%c0_89, %c0_90] : memref<64x128xf32, #tpu.memory_space<vmem>>, vector<64x128xf32>
    %cst_91 = arith.constant dense<0.000000e+00> : vector<8x128xf32>
    %339 = tpu.matmul %337, %338, %cst_91 {dimension_numbers = #tpu.dot_dimension_numbers<[1], [0], [0], [1], [0, 0, 1, 1], [], []>, precision = #tpu.contract_precision<fp32>} : vector<8x64xf32>, vector<64x128xf32>, vector<8x128xf32> -> vector<8x128xf32>
    %c0_92 = arith.constant 0 : index
    %c0_93 = arith.constant 0 : index
    %340 = vector.load %arg3[%c0_92, %c0_93] : memref<1x128xf32, #tpu.memory_space<vmem>>, vector<1x128xf32>
    %341 = vector.broadcast %340 : vector<1x128xf32> to vector<8x128xf32>
    %342 = arith.addf %339, %341 : vector<8x128xf32>
    %343 = math.tanh %342 : vector<8x128xf32>
    %344 = arith.negf %342 : vector<8x128xf32>
    %345 = math.exp %344 : vector<8x128xf32>
    %cst_94 = arith.constant 1.000000e+00 : f32
    %346 = vector.broadcast %cst_94 : f32 to vector<8x128xf32>
    %347 = arith.addf %346, %345 : vector<8x128xf32>
    %348 = arith.divf %346, %347 : vector<8x128xf32>
    %349 = arith.select %5, %343, %348 : vector<8x128xi1>, vector<8x128xf32>
    %350 = vector.extract_strided_slice %349 {offsets = [0, 0], sizes = [8, 32], strides = [1, 1]} : vector<8x128xf32> to vector<8x32xf32>
    %351 = vector.extract_strided_slice %349 {offsets = [0, 32], sizes = [8, 32], strides = [1, 1]} : vector<8x128xf32> to vector<8x32xf32>
    %352 = vector.extract_strided_slice %349 {offsets = [0, 64], sizes = [8, 32], strides = [1, 1]} : vector<8x128xf32> to vector<8x32xf32>
    %353 = vector.extract_strided_slice %349 {offsets = [0, 96], sizes = [8, 32], strides = [1, 1]} : vector<8x128xf32> to vector<8x32xf32>
    %354 = arith.mulf %351, %312 : vector<8x32xf32>
    %355 = arith.mulf %350, %352 : vector<8x32xf32>
    %356 = arith.addf %354, %355 : vector<8x32xf32>
    %357 = math.tanh %356 : vector<8x32xf32>
    %358 = arith.mulf %353, %357 : vector<8x32xf32>
    %c8_i32 = arith.constant 8 : i32
    %c0_95 = arith.constant 0 : index
    %c0_96 = arith.constant 0 : index
    %c0_97 = arith.constant 0 : index
    %359 = vector.load %arg4[%c0_95, %c0_96, %c0_97] : memref<2x8x32xf32, #tpu.memory_space<vmem>>, vector<1x8x32xf32>
    %360 = vector.shape_cast %359 : vector<1x8x32xf32> to vector<8x32xf32>
    %361 = vector.shape_cast %336 : vector<8x32xf32> to vector<1x8x32xf32>
    tpu.vector_store %arg4[%c0_95, %c0_96, %c0_97], %361 {strides = array<i32>} : memref<2x8x32xf32, #tpu.memory_space<vmem>>, vector<1x8x32xf32>,
    %c0_98 = arith.constant 0 : index
    %c0_99 = arith.constant 0 : index
    %c0_100 = arith.constant 0 : index
    %362 = vector.load %arg5[%c0_98, %c0_99, %c0_100] : memref<2x8x32xf32, #tpu.memory_space<vmem>>, vector<1x8x32xf32>
    %363 = vector.shape_cast %362 : vector<1x8x32xf32> to vector<8x32xf32>
    %364 = vector.shape_cast %334 : vector<8x32xf32> to vector<1x8x32xf32>
    tpu.vector_store %arg5[%c0_98, %c0_99, %c0_100], %364 {strides = array<i32>} : memref<2x8x32xf32, #tpu.memory_space<vmem>>, vector<1x8x32xf32>,
    %c1 = arith.constant 1 : index
    %c0_101 = arith.constant 0 : index
    %c0_102 = arith.constant 0 : index
    %365 = vector.load %arg4[%c1, %c0_101, %c0_102] : memref<2x8x32xf32, #tpu.memory_space<vmem>>, vector<1x8x32xf32>
    %366 = vector.shape_cast %365 : vector<1x8x32xf32> to vector<8x32xf32>
    %367 = vector.shape_cast %358 : vector<8x32xf32> to vector<1x8x32xf32>
    tpu.vector_store %arg4[%c1, %c0_101, %c0_102], %367 {strides = array<i32>} : memref<2x8x32xf32, #tpu.memory_space<vmem>>, vector<1x8x32xf32>,
    %c1_103 = arith.constant 1 : index
    %c0_104 = arith.constant 0 : index
    %c0_105 = arith.constant 0 : index
    %368 = vector.load %arg5[%c1_103, %c0_104, %c0_105] : memref<2x8x32xf32, #tpu.memory_space<vmem>>, vector<1x8x32xf32>
    %369 = vector.shape_cast %368 : vector<1x8x32xf32> to vector<8x32xf32>
    %370 = vector.shape_cast %356 : vector<8x32xf32> to vector<1x8x32xf32>
    tpu.vector_store %arg5[%c1_103, %c0_104, %c0_105], %370 {strides = array<i32>} : memref<2x8x32xf32, #tpu.memory_space<vmem>>, vector<1x8x32xf32>,
    return
  }
}

module attributes {stable_mosaic.version = 11 : i64} {
  func.func @kernel(%arg0: memref<4x1xf32, #tpu.memory_space<vmem>>, %arg1: memref<4x8x1xf32, #tpu.memory_space<vmem>>, %arg2: memref<2x8x32xf32, #tpu.memory_space<vmem>>, %arg3: memref<2x8x32xf32, #tpu.memory_space<vmem>>, %arg4: memref<1x128xf32, #tpu.memory_space<vmem>>, %arg5: memref<32x128xf32, #tpu.memory_space<vmem>>, %arg6: memref<1x128xf32, #tpu.memory_space<vmem>>, %arg7: memref<64x128xf32, #tpu.memory_space<vmem>>, %arg8: memref<1x128xf32, #tpu.memory_space<vmem>>, %arg9: memref<1x32xf32, #tpu.memory_space<vmem>>, %arg10: memref<1x1xf32, #tpu.memory_space<vmem>>, %arg11: memref<8x4xf32, #tpu.memory_space<vmem>>) attributes {dimension_semantics = [], scalar_prefetch = 0 : i64, scratch_operands = 0 : i64, tpu.core_type = #tpu.core_type<tc>} {
    %0 = tpu.iota {dimensions = array<i32: 1>} : vector<8x128xi32>
    %c64_i32 = arith.constant 64 : i32
    %1 = vector.broadcast %c64_i32 : i32 to vector<8x128xi32>
    %2 = arith.cmpi sge, %0, %1 : vector<8x128xi32>
    %c96_i32 = arith.constant 96 : i32
    %3 = vector.broadcast %c96_i32 : i32 to vector<8x128xi32>
    %4 = arith.cmpi slt, %0, %3 : vector<8x128xi32>
    %5 = arith.andi %2, %4 : vector<8x128xi1>
    %c0 = arith.constant 0 : index
    %c0_0 = arith.constant 0 : index
    %c0_1 = arith.constant 0 : index
    %6 = vector.load %arg2[%c0, %c0_0, %c0_1] : memref<2x8x32xf32, #tpu.memory_space<vmem>>, vector<1x8x32xf32>
    %7 = vector.shape_cast %6 : vector<1x8x32xf32> to vector<8x32xf32>
    %c1 = arith.constant 1 : index
    %c0_2 = arith.constant 0 : index
    %c0_3 = arith.constant 0 : index
    %8 = vector.load %arg2[%c1, %c0_2, %c0_3] : memref<2x8x32xf32, #tpu.memory_space<vmem>>, vector<1x8x32xf32>
    %9 = vector.shape_cast %8 : vector<1x8x32xf32> to vector<8x32xf32>
    %c0_4 = arith.constant 0 : index
    %c0_5 = arith.constant 0 : index
    %c0_6 = arith.constant 0 : index
    %10 = vector.load %arg3[%c0_4, %c0_5, %c0_6] : memref<2x8x32xf32, #tpu.memory_space<vmem>>, vector<1x8x32xf32>
    %11 = vector.shape_cast %10 : vector<1x8x32xf32> to vector<8x32xf32>
    %c1_7 = arith.constant 1 : index
    %c0_8 = arith.constant 0 : index
    %c0_9 = arith.constant 0 : index
    %12 = vector.load %arg3[%c1_7, %c0_8, %c0_9] : memref<2x8x32xf32, #tpu.memory_space<vmem>>, vector<1x8x32xf32>
    %13 = vector.shape_cast %12 : vector<1x8x32xf32> to vector<8x32xf32>
    %c0_10 = arith.constant 0 : index
    %c0_11 = arith.constant 0 : index
    %c0_12 = arith.constant 0 : index
    %14 = vector.load %arg1[%c0_10, %c0_11, %c0_12] : memref<4x8x1xf32, #tpu.memory_space<vmem>>, vector<1x8x1xf32>
    %15 = vector.shape_cast %14 : vector<1x8x1xf32> to vector<8x1xf32>
    %c0_13 = arith.constant 0 : index
    %c0_14 = arith.constant 0 : index
    %16 = vector.load %arg4[%c0_13, %c0_14] : memref<1x128xf32, #tpu.memory_space<vmem>>, vector<1x128xf32>
    %17 = vector.broadcast %15 : vector<8x1xf32> to vector<8x128xf32>
    %18 = vector.broadcast %16 : vector<1x128xf32> to vector<8x128xf32>
    %19 = arith.mulf %17, %18 : vector<8x128xf32>
    %c0_15 = arith.constant 0 : index
    %c0_16 = arith.constant 0 : index
    %20 = vector.load %arg5[%c0_15, %c0_16] : memref<32x128xf32, #tpu.memory_space<vmem>>, vector<32x128xf32>
    %cst = arith.constant dense<0.000000e+00> : vector<8x128xf32>
    %21 = tpu.matmul %7, %20, %cst {dimension_numbers = #tpu.dot_dimension_numbers<[1], [0], [0], [1], [0, 0, 1, 1], [], []>, precision = #tpu.contract_precision<fp32>} : vector<8x32xf32>, vector<32x128xf32>, vector<8x128xf32> -> vector<8x128xf32>
    %22 = arith.addf %19, %21 : vector<8x128xf32>
    %c0_17 = arith.constant 0 : index
    %c0_18 = arith.constant 0 : index
    %23 = vector.load %arg6[%c0_17, %c0_18] : memref<1x128xf32, #tpu.memory_space<vmem>>, vector<1x128xf32>
    %24 = vector.broadcast %23 : vector<1x128xf32> to vector<8x128xf32>
    %25 = arith.addf %22, %24 : vector<8x128xf32>
    %26 = math.tanh %25 : vector<8x128xf32>
    %27 = arith.negf %25 : vector<8x128xf32>
    %28 = math.exp %27 : vector<8x128xf32>
    %cst_19 = arith.constant 1.000000e+00 : f32
    %29 = vector.broadcast %cst_19 : f32 to vector<8x128xf32>
    %30 = arith.addf %29, %28 : vector<8x128xf32>
    %31 = arith.divf %29, %30 : vector<8x128xf32>
    %32 = arith.select %5, %26, %31 : vector<8x128xi1>, vector<8x128xf32>
    %33 = vector.extract_strided_slice %32 {offsets = [0, 0], sizes = [8, 32], strides = [1, 1]} : vector<8x128xf32> to vector<8x32xf32>
    %34 = vector.extract_strided_slice %32 {offsets = [0, 32], sizes = [8, 32], strides = [1, 1]} : vector<8x128xf32> to vector<8x32xf32>
    %35 = vector.extract_strided_slice %32 {offsets = [0, 64], sizes = [8, 32], strides = [1, 1]} : vector<8x128xf32> to vector<8x32xf32>
    %36 = vector.extract_strided_slice %32 {offsets = [0, 96], sizes = [8, 32], strides = [1, 1]} : vector<8x128xf32> to vector<8x32xf32>
    %37 = arith.mulf %34, %11 : vector<8x32xf32>
    %38 = arith.mulf %33, %35 : vector<8x32xf32>
    %39 = arith.addf %37, %38 : vector<8x32xf32>
    %40 = math.tanh %39 : vector<8x32xf32>
    %41 = arith.mulf %36, %40 : vector<8x32xf32>
    %42 = tpu.concatenate %41, %9 in 1 : vector<8x32xf32>, vector<8x32xf32> -> vector<8x64xf32>
    %c0_20 = arith.constant 0 : index
    %c0_21 = arith.constant 0 : index
    %43 = vector.load %arg7[%c0_20, %c0_21] : memref<64x128xf32, #tpu.memory_space<vmem>>, vector<64x128xf32>
    %cst_22 = arith.constant dense<0.000000e+00> : vector<8x128xf32>
    %44 = tpu.matmul %42, %43, %cst_22 {dimension_numbers = #tpu.dot_dimension_numbers<[1], [0], [0], [1], [0, 0, 1, 1], [], []>, precision = #tpu.contract_precision<fp32>} : vector<8x64xf32>, vector<64x128xf32>, vector<8x128xf32> -> vector<8x128xf32>
    %c0_23 = arith.constant 0 : index
    %c0_24 = arith.constant 0 : index
    %45 = vector.load %arg8[%c0_23, %c0_24] : memref<1x128xf32, #tpu.memory_space<vmem>>, vector<1x128xf32>
    %46 = vector.broadcast %45 : vector<1x128xf32> to vector<8x128xf32>
    %47 = arith.addf %44, %46 : vector<8x128xf32>
    %48 = math.tanh %47 : vector<8x128xf32>
    %49 = arith.negf %47 : vector<8x128xf32>
    %50 = math.exp %49 : vector<8x128xf32>
    %cst_25 = arith.constant 1.000000e+00 : f32
    %51 = vector.broadcast %cst_25 : f32 to vector<8x128xf32>
    %52 = arith.addf %51, %50 : vector<8x128xf32>
    %53 = arith.divf %51, %52 : vector<8x128xf32>
    %54 = arith.select %5, %48, %53 : vector<8x128xi1>, vector<8x128xf32>
    %55 = vector.extract_strided_slice %54 {offsets = [0, 0], sizes = [8, 32], strides = [1, 1]} : vector<8x128xf32> to vector<8x32xf32>
    %56 = vector.extract_strided_slice %54 {offsets = [0, 32], sizes = [8, 32], strides = [1, 1]} : vector<8x128xf32> to vector<8x32xf32>
    %57 = vector.extract_strided_slice %54 {offsets = [0, 64], sizes = [8, 32], strides = [1, 1]} : vector<8x128xf32> to vector<8x32xf32>
    %58 = vector.extract_strided_slice %54 {offsets = [0, 96], sizes = [8, 32], strides = [1, 1]} : vector<8x128xf32> to vector<8x32xf32>
    %59 = arith.mulf %56, %13 : vector<8x32xf32>
    %60 = arith.mulf %55, %57 : vector<8x32xf32>
    %61 = arith.addf %59, %60 : vector<8x32xf32>
    %62 = math.tanh %61 : vector<8x32xf32>
    %63 = arith.mulf %58, %62 : vector<8x32xf32>
    %c0_26 = arith.constant 0 : index
    %c0_27 = arith.constant 0 : index
    %64 = vector.load %arg9[%c0_26, %c0_27] : memref<1x32xf32, #tpu.memory_space<vmem>>, vector<1x32xf32>
    %65 = vector.broadcast %64 : vector<1x32xf32> to vector<8x32xf32>
    %66 = arith.mulf %63, %65 : vector<8x32xf32>
    %cst_28 = arith.constant dense<0.000000e+00> : vector<8xf32>
    %67 = vector.multi_reduction <add>, %66, %cst_28 [1] : vector<8x32xf32> to vector<8xf32>
    %68 = vector.shape_cast %67 : vector<8xf32> to vector<8x1xf32>
    %c0_29 = arith.constant 0 : index
    %c0_30 = arith.constant 0 : index
    %69 = vector.load %arg10[%c0_29, %c0_30] : memref<1x1xf32, #tpu.memory_space<vmem>>, vector<1x1xf32>
    %70 = vector.broadcast %69 : vector<1x1xf32> to vector<8x1xf32>
    %71 = arith.addf %68, %70 : vector<8x1xf32>
    %c0_31 = arith.constant 0 : index
    %c0_32 = arith.constant 0 : index
    %72 = vector.load %arg0[%c0_31, %c0_32] : memref<4x1xf32, #tpu.memory_space<vmem>>, vector<1x1xf32>
    %73 = vector.shape_cast %72 : vector<1x1xf32> to vector<1xf32>
    %c1_33 = arith.constant 1 : index
    %c0_34 = arith.constant 0 : index
    %c0_35 = arith.constant 0 : index
    %74 = vector.load %arg1[%c1_33, %c0_34, %c0_35] : memref<4x8x1xf32, #tpu.memory_space<vmem>>, vector<1x8x1xf32>
    %75 = vector.shape_cast %74 : vector<1x8x1xf32> to vector<8x1xf32>
    %76 = vector.shape_cast %73 : vector<1xf32> to vector<1x1xf32>
    %77 = vector.broadcast %76 : vector<1x1xf32> to vector<8x1xf32>
    %78 = arith.mulf %77, %75 : vector<8x1xf32>
    %cst_36 = arith.constant 1.000000e+00 : f32
    %79 = vector.broadcast %cst_36 : f32 to vector<1xf32>
    %80 = arith.subf %79, %73 : vector<1xf32>
    %81 = vector.shape_cast %80 : vector<1xf32> to vector<1x1xf32>
    %82 = vector.broadcast %81 : vector<1x1xf32> to vector<8x1xf32>
    %83 = arith.mulf %82, %71 : vector<8x1xf32>
    %84 = arith.addf %78, %83 : vector<8x1xf32>
    %c0_37 = arith.constant 0 : index
    %c0_38 = arith.constant 0 : index
    %85 = vector.load %arg4[%c0_37, %c0_38] : memref<1x128xf32, #tpu.memory_space<vmem>>, vector<1x128xf32>
    %86 = vector.broadcast %84 : vector<8x1xf32> to vector<8x128xf32>
    %87 = vector.broadcast %85 : vector<1x128xf32> to vector<8x128xf32>
    %88 = arith.mulf %86, %87 : vector<8x128xf32>
    %c0_39 = arith.constant 0 : index
    %c0_40 = arith.constant 0 : index
    %89 = vector.load %arg5[%c0_39, %c0_40] : memref<32x128xf32, #tpu.memory_space<vmem>>, vector<32x128xf32>
    %cst_41 = arith.constant dense<0.000000e+00> : vector<8x128xf32>
    %90 = tpu.matmul %41, %89, %cst_41 {dimension_numbers = #tpu.dot_dimension_numbers<[1], [0], [0], [1], [0, 0, 1, 1], [], []>, precision = #tpu.contract_precision<fp32>} : vector<8x32xf32>, vector<32x128xf32>, vector<8x128xf32> -> vector<8x128xf32>
    %91 = arith.addf %88, %90 : vector<8x128xf32>
    %c0_42 = arith.constant 0 : index
    %c0_43 = arith.constant 0 : index
    %92 = vector.load %arg6[%c0_42, %c0_43] : memref<1x128xf32, #tpu.memory_space<vmem>>, vector<1x128xf32>
    %93 = vector.broadcast %92 : vector<1x128xf32> to vector<8x128xf32>
    %94 = arith.addf %91, %93 : vector<8x128xf32>
    %95 = math.tanh %94 : vector<8x128xf32>
    %96 = arith.negf %94 : vector<8x128xf32>
    %97 = math.exp %96 : vector<8x128xf32>
    %cst_44 = arith.constant 1.000000e+00 : f32
    %98 = vector.broadcast %cst_44 : f32 to vector<8x128xf32>
    %99 = arith.addf %98, %97 : vector<8x128xf32>
    %100 = arith.divf %98, %99 : vector<8x128xf32>
    %101 = arith.select %5, %95, %100 : vector<8x128xi1>, vector<8x128xf32>
    %102 = vector.extract_strided_slice %101 {offsets = [0, 0], sizes = [8, 32], strides = [1, 1]} : vector<8x128xf32> to vector<8x32xf32>
    %103 = vector.extract_strided_slice %101 {offsets = [0, 32], sizes = [8, 32], strides = [1, 1]} : vector<8x128xf32> to vector<8x32xf32>
    %104 = vector.extract_strided_slice %101 {offsets = [0, 64], sizes = [8, 32], strides = [1, 1]} : vector<8x128xf32> to vector<8x32xf32>
    %105 = vector.extract_strided_slice %101 {offsets = [0, 96], sizes = [8, 32], strides = [1, 1]} : vector<8x128xf32> to vector<8x32xf32>
    %106 = arith.mulf %103, %39 : vector<8x32xf32>
    %107 = arith.mulf %102, %104 : vector<8x32xf32>
    %108 = arith.addf %106, %107 : vector<8x32xf32>
    %109 = math.tanh %108 : vector<8x32xf32>
    %110 = arith.mulf %105, %109 : vector<8x32xf32>
    %111 = tpu.concatenate %110, %63 in 1 : vector<8x32xf32>, vector<8x32xf32> -> vector<8x64xf32>
    %c0_45 = arith.constant 0 : index
    %c0_46 = arith.constant 0 : index
    %112 = vector.load %arg7[%c0_45, %c0_46] : memref<64x128xf32, #tpu.memory_space<vmem>>, vector<64x128xf32>
    %cst_47 = arith.constant dense<0.000000e+00> : vector<8x128xf32>
    %113 = tpu.matmul %111, %112, %cst_47 {dimension_numbers = #tpu.dot_dimension_numbers<[1], [0], [0], [1], [0, 0, 1, 1], [], []>, precision = #tpu.contract_precision<fp32>} : vector<8x64xf32>, vector<64x128xf32>, vector<8x128xf32> -> vector<8x128xf32>
    %c0_48 = arith.constant 0 : index
    %c0_49 = arith.constant 0 : index
    %114 = vector.load %arg8[%c0_48, %c0_49] : memref<1x128xf32, #tpu.memory_space<vmem>>, vector<1x128xf32>
    %115 = vector.broadcast %114 : vector<1x128xf32> to vector<8x128xf32>
    %116 = arith.addf %113, %115 : vector<8x128xf32>
    %117 = math.tanh %116 : vector<8x128xf32>
    %118 = arith.negf %116 : vector<8x128xf32>
    %119 = math.exp %118 : vector<8x128xf32>
    %cst_50 = arith.constant 1.000000e+00 : f32
    %120 = vector.broadcast %cst_50 : f32 to vector<8x128xf32>
    %121 = arith.addf %120, %119 : vector<8x128xf32>
    %122 = arith.divf %120, %121 : vector<8x128xf32>
    %123 = arith.select %5, %117, %122 : vector<8x128xi1>, vector<8x128xf32>
    %124 = vector.extract_strided_slice %123 {offsets = [0, 0], sizes = [8, 32], strides = [1, 1]} : vector<8x128xf32> to vector<8x32xf32>
    %125 = vector.extract_strided_slice %123 {offsets = [0, 32], sizes = [8, 32], strides = [1, 1]} : vector<8x128xf32> to vector<8x32xf32>
    %126 = vector.extract_strided_slice %123 {offsets = [0, 64], sizes = [8, 32], strides = [1, 1]} : vector<8x128xf32> to vector<8x32xf32>
    %127 = vector.extract_strided_slice %123 {offsets = [0, 96], sizes = [8, 32], strides = [1, 1]} : vector<8x128xf32> to vector<8x32xf32>
    %128 = arith.mulf %125, %61 : vector<8x32xf32>
    %129 = arith.mulf %124, %126 : vector<8x32xf32>
    %130 = arith.addf %128, %129 : vector<8x32xf32>
    %131 = math.tanh %130 : vector<8x32xf32>
    %132 = arith.mulf %127, %131 : vector<8x32xf32>
    %c0_51 = arith.constant 0 : index
    %c0_52 = arith.constant 0 : index
    %133 = vector.load %arg9[%c0_51, %c0_52] : memref<1x32xf32, #tpu.memory_space<vmem>>, vector<1x32xf32>
    %134 = vector.broadcast %133 : vector<1x32xf32> to vector<8x32xf32>
    %135 = arith.mulf %132, %134 : vector<8x32xf32>
    %cst_53 = arith.constant dense<0.000000e+00> : vector<8xf32>
    %136 = vector.multi_reduction <add>, %135, %cst_53 [1] : vector<8x32xf32> to vector<8xf32>
    %137 = vector.shape_cast %136 : vector<8xf32> to vector<8x1xf32>
    %c0_54 = arith.constant 0 : index
    %c0_55 = arith.constant 0 : index
    %138 = vector.load %arg10[%c0_54, %c0_55] : memref<1x1xf32, #tpu.memory_space<vmem>>, vector<1x1xf32>
    %139 = vector.broadcast %138 : vector<1x1xf32> to vector<8x1xf32>
    %140 = arith.addf %137, %139 : vector<8x1xf32>
    %c1_56 = arith.constant 1 : index
    %c0_57 = arith.constant 0 : index
    %141 = vector.load %arg0[%c1_56, %c0_57] : memref<4x1xf32, #tpu.memory_space<vmem>>, vector<1x1xf32>
    %142 = vector.shape_cast %141 : vector<1x1xf32> to vector<1xf32>
    %c2 = arith.constant 2 : index
    %c0_58 = arith.constant 0 : index
    %c0_59 = arith.constant 0 : index
    %143 = vector.load %arg1[%c2, %c0_58, %c0_59] : memref<4x8x1xf32, #tpu.memory_space<vmem>>, vector<1x8x1xf32>
    %144 = vector.shape_cast %143 : vector<1x8x1xf32> to vector<8x1xf32>
    %145 = vector.shape_cast %142 : vector<1xf32> to vector<1x1xf32>
    %146 = vector.broadcast %145 : vector<1x1xf32> to vector<8x1xf32>
    %147 = arith.mulf %146, %144 : vector<8x1xf32>
    %cst_60 = arith.constant 1.000000e+00 : f32
    %148 = vector.broadcast %cst_60 : f32 to vector<1xf32>
    %149 = arith.subf %148, %142 : vector<1xf32>
    %150 = vector.shape_cast %149 : vector<1xf32> to vector<1x1xf32>
    %151 = vector.broadcast %150 : vector<1x1xf32> to vector<8x1xf32>
    %152 = arith.mulf %151, %140 : vector<8x1xf32>
    %153 = arith.addf %147, %152 : vector<8x1xf32>
    %c0_61 = arith.constant 0 : index
    %c0_62 = arith.constant 0 : index
    %154 = vector.load %arg4[%c0_61, %c0_62] : memref<1x128xf32, #tpu.memory_space<vmem>>, vector<1x128xf32>
    %155 = vector.broadcast %153 : vector<8x1xf32> to vector<8x128xf32>
    %156 = vector.broadcast %154 : vector<1x128xf32> to vector<8x128xf32>
    %157 = arith.mulf %155, %156 : vector<8x128xf32>
    %c0_63 = arith.constant 0 : index
    %c0_64 = arith.constant 0 : index
    %158 = vector.load %arg5[%c0_63, %c0_64] : memref<32x128xf32, #tpu.memory_space<vmem>>, vector<32x128xf32>
    %cst_65 = arith.constant dense<0.000000e+00> : vector<8x128xf32>
    %159 = tpu.matmul %110, %158, %cst_65 {dimension_numbers = #tpu.dot_dimension_numbers<[1], [0], [0], [1], [0, 0, 1, 1], [], []>, precision = #tpu.contract_precision<fp32>} : vector<8x32xf32>, vector<32x128xf32>, vector<8x128xf32> -> vector<8x128xf32>
    %160 = arith.addf %157, %159 : vector<8x128xf32>
    %c0_66 = arith.constant 0 : index
    %c0_67 = arith.constant 0 : index
    %161 = vector.load %arg6[%c0_66, %c0_67] : memref<1x128xf32, #tpu.memory_space<vmem>>, vector<1x128xf32>
    %162 = vector.broadcast %161 : vector<1x128xf32> to vector<8x128xf32>
    %163 = arith.addf %160, %162 : vector<8x128xf32>
    %164 = math.tanh %163 : vector<8x128xf32>
    %165 = arith.negf %163 : vector<8x128xf32>
    %166 = math.exp %165 : vector<8x128xf32>
    %cst_68 = arith.constant 1.000000e+00 : f32
    %167 = vector.broadcast %cst_68 : f32 to vector<8x128xf32>
    %168 = arith.addf %167, %166 : vector<8x128xf32>
    %169 = arith.divf %167, %168 : vector<8x128xf32>
    %170 = arith.select %5, %164, %169 : vector<8x128xi1>, vector<8x128xf32>
    %171 = vector.extract_strided_slice %170 {offsets = [0, 0], sizes = [8, 32], strides = [1, 1]} : vector<8x128xf32> to vector<8x32xf32>
    %172 = vector.extract_strided_slice %170 {offsets = [0, 32], sizes = [8, 32], strides = [1, 1]} : vector<8x128xf32> to vector<8x32xf32>
    %173 = vector.extract_strided_slice %170 {offsets = [0, 64], sizes = [8, 32], strides = [1, 1]} : vector<8x128xf32> to vector<8x32xf32>
    %174 = vector.extract_strided_slice %170 {offsets = [0, 96], sizes = [8, 32], strides = [1, 1]} : vector<8x128xf32> to vector<8x32xf32>
    %175 = arith.mulf %172, %108 : vector<8x32xf32>
    %176 = arith.mulf %171, %173 : vector<8x32xf32>
    %177 = arith.addf %175, %176 : vector<8x32xf32>
    %178 = math.tanh %177 : vector<8x32xf32>
    %179 = arith.mulf %174, %178 : vector<8x32xf32>
    %180 = tpu.concatenate %179, %132 in 1 : vector<8x32xf32>, vector<8x32xf32> -> vector<8x64xf32>
    %c0_69 = arith.constant 0 : index
    %c0_70 = arith.constant 0 : index
    %181 = vector.load %arg7[%c0_69, %c0_70] : memref<64x128xf32, #tpu.memory_space<vmem>>, vector<64x128xf32>
    %cst_71 = arith.constant dense<0.000000e+00> : vector<8x128xf32>
    %182 = tpu.matmul %180, %181, %cst_71 {dimension_numbers = #tpu.dot_dimension_numbers<[1], [0], [0], [1], [0, 0, 1, 1], [], []>, precision = #tpu.contract_precision<fp32>} : vector<8x64xf32>, vector<64x128xf32>, vector<8x128xf32> -> vector<8x128xf32>
    %c0_72 = arith.constant 0 : index
    %c0_73 = arith.constant 0 : index
    %183 = vector.load %arg8[%c0_72, %c0_73] : memref<1x128xf32, #tpu.memory_space<vmem>>, vector<1x128xf32>
    %184 = vector.broadcast %183 : vector<1x128xf32> to vector<8x128xf32>
    %185 = arith.addf %182, %184 : vector<8x128xf32>
    %186 = math.tanh %185 : vector<8x128xf32>
    %187 = arith.negf %185 : vector<8x128xf32>
    %188 = math.exp %187 : vector<8x128xf32>
    %cst_74 = arith.constant 1.000000e+00 : f32
    %189 = vector.broadcast %cst_74 : f32 to vector<8x128xf32>
    %190 = arith.addf %189, %188 : vector<8x128xf32>
    %191 = arith.divf %189, %190 : vector<8x128xf32>
    %192 = arith.select %5, %186, %191 : vector<8x128xi1>, vector<8x128xf32>
    %193 = vector.extract_strided_slice %192 {offsets = [0, 0], sizes = [8, 32], strides = [1, 1]} : vector<8x128xf32> to vector<8x32xf32>
    %194 = vector.extract_strided_slice %192 {offsets = [0, 32], sizes = [8, 32], strides = [1, 1]} : vector<8x128xf32> to vector<8x32xf32>
    %195 = vector.extract_strided_slice %192 {offsets = [0, 64], sizes = [8, 32], strides = [1, 1]} : vector<8x128xf32> to vector<8x32xf32>
    %196 = vector.extract_strided_slice %192 {offsets = [0, 96], sizes = [8, 32], strides = [1, 1]} : vector<8x128xf32> to vector<8x32xf32>
    %197 = arith.mulf %194, %130 : vector<8x32xf32>
    %198 = arith.mulf %193, %195 : vector<8x32xf32>
    %199 = arith.addf %197, %198 : vector<8x32xf32>
    %200 = math.tanh %199 : vector<8x32xf32>
    %201 = arith.mulf %196, %200 : vector<8x32xf32>
    %c0_75 = arith.constant 0 : index
    %c0_76 = arith.constant 0 : index
    %202 = vector.load %arg9[%c0_75, %c0_76] : memref<1x32xf32, #tpu.memory_space<vmem>>, vector<1x32xf32>
    %203 = vector.broadcast %202 : vector<1x32xf32> to vector<8x32xf32>
    %204 = arith.mulf %201, %203 : vector<8x32xf32>
    %cst_77 = arith.constant dense<0.000000e+00> : vector<8xf32>
    %205 = vector.multi_reduction <add>, %204, %cst_77 [1] : vector<8x32xf32> to vector<8xf32>
    %206 = vector.shape_cast %205 : vector<8xf32> to vector<8x1xf32>
    %c0_78 = arith.constant 0 : index
    %c0_79 = arith.constant 0 : index
    %207 = vector.load %arg10[%c0_78, %c0_79] : memref<1x1xf32, #tpu.memory_space<vmem>>, vector<1x1xf32>
    %208 = vector.broadcast %207 : vector<1x1xf32> to vector<8x1xf32>
    %209 = arith.addf %206, %208 : vector<8x1xf32>
    %c2_80 = arith.constant 2 : index
    %c0_81 = arith.constant 0 : index
    %210 = vector.load %arg0[%c2_80, %c0_81] : memref<4x1xf32, #tpu.memory_space<vmem>>, vector<1x1xf32>
    %211 = vector.shape_cast %210 : vector<1x1xf32> to vector<1xf32>
    %c3 = arith.constant 3 : index
    %c0_82 = arith.constant 0 : index
    %c0_83 = arith.constant 0 : index
    %212 = vector.load %arg1[%c3, %c0_82, %c0_83] : memref<4x8x1xf32, #tpu.memory_space<vmem>>, vector<1x8x1xf32>
    %213 = vector.shape_cast %212 : vector<1x8x1xf32> to vector<8x1xf32>
    %214 = vector.shape_cast %211 : vector<1xf32> to vector<1x1xf32>
    %215 = vector.broadcast %214 : vector<1x1xf32> to vector<8x1xf32>
    %216 = arith.mulf %215, %213 : vector<8x1xf32>
    %cst_84 = arith.constant 1.000000e+00 : f32
    %217 = vector.broadcast %cst_84 : f32 to vector<1xf32>
    %218 = arith.subf %217, %211 : vector<1xf32>
    %219 = vector.shape_cast %218 : vector<1xf32> to vector<1x1xf32>
    %220 = vector.broadcast %219 : vector<1x1xf32> to vector<8x1xf32>
    %221 = arith.mulf %220, %209 : vector<8x1xf32>
    %222 = arith.addf %216, %221 : vector<8x1xf32>
    %c0_85 = arith.constant 0 : index
    %c0_86 = arith.constant 0 : index
    %223 = vector.load %arg4[%c0_85, %c0_86] : memref<1x128xf32, #tpu.memory_space<vmem>>, vector<1x128xf32>
    %224 = vector.broadcast %222 : vector<8x1xf32> to vector<8x128xf32>
    %225 = vector.broadcast %223 : vector<1x128xf32> to vector<8x128xf32>
    %226 = arith.mulf %224, %225 : vector<8x128xf32>
    %c0_87 = arith.constant 0 : index
    %c0_88 = arith.constant 0 : index
    %227 = vector.load %arg5[%c0_87, %c0_88] : memref<32x128xf32, #tpu.memory_space<vmem>>, vector<32x128xf32>
    %cst_89 = arith.constant dense<0.000000e+00> : vector<8x128xf32>
    %228 = tpu.matmul %179, %227, %cst_89 {dimension_numbers = #tpu.dot_dimension_numbers<[1], [0], [0], [1], [0, 0, 1, 1], [], []>, precision = #tpu.contract_precision<fp32>} : vector<8x32xf32>, vector<32x128xf32>, vector<8x128xf32> -> vector<8x128xf32>
    %229 = arith.addf %226, %228 : vector<8x128xf32>
    %c0_90 = arith.constant 0 : index
    %c0_91 = arith.constant 0 : index
    %230 = vector.load %arg6[%c0_90, %c0_91] : memref<1x128xf32, #tpu.memory_space<vmem>>, vector<1x128xf32>
    %231 = vector.broadcast %230 : vector<1x128xf32> to vector<8x128xf32>
    %232 = arith.addf %229, %231 : vector<8x128xf32>
    %233 = math.tanh %232 : vector<8x128xf32>
    %234 = arith.negf %232 : vector<8x128xf32>
    %235 = math.exp %234 : vector<8x128xf32>
    %cst_92 = arith.constant 1.000000e+00 : f32
    %236 = vector.broadcast %cst_92 : f32 to vector<8x128xf32>
    %237 = arith.addf %236, %235 : vector<8x128xf32>
    %238 = arith.divf %236, %237 : vector<8x128xf32>
    %239 = arith.select %5, %233, %238 : vector<8x128xi1>, vector<8x128xf32>
    %240 = vector.extract_strided_slice %239 {offsets = [0, 0], sizes = [8, 32], strides = [1, 1]} : vector<8x128xf32> to vector<8x32xf32>
    %241 = vector.extract_strided_slice %239 {offsets = [0, 32], sizes = [8, 32], strides = [1, 1]} : vector<8x128xf32> to vector<8x32xf32>
    %242 = vector.extract_strided_slice %239 {offsets = [0, 64], sizes = [8, 32], strides = [1, 1]} : vector<8x128xf32> to vector<8x32xf32>
    %243 = vector.extract_strided_slice %239 {offsets = [0, 96], sizes = [8, 32], strides = [1, 1]} : vector<8x128xf32> to vector<8x32xf32>
    %244 = arith.mulf %241, %177 : vector<8x32xf32>
    %245 = arith.mulf %240, %242 : vector<8x32xf32>
    %246 = arith.addf %244, %245 : vector<8x32xf32>
    %247 = math.tanh %246 : vector<8x32xf32>
    %248 = arith.mulf %243, %247 : vector<8x32xf32>
    %249 = tpu.concatenate %248, %201 in 1 : vector<8x32xf32>, vector<8x32xf32> -> vector<8x64xf32>
    %c0_93 = arith.constant 0 : index
    %c0_94 = arith.constant 0 : index
    %250 = vector.load %arg7[%c0_93, %c0_94] : memref<64x128xf32, #tpu.memory_space<vmem>>, vector<64x128xf32>
    %cst_95 = arith.constant dense<0.000000e+00> : vector<8x128xf32>
    %251 = tpu.matmul %249, %250, %cst_95 {dimension_numbers = #tpu.dot_dimension_numbers<[1], [0], [0], [1], [0, 0, 1, 1], [], []>, precision = #tpu.contract_precision<fp32>} : vector<8x64xf32>, vector<64x128xf32>, vector<8x128xf32> -> vector<8x128xf32>
    %c0_96 = arith.constant 0 : index
    %c0_97 = arith.constant 0 : index
    %252 = vector.load %arg8[%c0_96, %c0_97] : memref<1x128xf32, #tpu.memory_space<vmem>>, vector<1x128xf32>
    %253 = vector.broadcast %252 : vector<1x128xf32> to vector<8x128xf32>
    %254 = arith.addf %251, %253 : vector<8x128xf32>
    %255 = math.tanh %254 : vector<8x128xf32>
    %256 = arith.negf %254 : vector<8x128xf32>
    %257 = math.exp %256 : vector<8x128xf32>
    %cst_98 = arith.constant 1.000000e+00 : f32
    %258 = vector.broadcast %cst_98 : f32 to vector<8x128xf32>
    %259 = arith.addf %258, %257 : vector<8x128xf32>
    %260 = arith.divf %258, %259 : vector<8x128xf32>
    %261 = arith.select %5, %255, %260 : vector<8x128xi1>, vector<8x128xf32>
    %262 = vector.extract_strided_slice %261 {offsets = [0, 0], sizes = [8, 32], strides = [1, 1]} : vector<8x128xf32> to vector<8x32xf32>
    %263 = vector.extract_strided_slice %261 {offsets = [0, 32], sizes = [8, 32], strides = [1, 1]} : vector<8x128xf32> to vector<8x32xf32>
    %264 = vector.extract_strided_slice %261 {offsets = [0, 64], sizes = [8, 32], strides = [1, 1]} : vector<8x128xf32> to vector<8x32xf32>
    %265 = vector.extract_strided_slice %261 {offsets = [0, 96], sizes = [8, 32], strides = [1, 1]} : vector<8x128xf32> to vector<8x32xf32>
    %266 = arith.mulf %263, %199 : vector<8x32xf32>
    %267 = arith.mulf %262, %264 : vector<8x32xf32>
    %268 = arith.addf %266, %267 : vector<8x32xf32>
    %269 = math.tanh %268 : vector<8x32xf32>
    %270 = arith.mulf %265, %269 : vector<8x32xf32>
    %c0_99 = arith.constant 0 : index
    %c0_100 = arith.constant 0 : index
    %271 = vector.load %arg9[%c0_99, %c0_100] : memref<1x32xf32, #tpu.memory_space<vmem>>, vector<1x32xf32>
    %272 = vector.broadcast %271 : vector<1x32xf32> to vector<8x32xf32>
    %273 = arith.mulf %270, %272 : vector<8x32xf32>
    %cst_101 = arith.constant dense<0.000000e+00> : vector<8xf32>
    %274 = vector.multi_reduction <add>, %273, %cst_101 [1] : vector<8x32xf32> to vector<8xf32>
    %275 = vector.shape_cast %274 : vector<8xf32> to vector<8x1xf32>
    %c0_102 = arith.constant 0 : index
    %c0_103 = arith.constant 0 : index
    %276 = vector.load %arg10[%c0_102, %c0_103] : memref<1x1xf32, #tpu.memory_space<vmem>>, vector<1x1xf32>
    %277 = vector.broadcast %276 : vector<1x1xf32> to vector<8x1xf32>
    %278 = arith.addf %275, %277 : vector<8x1xf32>
    %279 = tpu.concatenate %71, %140, %209, %278 in 1 : vector<8x1xf32>, vector<8x1xf32>, vector<8x1xf32>, vector<8x1xf32> -> vector<8x4xf32>
    %c0_104 = arith.constant 0 : index
    %c0_105 = arith.constant 0 : index
    %280 = vector.load %arg11[%c0_104, %c0_105] : memref<8x4xf32, #tpu.memory_space<vmem>>, vector<8x4xf32>
    tpu.vector_store %arg11[%c0_104, %c0_105], %279 {strides = array<i32>} : memref<8x4xf32, #tpu.memory_space<vmem>>, vector<8x4xf32>,
    return
  }
}

</mosaic_0001>

<bundles_post_ra>
// kernel: seq2seq_forward_pallas.3
= control target key start
LH: loop header
LB: loop body
LE: loop exit
PB: predicated region body
PF: predicated region fallthrough
CT: control target
= control target key end

     0   :  { %vm66_vm0 = vcmask 261120   ;;  %v2363_v3 = vmov 0   ;;  %v40_v54 = vlaneseq  ;;  %s2365_s16 = smov 64   ;;  %vm324_vm8 = vcmask 523264   ;;  %s2366_s20 = smov 96   ;;  %s3127_s5 = inlined_call_operand.vmem [shape: f32[32,128], index: 5, kind: input, shape index: {}]   ;;  %s3128_s2 = inlined_call_operand.vmem [shape: f32[2,8,32], index: 2, kind: input, shape index: {}]   ;;  %s3129_s1 = inlined_call_operand.vmem [shape: f32[4,8,1], index: 1, kind: input, shape index: {}]   ;;  %s3130_s3 = inlined_call_operand.vmem [shape: f32[2,8,32], index: 3, kind: input, shape index: {}]   ;;  %s3131_s4 = inlined_call_operand.vmem [shape: f32[1,128], index: 4, kind: input, shape index: {}]   ;;  %s3132_s6 = inlined_call_operand.vmem [shape: f32[1,128], index: 6, kind: input, shape index: {}]   ;;  %s3133_s7 = inlined_call_operand.vmem [shape: f32[64,128], index: 7, kind: input, shape index: {}]   ;;  %s3134_s8 = inlined_call_operand.vmem [shape: f32[1,128], index: 8, kind: input, shape index: {}]   ;;  %s3135_s9 = inlined_call_operand.vmem [shape: f32[1,32], index: 9, kind: input, shape index: {}]   ;;  %s3136_s10 = inlined_call_operand.<no memory space> [shape: f32[1,1], index: 10, kind: input, shape index: {}]   ;;  %s3137_s0 = inlined_call_operand.vmem [shape: f32[4,1], index: 0, kind: input, shape index: {}]   ;;  %s3138_s11 = inlined_call_operand.vmem [shape: f32[8,4], index: 11, kind: output, shape index: {}]  }
   0x1   :  { %v65_v0 = vld [vmem:[%s3127_s5 + $0x18] sm:$0xff]  ;;  %v64_v1 = vld [vmem:[%s3127_s5 + $0x10] sm:$0xff]  ;;  %v63_v2 = vld [vmem:[%s3127_s5 + $0x8] sm:$0xff]  ;;  %2284 = vset.pattern.permute.xlu0 %v2363_v3  ;;  %2285 = vset.pattern.permute.xlu2 %v2363_v3 }
   0x2   :  { %v2439_v4 = vand.u32 4294901760, %v65_v0  ;;  %v2441_v5 = vand.u32 4294901760, %v64_v1  ;;  %v2443_v6 = vand.u32 4294901760, %v63_v2  ;;  %v62_v7 = vld [vmem:[%s3127_s5] sm:$0xff]  ;;  %2286 = vset.pattern.permute.xlu1 %v2363_v3  ;;  %s2364_s5 = smov 32   ;;  %v41_v56 = vand.u32 127, %v40_v54 }
   0x3   :  { %v45_v8 = vld [vmem:[%s3128_s2] sm:$0xff]  ;;  %v2454_v10 = vand.u32 4294901760, %v62_v7 }
   0x4   :  { %v51_v9 = vld [vmem:[%s3129_s1] sm:$0xff]  ;;  %v68_v11 = vsel %vm66_vm0, %v45_v8, 0  ;;  %83 = vmatpush.msra.mxu2 %v2439_v4  ;;  %v2462_v13 = vsub.f32 %v65_v0, %v2439_v4  ;;  %v2465_v15 = vsub.f32 %v64_v1, %v2441_v5  ;;  %v2468_v16 = vsub.f32 %v63_v2, %v2443_v6  ;;  %243 = vmatpush.msra.mxu1 %v2439_v4 }
   0x5   :  { %55 = vperm.xlu0 %2284, %v51_v9   ;;  %v48_v12 = vld [vmem:[%s3130_s3] sm:$0xff]  ;;  %v90_v14 = vand.u32 4294901760, %v68_v11  ;;  %v2472_v17 = vsub.f32 %v62_v7, %v2454_v10  ;;  %vm42_vm1 = vcmp.ge.s32.totalorder %v41_v56, 64  ;;  %vm43_vm2 = vcmp.lt.s32.totalorder %v41_v56, 96 }
   0x6   :  { %283 = vrot.lane.b32.xlu1 %v48_v12, %s2364_s5  ;;  %85 = vmatpush.msra.mxu2 %v2441_v5  ;;  %v2477_v18 = vand.u32 4294901760, %v2462_v13  ;;  %v2480_v20 = vand.u32 4294901760, %v2465_v15  ;;  %v2483_v21 = vand.u32 4294901760, %v2468_v16  ;;  %v2528_v39 = vld [vmem:[%s3131_s4] ss:$0 sm:$0xff]  ;;  %vm2537_vm4 = vmand %vm42_vm1, %vm43_vm2 }
   0x7   :  { %v91_v19 = vsub.f32 %v68_v11, %v90_v14  ;;  %245 = vmatpush.msra.mxu1 %v2441_v5  ;;  %v2487_v22 = vand.u32 4294901760, %v2472_v17  ;;  %v2534_v48 = vld [vmem:[%s3132_s6] ss:$0 sm:$0xff]  ;;  %v2264_v11 = vld [vmem:[%s3128_s2 + $0x8] sm:$0xff] }
   0x8   :  { %87 = vmatpush.msra.mxu2 %v2443_v6  ;;  %v114_v23 = vsub.f32 %v2462_v13, %v2477_v18  ;;  %v120_v25 = vsub.f32 %v2465_v15, %v2480_v20  ;;  %v126_v26 = vsub.f32 %v2468_v16, %v2483_v21  ;;  %212 = vmatpush.msra.mxu0 %v2477_v18 }
   0x9   :  { %v92_v24 = vand.u32 4294901760, %v91_v19  ;;  %247 = vmatpush.msra.mxu1 %v2443_v6  ;;  %v132_v30 = vsub.f32 %v2472_v17, %v2487_v22 }
   0xa   :  { %89 = vmatpush.msra.mxu2 %v2454_v10  ;;  %v2499_v27 = vand.u32 4294901760, %v114_v23  ;;  %v2501_v29 = vand.u32 4294901760, %v120_v25  ;;  %216 = vmatpush.msra.mxu0 %v2480_v20  ;;  %v2509_v32 = vand.u32 4294901760, %v126_v26  ;;  %v319_v25 = vld [vmem:[%s3133_s7 + $0x38] sm:$0xff]  ;;  %v318_v26 = vld [vmem:[%s3133_s7 + $0x30] sm:$0xff] }
   0xb   :  { %v93_v28 = vsub.f32 %v91_v19, %v92_v24  ;;  %249 = vmatpush.msra.mxu1 %v2454_v10  ;;  %v2514_v33 = vand.u32 4294901760, %v132_v30  ;;  %v2567_v30 = vand.u32 4294901760, %v319_v25 }
   0xc   :  { %3164 = vst [vmem:[#allocation3_spill] sm:$0xff] %v2499_v27  ;;  %154 = vmatpush.msrb.mxu2 %v2462_v13  ;;  %116 = vmatpush.msra.mxu3 %v2499_v27 }
   0xd   :  { %3165 = vst [vmem:[#allocation4_spill] sm:$0xff] %v2501_v29  ;;  %v94_v31 = vand.u32 4294901760, %v93_v28  ;;  %220 = vmatpush.msra.mxu0 %v2483_v21  ;;  %251 = vmatmul.f32.vlgmr.msra.gmra.mxu1 %v90_v14  ;;  %v317_v28 = vld [vmem:[%s3133_s7 + $0x28] sm:$0xff] }
   0xe   :  { %3166 = vst [vmem:[#allocation5_spill] sm:$0xff] %v2509_v32  ;;  %157 = vmatpush.msrb.mxu2 %v2465_v15  ;;  %122 = vmatpush.msra.mxu3 %v2501_v29 }
   0xf   :  { %95 = vmatmul.f32.vlgmr.msra.gmra.mxu2 %v94_v31  ;;  %3167 = vst [vmem:[#allocation6_spill] sm:$0xff] %v2514_v33  ;;  %224 = vmatpush.msra.mxu0 %v2487_v22  ;;  %v2569_v31 = vand.u32 4294901760, %v318_v26 }
  0x10   :  { %160 = vmatpush.msrb.mxu2 %v2468_v16  ;;  %128 = vmatpush.msra.mxu3 %v2509_v32 }
  0x11   :  { %226 = vmatmul.f32.vlgmr.msra.gmra.mxu0 %v90_v14  ;;  %469 = vmatpush.msrb.mxu1 %v2567_v30 }
  0x12   :  { %163 = vmatpush.msrb.mxu2 %v2472_v17  ;;  %134 = vmatpush.msra.mxu3 %v2514_v33 }
  0x13   :  { %136 = vmatmul.f32.vlgmr.msra.gmra.mxu3 %v90_v14  ;;  %471 = vmatpush.msrb.mxu1 %v2569_v31 }
  0x14   :  { %183 = vmatpush.msrb.mxu3 %v2439_v4  ;;  %337 = vmatpush.msra.mxu2 %v2567_v30 }
  0x16   :  { %185 = vmatpush.msrb.mxu3 %v2441_v5  ;;  %339 = vmatpush.msra.mxu2 %v2569_v31 }
  0x17   :  { %166 = vmatmul.f32.vlgmr.msrb.gmra.mxu2 %v91_v19 }
  0x18   :  { %187 = vmatpush.msrb.mxu3 %v2443_v6 }
  0x1a   :  { %189 = vmatpush.msrb.mxu3 %v2454_v10 }
  0x1b   :  { %193 = vmatmul.f32.vlgmr.msrb.gmra.mxu3 %v92_v24 }
  0x77   :  { %v56_v40 = vpop.permute.xlu0 %55 }
  0x78   :  { %v61_v46 = vmul.f32 %v2528_v39, %v56_v40  ;;  %v284_v12 = vpop.permute.xlu1 %283 }
  0x8a   :  { %v252_v44 = vpop.f32.mrf.mxu1 }
  0x8e   :  { %v227_v42 = vpop.f32.mrf.mxu0 }
  0x92   :  { %v96_v34 = vpop.f32.mrf.mxu2 }
  0x96   :  { %v137_v35 = vpop.f32.mrf.mxu3 }
  0x97   :  { %v138_v36 = vadd.f32 %v137_v35, %v96_v34  ;;  %v2571_v34 = vand.u32 4294901760, %v317_v28  ;;  %v316_v35 = vld [vmem:[%s3133_s7 + $0x20] sm:$0xff] }
  0x99   :  { %341 = vmatpush.msra.mxu2 %v2571_v34  ;;  %473 = vmatpush.msrb.mxu1 %v2571_v34 }
  0x9a   :  { %v167_v37 = vpop.f32.mrf.mxu2 }
  0x9b   :  { %v168_v38 = vadd.f32 %v167_v37, %v138_v36  ;;  %v315_v36 = vld [vmem:[%s3133_s7 + $0x18] sm:$0xff]  ;;  %v314_v37 = vld [vmem:[%s3133_s7 + $0x10] sm:$0xff] }
  0x9c   :  { %v2584_v40 = vand.u32 4294901760, %v315_v36 }
  0x9e   :  { %v194_v41 = vpop.f32.mrf.mxu3 }
  0x9f   :  { %v195_v43 = vadd.f32 %v194_v41, %v168_v38  ;;  %v2582_v38 = vand.u32 4294901760, %v316_v35  ;;  %v2586_v41 = vand.u32 4294901760, %v314_v37 }
  0xa1   :  { %v228_v45 = vadd.f32 %v227_v42, %v195_v43  ;;  %v313_v42 = vld [vmem:[%s3133_s7 + $0x8] sm:$0xff]  ;;  %v312_v43 = vld [vmem:[%s3133_s7] sm:$0xff]  ;;  %343 = vmatpush.msra.mxu2 %v2582_v38  ;;  %475 = vmatpush.msrb.mxu1 %v2582_v38 }
  0xa3   :  { %v253_v47 = vadd.f32 %v252_v44, %v228_v45  ;;  %v2595_v44 = vsub.f32 %v319_v25, %v2567_v30  ;;  %v2598_v45 = vsub.f32 %v318_v26, %v2569_v31  ;;  %345 = vmatpush.msra.mxu2 %v2584_v40  ;;  %477 = vmatpush.msrb.mxu1 %v2584_v40 }
  0xa5   :  { %v255_v49 = vadd.f32 %v253_v47, %v61_v46  ;;  %v2601_v46 = vsub.f32 %v317_v28, %v2571_v34  ;;  %v2605_v47 = vand.u32 4294901760, %v313_v42  ;;  %432 = vmatpush.msrb.mxu0 %v2595_v44  ;;  %347 = vmatpush.msra.mxu2 %v2586_v41 }
  0xa6   :  { %479 = vmatpush.msrb.mxu1 %v2586_v41 }
  0xa7   :  { %v260_v50 = vadd.f32 %v2534_v48, %v255_v49  ;;  %v2608_v49 = vsub.f32 %v316_v35, %v2582_v38  ;;  %v2623_v54 = vand.u32 4294901760, %v2601_v46  ;;  %435 = vmatpush.msrb.mxu0 %v2598_v45  ;;  %349 = vmatpush.msra.mxu2 %v2605_v47 }
  0xa8   :  { %481 = vmatpush.msrb.mxu1 %v2605_v47 }
  0xa9   :  { %v2266_v51 = vmul.f32 -1.442695, %v260_v50  ;;  %3170 = vst [vmem:[#allocation7_spill] sm:$0xff] %v2623_v54  ;;  %v2630_v56 = vand.u32 4294901760, %v2608_v49  ;;  %438 = vmatpush.msrb.mxu0 %v2601_v46 }
  0xab   :  { %2295 = vpow2.f32 %v2266_v51  ;;  %v2614_v51 = vsub.f32 %v314_v37, %v2586_v41  ;;  %3171 = vst [vmem:[#allocation8_spill] sm:$0xff] %v2630_v56  ;;  %441 = vmatpush.msrb.mxu0 %v2608_v49 }
  0xb1   :  { %v2296_v52 = vpop.eup %2295 }
  0xb2   :  { %v265_v53 = vadd.f32 1.0, %v2296_v52  ;;  %v2617_v52 = vand.u32 4294901760, %v2595_v44 }
  0xb4   :  { %2297 = vrcp.f32 %v265_v53  ;;  %v277_v59 = vand.u32 2147483648, %v265_v53  ;;  %v275_v61 = vand.u32 2147483647, %v265_v53  ;;  %vm271_vm5 = vweird.f32 %v265_v53 }
  0xb5   :  { %2299 = vtanh.f32 %v260_v50  ;;  %v2611_v50 = vsub.f32 %v315_v36, %v2584_v40 }
  0xb6   :  { %v278_v0 = vor.u32 1.1754944e-38, %v277_v59  ;;  %vm276_vm7 = vcmp.eq.f32.partialorder %v275_v61, 8.507059e+37 }
  0xb7   :  { %v2643_v61 = vand.u32 4294901760, %v2611_v50  ;;  %444 = vmatpush.msrb.mxu0 %v2611_v50 }
  0xb9   :  { %3172 = vst [vmem:[#allocation9_spill] sm:$0xff] %v2643_v61  ;;  %447 = vmatpush.msrb.mxu0 %v2614_v51 }
  0xba   :  { %v2298_v55 = vpop.eup %2297 }
  0xbb   :  { %v267_v57 = vmul.f32 %v2298_v55, %v265_v53  ;;  %vm272_vm3 = vweird.f32 %v2298_v55  ;;  %v2300_v2 = vpop.eup %2299  ;;  %v2620_v53 = vand.u32 4294901760, %v2598_v45 }
  0xbc   :  { %vm273_vm6 = vmor %vm271_vm5, %vm272_vm3 }
  0xbd   :  { %v268_v58 = vsub.f32 1.0, %v267_v57  ;;  %v2633_v57 = vsub.f32 %v313_v42, %v2605_v47  ;;  %v378_v59 = vsub.f32 %v2598_v45, %v2620_v53 }
  0xbf   :  { %v269_v60 = vmul.f32 %v2298_v55, %v268_v58  ;;  %v372_v58 = vsub.f32 %v2595_v44, %v2617_v52  ;;  %450 = vmatpush.msrb.mxu0 %v2633_v57 }
  0xc1   :  { %v270_v63 = vadd.f32 %v2298_v55, %v269_v60  ;;  %v384_v60 = vsub.f32 %v2601_v46, %v2623_v54 }
  0xc3   :  { %v274_v1 = vsel %vm273_vm6, %v2298_v55, %v270_v63  ;;  %v2627_v55 = vand.u32 4294901760, %v312_v43  ;;  %v2648_v63 = vand.u32 4294901760, %v2614_v51 }
  0xc4   :  { %v279_v3 = vsel %vm276_vm7, %v278_v0, %v274_v1  ;;  %v2651_v0 = vand.u32 4294901760, %v372_v58  ;;  %v2653_v1 = vand.u32 4294901760, %v378_v59 }
  0xc5   :  { %v2543_v7 = vsel %vm2537_vm4, %v2300_v2, %v279_v3  ;;  %3173 = vst [vmem:[#allocation10_spill] sm:$0xff] %v2648_v63  ;;  %v390_v2 = vsub.f32 %v2608_v49, %v2630_v56  ;;  %v2660_v3 = vsub.f32 %v312_v43, %v2627_v55  ;;  %351 = vmatpush.msra.mxu2 %v2627_v55 }
  0xc6   :  { %288 = vrot.lane.b32.xlu0 %v2543_v7, %s2365_s16  ;;  %v286_v14 = vmul.f32 %v284_v12, %v2543_v7  ;;  %374 = vmatpush.msra.mxu3 %v2651_v0 }
  0xc7   :  { %v2675_v12 = vand.u32 4294901760, %v390_v2  ;;  %483 = vmatpush.msrb.mxu1 %v2627_v55  ;;  %453 = vmatpush.msrb.mxu0 %v2660_v3 }
  0xc8   :  { %380 = vmatpush.msra.mxu3 %v2653_v1  ;;  %502 = vmatpush.msrb.mxu2 %v2617_v52 }
  0xc9   :  { %656 = vmatpush.msra.mxu0 %v2439_v4  ;;  %689 = vmatpush.msra.mxu1 %v2499_v27 }
  0xca   :  { %506 = vmatpush.msrb.mxu2 %v2620_v53 }
  0xcb   :  { %658 = vmatpush.msra.mxu0 %v2441_v5  ;;  %695 = vmatpush.msra.mxu1 %v2501_v29 }
  0xcc   :  { %510 = vmatpush.msrb.mxu2 %v2623_v54 }
  0xcd   :  { %660 = vmatpush.msra.mxu0 %v2443_v6  ;;  %701 = vmatpush.msra.mxu1 %v2509_v32 }
  0xce   :  { %308 = vrot.lane.b32.xlu0 %v2264_v11, %s2364_s5  ;;  %v2669_v11 = vand.u32 4294901760, %v2633_v57  ;;  %514 = vmatpush.msrb.mxu2 %v2630_v56 }
  0xcf   :  { %662 = vmatpush.msra.mxu0 %v2454_v10  ;;  %707 = vmatpush.msra.mxu1 %v2514_v33 }
  0xd0   :  { %3174 = vst [vmem:[#allocation11_spill] sm:$0xff] %v2669_v11  ;;  %v408_v25 = vsub.f32 %v2633_v57, %v2669_v11  ;;  %518 = vmatpush.msrb.mxu2 %v2643_v61 }
  0xd2   :  { %v2702_v35 = vand.u32 4294901760, %v408_v25  ;;  %522 = vmatpush.msrb.mxu2 %v2648_v63 }
  0xd4   :  { %526 = vmatpush.msrb.mxu2 %v2669_v11 }
 0x138   :  { %v289_v8 = vpop.permute.xlu0 %288 }
 0x139   :  { %v291_v9 = vmul.f32 %v289_v8, %v2543_v7  ;;  %v2664_v8 = vand.u32 4294901760, %v384_v60 }
 0x13b   :  { %293 = vrot.lane.b32.xlu1 %v291_v9, %s2364_s5  ;;  %v396_v9 = vsub.f32 %v2611_v50, %v2643_v61  ;;  %386 = vmatpush.msra.mxu3 %v2664_v8 }
 0x13d   :  { %392 = vmatpush.msra.mxu3 %v2675_v12 }
 0x140   :  { %v309_v43 = vpop.permute.xlu0 %308 }
 0x1ad   :  { %v294_v19 = vpop.permute.xlu1 %293 }
 0x1ae   :  { %v2554_v23 = vadd.f32 %v294_v19, %v286_v14  ;;  %v402_v14 = vsub.f32 %v2614_v51, %v2648_v63  ;;  %v2680_v19 = vand.u32 4294901760, %v2660_v3 }
 0x1b0   :  { %2301 = vtanh.f32 %v2554_v23  ;;  %3175 = vst [vmem:[#allocation12_spill] sm:$0xff] %v2680_v19  ;;  %v2694_v26 = vand.u32 4294901760, %v402_v14  ;;  %v414_v28 = vsub.f32 %v2660_v3, %v2680_v19  ;;  %530 = vmatpush.msrb.mxu2 %v2680_v19 }
 0x1b2   :  { %v2708_v36 = vand.u32 4294901760, %v414_v28 }
 0x1b6   :  { %v2302_v24 = vpop.eup %2301 }
 0x1b7   :  { %299 = vrot.lane.b32.xlu2 %v2302_v24, %s2365_s16  ;;  %v2686_v24 = vand.u32 4294901760, %v396_v9 }
 0x1b9   :  { %398 = vmatpush.msra.mxu3 %v2686_v24 }
 0x1bb   :  { %404 = vmatpush.msra.mxu3 %v2694_v26 }
 0x1bd   :  { %410 = vmatpush.msra.mxu3 %v2702_v35 }
 0x1bf   :  { %416 = vmatpush.msra.mxu3 %v2708_v36 }
 0x1c1   :  { %545 = vmatpush.msrb.mxu3 %v2567_v30 }
 0x1c3   :  { %547 = vmatpush.msrb.mxu3 %v2569_v31 }
 0x1c5   :  { %549 = vmatpush.msrb.mxu3 %v2571_v34 }
 0x1c7   :  { %551 = vmatpush.msrb.mxu3 %v2582_v38 }
 0x1c9   :  { %553 = vmatpush.msrb.mxu3 %v2584_v40 }
 0x1cb   :  { %555 = vmatpush.msrb.mxu3 %v2586_v41 }
 0x1cd   :  { %557 = vmatpush.msrb.mxu3 %v2605_v47 }
 0x1cf   :  { %559 = vmatpush.msrb.mxu3 %v2627_v55 }
 0x211   :  { %v300_v37 = vpop.permute.xlu2 %299 }
 0x212   :  { %v302_v42 = vmul.f32 %v300_v37, %v2543_v7  ;;  %v2265_v7 = vld [vmem:[%s3130_s3 + $0x8] sm:$0xff] }
 0x214   :  { %304 = vrot.lane.b32.xlu2 %v302_v42, %s2364_s5 }
 0x21c   :  { %587 = vrot.lane.b32.xlu2 %v2265_v7, %s2364_s5 }
 0x26e   :  { %v305_v58 = vpop.permute.xlu2 %304 }
 0x26f   :  { %v311_v59 = vsel %vm66_vm0, %v305_v58, %v309_v43  ;;  %v641_v60 = vsel %vm66_vm0, %v305_v58, 0 }
 0x270   :  { %v326_v2 = vsel %vm324_vm8, %v311_v59, 0  ;;  %v663_v9 = vand.u32 4294901760, %v641_v60 }
 0x271   :  { %v352_v14 = vand.u32 4294901760, %v326_v2 }
 0x272   :  { %v664_v25 = vsub.f32 %v641_v60, %v663_v9  ;;  %v2818_v60 = vld [vmem:[%s3134_s8] ss:$0 sm:$0xff] }
 0x273   :  { %v353_v28 = vsub.f32 %v326_v2, %v352_v14  ;;  %418 = vmatmul.f32.vlgmr.msra.gmra.mxu3 %v352_v14  ;;  %3176 = vst [vmem:[#allocation13_spill] sm:$0xff] %v2818_v60 }
 0x274   :  { %v665_v37 = vand.u32 4294901760, %v664_v25  ;;  %816 = vmatpush.msra.mxu3 %v2439_v4 }
 0x275   :  { %456 = vmatmul.f32.vlgmr.msrb.gmra.mxu0 %v353_v28  ;;  %v354_v42 = vand.u32 4294901760, %v353_v28 }
 0x276   :  { %727 = vmatpush.msrb.mxu0 %v2462_v13  ;;  %818 = vmatpush.msra.mxu3 %v2441_v5  ;;  %v666_v7 = vsub.f32 %v664_v25, %v665_v37 }
 0x277   :  { %v355_v43 = vsub.f32 %v353_v28, %v354_v42  ;;  %487 = vmatmul.f32.vlgmr.msrb.gmra.mxu1 %v354_v42 }
 0x278   :  { %730 = vmatpush.msrb.mxu0 %v2465_v15  ;;  %756 = vmatpush.msrb.mxu1 %v2439_v4  ;;  %v667_v59 = vand.u32 4294901760, %v666_v7 }
 0x279   :  { %v356_v58 = vand.u32 4294901760, %v355_v43  ;;  %820 = vmatpush.msra.mxu3 %v2443_v6 }
 0x27a   :  { %733 = vmatpush.msrb.mxu0 %v2468_v16  ;;  %758 = vmatpush.msrb.mxu1 %v2441_v5 }
 0x27b   :  { %357 = vmatmul.f32.vlgmr.msra.gmra.mxu2 %v356_v58  ;;  %561 = vmatmul.f32.vlgmr.msrb.gmra.mxu3 %v352_v14 }
 0x27c   :  { %822 = vmatpush.msra.mxu3 %v2454_v10  ;;  %736 = vmatpush.msrb.mxu0 %v2472_v17 }
 0x27d   :  { %668 = vmatmul.f32.vlgmr.msra.gmra.mxu0 %v667_v59  ;;  %760 = vmatpush.msrb.mxu1 %v2443_v6 }
 0x27e   :  { %785 = vmatpush.msra.mxu2 %v2477_v18  ;;  %889 = vmatpush.msra.mxu0 %v2567_v30 }
 0x27f   :  { %709 = vmatmul.f32.vlgmr.msra.gmra.mxu1 %v663_v9  ;;  %1021 = vmatpush.msrb.mxu3 %v2567_v30 }
 0x280   :  { %762 = vmatpush.msrb.mxu1 %v2454_v10  ;;  %789 = vmatpush.msra.mxu2 %v2480_v20 }
 0x281   :  { %891 = vmatpush.msra.mxu0 %v2569_v31  ;;  %1023 = vmatpush.msrb.mxu3 %v2569_v31 }
 0x282   :  { %926 = vmatpush.msra.mxu1 %v2651_v0  ;;  %793 = vmatpush.msra.mxu2 %v2483_v21 }
 0x283   :  { %532 = vmatmul.f32.vlgmr.msrb.gmra.mxu2 %v352_v14  ;;  %824 = vmatmul.f32.vlgmr.msra.gmra.mxu3 %v663_v9 }
 0x284   :  { %797 = vmatpush.msra.mxu2 %v2487_v22  ;;  %932 = vmatpush.msra.mxu1 %v2653_v1 }
 0x285   :  { %739 = vmatmul.f32.vlgmr.msrb.gmra.mxu0 %v664_v25  ;;  %1025 = vmatpush.msrb.mxu3 %v2571_v34 }
 0x286   :  { %984 = vmatpush.msrb.mxu2 %v2595_v44  ;;  %938 = vmatpush.msra.mxu1 %v2664_v8 }
 0x287   :  { %893 = vmatpush.msra.mxu0 %v2571_v34  ;;  %766 = vmatmul.f32.vlgmr.msrb.gmra.mxu1 %v665_v37 }
 0x288   :  { %987 = vmatpush.msrb.mxu2 %v2598_v45  ;;  %944 = vmatpush.msra.mxu1 %v2675_v12 }
 0x289   :  { %895 = vmatpush.msra.mxu0 %v2582_v38  ;;  %1027 = vmatpush.msrb.mxu3 %v2582_v38 }
 0x28a   :  { %990 = vmatpush.msrb.mxu2 %v2601_v46  ;;  %950 = vmatpush.msra.mxu1 %v2686_v24 }
 0x28b   :  { %897 = vmatpush.msra.mxu0 %v2584_v40  ;;  %799 = vmatmul.f32.vlgmr.msra.gmra.mxu2 %v663_v9 }
 0x28c   :  { %956 = vmatpush.msra.mxu1 %v2694_v26  ;;  %993 = vmatpush.msrb.mxu2 %v2608_v49 }
 0x28d   :  { %899 = vmatpush.msra.mxu0 %v2586_v41  ;;  %1029 = vmatpush.msrb.mxu3 %v2584_v40 }
 0x28e   :  { %962 = vmatpush.msra.mxu1 %v2702_v35  ;;  %996 = vmatpush.msrb.mxu2 %v2611_v50 }
 0x28f   :  { %901 = vmatpush.msra.mxu0 %v2605_v47  ;;  %1031 = vmatpush.msrb.mxu3 %v2586_v41 }
 0x290   :  { %968 = vmatpush.msra.mxu1 %v2708_v36  ;;  %999 = vmatpush.msrb.mxu2 %v2614_v51 }
 0x291   :  { %903 = vmatpush.msra.mxu0 %v2627_v55  ;;  %1033 = vmatpush.msrb.mxu3 %v2605_v47 }
 0x292   :  { %1097 = vmatpush.msrb.mxu1 %v2567_v30  ;;  %1002 = vmatpush.msrb.mxu2 %v2633_v57 }
 0x293   :  { %1054 = vmatpush.msrb.mxu0 %v2617_v52  ;;  %1035 = vmatpush.msrb.mxu3 %v2627_v55 }
 0x294   :  { %1099 = vmatpush.msrb.mxu1 %v2569_v31  ;;  %1005 = vmatpush.msrb.mxu2 %v2660_v3 }
 0x295   :  { %1058 = vmatpush.msrb.mxu0 %v2620_v53  ;;  %1227 = vmatpush.msra.mxu3 %v2499_v27 }
 0x296   :  { %1101 = vmatpush.msrb.mxu1 %v2571_v34  ;;  %1194 = vmatpush.msra.mxu2 %v2439_v4 }
 0x297   :  { %1062 = vmatpush.msrb.mxu0 %v2623_v54  ;;  %1233 = vmatpush.msra.mxu3 %v2501_v29 }
 0x298   :  { %1103 = vmatpush.msrb.mxu1 %v2582_v38  ;;  %1196 = vmatpush.msra.mxu2 %v2441_v5 }
 0x299   :  { %1066 = vmatpush.msrb.mxu0 %v2630_v56  ;;  %1239 = vmatpush.msra.mxu3 %v2509_v32 }
 0x29a   :  { %1105 = vmatpush.msrb.mxu1 %v2584_v40  ;;  %1198 = vmatpush.msra.mxu2 %v2443_v6 }
 0x29b   :  { %1070 = vmatpush.msrb.mxu0 %v2643_v61  ;;  %1245 = vmatpush.msra.mxu3 %v2514_v33 }
 0x29c   :  { %1107 = vmatpush.msrb.mxu1 %v2586_v41  ;;  %1200 = vmatpush.msra.mxu2 %v2454_v10 }
 0x29d   :  { %1074 = vmatpush.msrb.mxu0 %v2648_v63 }
 0x29e   :  { %1109 = vmatpush.msrb.mxu1 %v2605_v47 }
 0x29f   :  { %1078 = vmatpush.msrb.mxu0 %v2669_v11 }
 0x2a0   :  { %1111 = vmatpush.msrb.mxu1 %v2627_v55 }
 0x2a1   :  { %1082 = vmatpush.msrb.mxu0 %v2680_v19 }
 0x2f2   :  { %v457_v28 = vpop.f32.mrf.mxu0 }
 0x2f4   :  { %v488_v42 = vpop.f32.mrf.mxu1 }
 0x2f6   :  { %v419_v2 = vpop.f32.mrf.mxu3 }
 0x2fe   :  { %v358_v9 = vpop.f32.mrf.mxu2  ;;  %v562_v59 = vpop.f32.mrf.mxu3 }
 0x2ff   :  { %v359_v14 = vadd.f32 %v2818_v60, %v358_v9 }
 0x301   :  { %v420_v25 = vadd.f32 %v419_v2, %v359_v14 }
 0x303   :  { %v458_v37 = vadd.f32 %v457_v28, %v420_v25 }
 0x305   :  { %v489_v7 = vadd.f32 %v488_v42, %v458_v37 }
 0x306   :  { %v533_v43 = vpop.f32.mrf.mxu2  ;;  %v825_v54 = vpop.f32.mrf.mxu3 }
 0x307   :  { %v534_v58 = vadd.f32 %v533_v43, %v489_v7 }
 0x309   :  { %v563_v11 = vadd.f32 %v562_v59, %v534_v58 }
 0x30b   :  { %v2267_v63 = vmul.f32 -1.442695, %v563_v11 }
 0x30d   :  { %2303 = vpow2.f32 %v2267_v63 }
 0x313   :  { %v2304_v19 = vpop.eup %2303 }
 0x314   :  { %v569_v33 = vadd.f32 1.0, %v2304_v19 }
 0x316   :  { %2305 = vrcp.f32 %v569_v33  ;;  %v581_v29 = vand.u32 2147483648, %v569_v33  ;;  %v579_v2 = vand.u32 2147483647, %v569_v33  ;;  %vm575_vm10 = vweird.f32 %v569_v33 }
 0x317   :  { %2307 = vtanh.f32 %v563_v11 }
 0x318   :  { %v582_v25 = vor.u32 1.1754944e-38, %v581_v29  ;;  %vm580_vm12 = vcmp.eq.f32.partialorder %v579_v2, 8.507059e+37  ;;  %v588_v29 = vpop.permute.xlu2 %587  ;;  %v16_v2 = vstv %s3136_s10 }
 0x319   :  { %17 = vst [vmem:[#allocation2] sm:$0x1] %v16_v2 }
 0x31c   :  { %v2306_v61 = vpop.eup %2305 }
 0x31d   :  { %v571_v32 = vmul.f32 %v2306_v61, %v569_v33  ;;  %vm576_vm9 = vweird.f32 %v2306_v61  ;;  %v2308_v37 = vpop.eup %2307 }
 0x31e   :  { %vm577_vm11 = vmor %vm575_vm10, %vm576_vm9 }
 0x31f   :  { %v572_v56 = vsub.f32 1.0, %v571_v32 }
 0x321   :  { %v573_v9 = vmul.f32 %v2306_v61, %v572_v56  ;;  %v2290_v56 = vld [vmem:[%s3135_s9] ss:$0 sm:$0xff] }
 0x322   :  { %610 = vrot.lane.b32.xlu2 %v2290_v56, %s2366_s20  ;;  %s2368_s20 = smov 2  }
 0x323   :  { %v574_v14 = vadd.f32 %v2306_v61, %v573_v9 }
 0x325   :  { %v578_v28 = vsel %vm577_vm11, %v2306_v61, %v574_v14 }
 0x326   :  { %v583_v42 = vsel %vm580_vm12, %v582_v25, %v578_v28  ;;  %v626_v28 = vld [vmem:[%s3137_s0] sm:$0x1] }
 0x327   :  { %v585_v63 = vsel %vm2537_vm4, %v2308_v37, %v583_v42  ;;  %v631_v37 = vsub.f32 1.0, %v626_v28  ;;  %v2846_v42 = vld [vmem:[#allocation2] ss:$0 sm:$0xff] }
 0x328   :  { %592 = vrot.lane.b32.xlu1 %v585_v63, %s2365_s16  ;;  %v590_v33 = vmul.f32 %v588_v29, %v585_v63  ;;  %3179 = vst [vmem:[#allocation16_spill] sm:$0xff] %v2846_v42 }
 0x37c   :  { %v2832_v58 = vpop.permute.xlu2 %610 }
 0x37d   :  { %3178 = vst [vmem:[#allocation15_spill] sm:$0xff] %v2832_v58 }
 0x39a   :  { %v593_v19 = vpop.permute.xlu1 %592 }
 0x39b   :  { %v595_v32 = vmul.f32 %v593_v19, %v585_v63  ;;  %v2268_v19 = vld [vmem:[%s3129_s1 + $0x8] sm:$0xff] }
 0x39d   :  { %597 = vrot.lane.b32.xlu0 %v595_v32, %s2364_s5  ;;  %v632_v32 = vperm.slane %v631_v37, 0 }
 0x40f   :  { %v598_v61 = vpop.permute.xlu0 %597 }
 0x410   :  { %v2828_v11 = vadd.f32 %v598_v61, %v590_v33 }
 0x412   :  { %3177 = vst [vmem:[#allocation14_spill] sm:$0xff] %v2828_v11  ;;  %2309 = vtanh.f32 %v2828_v11 }
 0x418   :  { %v2310_v7 = vpop.eup %2309 }
 0x419   :  { %603 = vrot.lane.b32.xlu1 %v2310_v7, %s2365_s16 }
 0x48b   :  { %v604_v43 = vpop.permute.xlu1 %603 }
 0x48c   :  { %v2834_v59 = vmul.f32 %v604_v43, %v585_v63  ;;  %v2292_v63 = vld [vmem:[%s3137_s0] ss:$0 sm:$0xff]  ;;  %v669_v43 = vpop.f32.mrf.mxu0 }
 0x48d   :  { %v630_v33 = vmul.f32 %v2292_v63, %v2268_v19 }
 0x48e   :  { %v613_v9 = vmul.f32 %v2832_v58, %v2834_v59  ;;  %v800_v58 = vpop.f32.mrf.mxu2 }
 0x490   :  { %615 = vrot.lane.b32.xlu0 %v613_v9, %s2364_s5  ;;  %v710_v9 = vpop.f32.mrf.mxu1 }
 0x494   :  { %v740_v2 = vpop.f32.mrf.mxu0 }
 0x498   :  { %v767_v28 = vpop.f32.mrf.mxu1 }
 0x502   :  { %v616_v14 = vpop.permute.xlu0 %615 }
 0x503   :  { %v618_v25 = vsel %vm66_vm0, %v616_v14, 0.0  ;;  %v711_v14 = vadd.f32 %v710_v9, %v669_v43 }
 0x504   :  { %619 = vadd.xlane.f32.xlu1 %v618_v25 }
 0x505   :  { %v741_v25 = vadd.f32 %v740_v2, %v711_v14 }
 0x507   :  { %v768_v11 = vadd.f32 %v767_v28, %v741_v25 }
 0x509   :  { %v801_v60 = vadd.f32 %v800_v58, %v768_v11 }
 0x50b   :  { %v826_v27 = vadd.f32 %v825_v54, %v801_v60 }
 0x577   :  { %v620_v56 = vpop.xlane.xlu1 %619 }
 0x578   :  { %v2855_v29 = vadd.f32 %v2846_v42, %v620_v56 }
 0x57a   :  { %3180 = vst [vmem:[#allocation17_spill] sm:$0xff] %v2855_v29  ;;  %v633_v61 = vmul.f32 %v632_v32, %v2855_v29 }
 0x57c   :  { %v634_v7 = vadd.f32 %v633_v61, %v630_v33 }
 0x57e   :  { %637 = vperm.xlu2 %2285, %v634_v7  }
 0x5d8   :  { %v638_v37 = vpop.permute.xlu2 %637 }
 0x5d9   :  { %v640_v56 = vmul.f32 %v2528_v39, %v638_v37 }
 0x5db   :  { %v828_v42 = vadd.f32 %v826_v27, %v640_v56 }
 0x5dd   :  { %v829_v63 = vadd.f32 %v2534_v48, %v828_v42 }
 0x5df   :  { %v2269_v19 = vmul.f32 -1.442695, %v829_v63 }
 0x5e1   :  { %2311 = vpow2.f32 %v2269_v19 }
 0x5e7   :  { %v2312_v32 = vpop.eup %2311 }
 0x5e8   :  { %v834_v33 = vadd.f32 1.0, %v2312_v32 }
 0x5ea   :  { %2313 = vrcp.f32 %v834_v33  ;;  %v846_v9 = vand.u32 2147483648, %v834_v33  ;;  %v844_v11 = vand.u32 2147483647, %v834_v33  ;;  %vm840_vm14 = vweird.f32 %v834_v33 }
 0x5eb   :  { %2315 = vtanh.f32 %v829_v63 }
 0x5ec   :  { %v847_v39 = vor.u32 1.1754944e-38, %v846_v9  ;;  %vm845_vm1 = vcmp.eq.f32.partialorder %v844_v11, 8.507059e+37 }
 0x5f0   :  { %v2314_v61 = vpop.eup %2313 }
 0x5f1   :  { %v836_v7 = vmul.f32 %v2314_v61, %v834_v33  ;;  %vm841_vm13 = vweird.f32 %v2314_v61  ;;  %v2316_v48 = vpop.eup %2315 }
 0x5f2   :  { %vm842_vm15 = vmor %vm840_vm14, %vm841_vm13 }
 0x5f3   :  { %v837_v43 = vsub.f32 1.0, %v836_v7 }
 0x5f5   :  { %v838_v2 = vmul.f32 %v2314_v61, %v837_v43 }
 0x5f7   :  { %v839_v58 = vadd.f32 %v2314_v61, %v838_v2 }
 0x5f9   :  { %v843_v27 = vsel %vm842_vm15, %v2314_v61, %v839_v58 }
 0x5fa   :  { %v848_v54 = vsel %vm845_vm1, %v847_v39, %v843_v27 }
 0x5fb   :  { %v850_v60 = vsel %vm2537_vm4, %v2316_v48, %v848_v54 }
 0x5fc   :  { %853 = vrot.lane.b32.xlu0 %v850_v60, %s2365_s16  ;;  %v851_v25 = vmul.f32 %v850_v60, %v2554_v23 }
 0x66e   :  { %v854_v42 = vpop.permute.xlu0 %853 }
 0x66f   :  { %v856_v14 = vmul.f32 %v854_v42, %v850_v60  ;;  %v3182_v42 = vld [vmem:[#allocation7_spill] sm:$0xff] }
 0x671   :  { %858 = vrot.lane.b32.xlu2 %v856_v14, %s2364_s5  ;;  %v3183_v14 = vld [vmem:[#allocation4_spill] sm:$0xff] }
 0x6cb   :  { %v859_v28 = vpop.permute.xlu2 %858 }
 0x6cc   :  { %v2865_v37 = vadd.f32 %v859_v28, %v851_v25  ;;  %v3184_v25 = vld [vmem:[#allocation8_spill] sm:$0xff]  ;;  %v3185_v28 = vld [vmem:[#allocation5_spill] sm:$0xff] }
 0x6ce   :  { %2317 = vtanh.f32 %v2865_v37 }
 0x6d4   :  { %v2318_v56 = vpop.eup %2317 }
 0x6d5   :  { %864 = vrot.lane.b32.xlu0 %v2318_v56, %s2365_s16  ;;  %v3186_v56 = vld [vmem:[#allocation9_spill] sm:$0xff] }
 0x6dd   :  { %873 = vrot.lane.b32.xlu0 %v2834_v59, %s2365_s16 }
 0x747   :  { %v865_v63 = vpop.permute.xlu0 %864 }
 0x748   :  { %v867_v19 = vmul.f32 %v865_v63, %v850_v60  ;;  %v3181_v60 = vld [vmem:[#allocation3_spill] sm:$0xff]  ;;  %v3187_v63 = vld [vmem:[#allocation6_spill] sm:$0xff] }
 0x74a   :  { %869 = vrot.lane.b32.xlu2 %v867_v19, %s2364_s5  ;;  %v3188_v19 = vld [vmem:[#allocation10_spill] sm:$0xff] }
 0x74f   :  { %v874_v32 = vpop.permute.xlu0 %873 }
 0x7a4   :  { %v870_v33 = vpop.permute.xlu2 %869 }
 0x7a5   :  { %v876_v61 = vsel %vm66_vm0, %v870_v33, %v874_v32  ;;  %v1179_v23 = vsel %vm66_vm0, %v870_v33, 0  ;;  %v3189_v32 = vld [vmem:[#allocation11_spill] sm:$0xff]  ;;  %v3190_v33 = vld [vmem:[#allocation12_spill] sm:$0xff] }
 0x7a6   :  { %v878_v7 = vsel %vm324_vm8, %v876_v61, 0  ;;  %v1201_v43 = vand.u32 4294901760, %v1179_v23 }
 0x7a7   :  { %v904_v9 = vand.u32 4294901760, %v878_v7 }
 0x7a8   :  { %v1202_v2 = vsub.f32 %v1179_v23, %v1201_v43 }
 0x7a9   :  { %v905_v11 = vsub.f32 %v878_v7, %v904_v9  ;;  %970 = vmatmul.f32.vlgmr.msra.gmra.mxu1 %v904_v9  ;;  %v3191_v7 = vld [vmem:[#allocation13_spill] sm:$0xff] }
 0x7aa   :  { %v1203_v58 = vand.u32 4294901760, %v1202_v2  ;;  %1354 = vmatpush.msra.mxu1 %v2439_v4 }
 0x7ab   :  { %1008 = vmatmul.f32.vlgmr.msrb.gmra.mxu2 %v905_v11  ;;  %v906_v59 = vand.u32 4294901760, %v905_v11 }
 0x7ac   :  { %1265 = vmatpush.msrb.mxu2 %v2462_v13  ;;  %1356 = vmatpush.msra.mxu1 %v2441_v5  ;;  %v1204_v39 = vsub.f32 %v1202_v2, %v1203_v58 }
 0x7ad   :  { %1039 = vmatmul.f32.vlgmr.msrb.gmra.mxu3 %v906_v59  ;;  %v907_v27 = vsub.f32 %v905_v11, %v906_v59 }
 0x7ae   :  { %1268 = vmatpush.msrb.mxu2 %v2465_v15  ;;  %1294 = vmatpush.msrb.mxu3 %v2439_v4  ;;  %v1205_v54 = vand.u32 4294901760, %v1204_v39 }
 0x7af   :  { %v908_v48 = vand.u32 4294901760, %v907_v27  ;;  %1358 = vmatpush.msra.mxu1 %v2443_v6 }
 0x7b0   :  { %1271 = vmatpush.msrb.mxu2 %v2468_v16  ;;  %1296 = vmatpush.msrb.mxu3 %v2441_v5 }
 0x7b1   :  { %909 = vmatmul.f32.vlgmr.msra.gmra.mxu0 %v908_v48  ;;  %1113 = vmatmul.f32.vlgmr.msrb.gmra.mxu1 %v904_v9 }
 0x7b2   :  { %1360 = vmatpush.msra.mxu1 %v2454_v10  ;;  %1274 = vmatpush.msrb.mxu2 %v2472_v17 }
 0x7b3   :  { %1206 = vmatmul.f32.vlgmr.msra.gmra.mxu2 %v1205_v54  ;;  %1298 = vmatpush.msrb.mxu3 %v2443_v6 }
 0x7b4   :  { %1323 = vmatpush.msra.mxu0 %v2477_v18  ;;  %1427 = vmatpush.msra.mxu2 %v2567_v30 }
 0x7b5   :  { %1247 = vmatmul.f32.vlgmr.msra.gmra.mxu3 %v1201_v43  ;;  %1559 = vmatpush.msrb.mxu1 %v2567_v30 }
 0x7b6   :  { %1300 = vmatpush.msrb.mxu3 %v2454_v10  ;;  %1327 = vmatpush.msra.mxu0 %v2480_v20 }
 0x7b7   :  { %1429 = vmatpush.msra.mxu2 %v2569_v31  ;;  %1561 = vmatpush.msrb.mxu1 %v2569_v31 }
 0x7b8   :  { %1464 = vmatpush.msra.mxu3 %v2651_v0  ;;  %1331 = vmatpush.msra.mxu0 %v2483_v21 }
 0x7b9   :  { %1084 = vmatmul.f32.vlgmr.msrb.gmra.mxu0 %v904_v9  ;;  %1362 = vmatmul.f32.vlgmr.msra.gmra.mxu1 %v1201_v43 }
 0x7ba   :  { %1335 = vmatpush.msra.mxu0 %v2487_v22  ;;  %1470 = vmatpush.msra.mxu3 %v2653_v1 }
 0x7bb   :  { %1277 = vmatmul.f32.vlgmr.msrb.gmra.mxu2 %v1202_v2  ;;  %1563 = vmatpush.msrb.mxu1 %v2571_v34 }
 0x7bc   :  { %1522 = vmatpush.msrb.mxu0 %v2595_v44  ;;  %1476 = vmatpush.msra.mxu3 %v2664_v8 }
 0x7bd   :  { %1431 = vmatpush.msra.mxu2 %v2571_v34  ;;  %1304 = vmatmul.f32.vlgmr.msrb.gmra.mxu3 %v1203_v58 }
 0x7be   :  { %1525 = vmatpush.msrb.mxu0 %v2598_v45  ;;  %1482 = vmatpush.msra.mxu3 %v2675_v12 }
 0x7bf   :  { %1433 = vmatpush.msra.mxu2 %v2582_v38  ;;  %1565 = vmatpush.msrb.mxu1 %v2582_v38 }
 0x7c0   :  { %1528 = vmatpush.msrb.mxu0 %v2601_v46  ;;  %1488 = vmatpush.msra.mxu3 %v2686_v24 }
 0x7c1   :  { %1435 = vmatpush.msra.mxu2 %v2584_v40  ;;  %1337 = vmatmul.f32.vlgmr.msra.gmra.mxu0 %v1201_v43 }
 0x7c2   :  { %1494 = vmatpush.msra.mxu3 %v2694_v26  ;;  %1531 = vmatpush.msrb.mxu0 %v2608_v49 }
 0x7c3   :  { %1437 = vmatpush.msra.mxu2 %v2586_v41  ;;  %1567 = vmatpush.msrb.mxu1 %v2584_v40 }
 0x7c4   :  { %1500 = vmatpush.msra.mxu3 %v2702_v35  ;;  %1534 = vmatpush.msrb.mxu0 %v2611_v50 }
 0x7c5   :  { %1439 = vmatpush.msra.mxu2 %v2605_v47  ;;  %1569 = vmatpush.msrb.mxu1 %v2586_v41 }
 0x7c6   :  { %1506 = vmatpush.msra.mxu3 %v2708_v36  ;;  %1537 = vmatpush.msrb.mxu0 %v2614_v51 }
 0x7c7   :  { %1441 = vmatpush.msra.mxu2 %v2627_v55  ;;  %1571 = vmatpush.msrb.mxu1 %v2605_v47 }
 0x7c8   :  { %1635 = vmatpush.msrb.mxu3 %v2567_v30  ;;  %1540 = vmatpush.msrb.mxu0 %v2633_v57 }
 0x7c9   :  { %1592 = vmatpush.msrb.mxu2 %v2617_v52  ;;  %1573 = vmatpush.msrb.mxu1 %v2627_v55 }
 0x7ca   :  { %1637 = vmatpush.msrb.mxu3 %v2569_v31  ;;  %1543 = vmatpush.msrb.mxu0 %v2660_v3 }
 0x7cb   :  { %1596 = vmatpush.msrb.mxu2 %v2620_v53  ;;  %1765 = vmatpush.msra.mxu1 %v3181_v60 }
 0x7cc   :  { %1639 = vmatpush.msrb.mxu3 %v2571_v34  ;;  %1732 = vmatpush.msra.mxu0 %v2439_v4 }
 0x7cd   :  { %1600 = vmatpush.msrb.mxu2 %v3182_v42  ;;  %1771 = vmatpush.msra.mxu1 %v3183_v14 }
 0x7ce   :  { %1641 = vmatpush.msrb.mxu3 %v2582_v38  ;;  %1734 = vmatpush.msra.mxu0 %v2441_v5 }
 0x7cf   :  { %1604 = vmatpush.msrb.mxu2 %v3184_v25  ;;  %1777 = vmatpush.msra.mxu1 %v3185_v28 }
 0x7d0   :  { %1643 = vmatpush.msrb.mxu3 %v2584_v40  ;;  %1736 = vmatpush.msra.mxu0 %v2443_v6 }
 0x7d1   :  { %1608 = vmatpush.msrb.mxu2 %v3186_v56  ;;  %1783 = vmatpush.msra.mxu1 %v3187_v63 }
 0x7d2   :  { %1645 = vmatpush.msrb.mxu3 %v2586_v41  ;;  %1738 = vmatpush.msra.mxu0 %v2454_v10 }
 0x7d3   :  { %1612 = vmatpush.msrb.mxu2 %v3188_v19 }
 0x7d4   :  { %1647 = vmatpush.msrb.mxu3 %v2605_v47 }
 0x7d5   :  { %1616 = vmatpush.msrb.mxu2 %v3189_v32 }
 0x7d6   :  { %1649 = vmatpush.msrb.mxu3 %v2627_v55 }
 0x7d7   :  { %1620 = vmatpush.msrb.mxu2 %v3190_v33 }
 0x826   :  { %v971_v61 = vpop.f32.mrf.mxu1 }
 0x82e   :  { %v910_v23 = vpop.f32.mrf.mxu0  ;;  %v1009_v2 = vpop.f32.mrf.mxu2 }
 0x82f   :  { %v911_v43 = vadd.f32 %v3191_v7, %v910_v23  ;;  %v1114_v48 = vpop.f32.mrf.mxu1 }
 0x830   :  { %v1040_v58 = vpop.f32.mrf.mxu3 }
 0x831   :  { %v972_v9 = vadd.f32 %v971_v61, %v911_v43 }
 0x833   :  { %v1010_v11 = vadd.f32 %v1009_v2, %v972_v9 }
 0x835   :  { %v1041_v59 = vadd.f32 %v1040_v58, %v1010_v11 }
 0x836   :  { %v1085_v39 = vpop.f32.mrf.mxu0 }
 0x837   :  { %v1086_v27 = vadd.f32 %v1085_v39, %v1041_v59  ;;  %v1363_v19 = vpop.f32.mrf.mxu1 }
 0x839   :  { %v1115_v54 = vadd.f32 %v1114_v48, %v1086_v27 }
 0x83b   :  { %v2270_v60 = vmul.f32 -1.442695, %v1115_v54 }
 0x83d   :  { %2319 = vpow2.f32 %v2270_v60 }
 0x843   :  { %v2320_v14 = vpop.eup %2319 }
 0x844   :  { %v1121_v28 = vadd.f32 1.0, %v2320_v14 }
 0x846   :  { %2321 = vrcp.f32 %v1121_v28  ;;  %v1133_v32 = vand.u32 2147483648, %v1121_v28  ;;  %v1131_v61 = vand.u32 2147483647, %v1121_v28  ;;  %vm1127_vm3 = vweird.f32 %v1121_v28 }
 0x847   :  { %2323 = vtanh.f32 %v1115_v54 }
 0x848   :  { %v1134_v9 = vor.u32 1.1754944e-38, %v1133_v32  ;;  %vm1132_vm6 = vcmp.eq.f32.partialorder %v1131_v61, 8.507059e+37 }
 0x84c   :  { %v2322_v63 = vpop.eup %2321 }
 0x84d   :  { %v1123_v29 = vmul.f32 %v2322_v63, %v1121_v28  ;;  %vm1128_vm2 = vweird.f32 %v2322_v63  ;;  %v2324_v11 = vpop.eup %2323  ;;  %v3194_v28 = vld [vmem:[#allocation15_spill] sm:$0xff] }
 0x84e   :  { %vm1129_vm5 = vmor %vm1127_vm3, %vm1128_vm2 }
 0x84f   :  { %v1124_v33 = vsub.f32 1.0, %v1123_v29 }
 0x851   :  { %v1125_v23 = vmul.f32 %v2322_v63, %v1124_v33  ;;  %v3192_v33 = vld [vmem:[#allocation14_spill] sm:$0xff] }
 0x853   :  { %v1126_v43 = vadd.f32 %v2322_v63, %v1125_v23 }
 0x855   :  { %v1130_v2 = vsel %vm1129_vm5, %v2322_v63, %v1126_v43  ;;  %v1164_v43 = vld [vmem:[%s3137_s0 + $0x1] sm:$0x1] }
 0x856   :  { %v1135_v58 = vsel %vm1132_vm6, %v1134_v9, %v1130_v2  ;;  %v1169_v9 = vsub.f32 1.0, %v1164_v43  ;;  %v2293_v2 = vld [vmem:[%s3137_s0 + $0x1] ss:$0 sm:$0xff] }
 0x857   :  { %v1137_v59 = vsel %vm2537_vm4, %v2324_v11, %v1135_v58  ;;  %v2271_v11 = vld [vmem:[%s3129_s1 + $0x10] sm:$0xff] }
 0x858   :  { %1140 = vrot.lane.b32.xlu2 %v1137_v59, %s2365_s16  ;;  %v1138_v27 = vmul.f32 %v1137_v59, %v3192_v33  ;;  %v1170_v58 = vperm.slane %v1169_v9, 0  ;;  %v1168_v33 = vmul.f32 %v2293_v2, %v2271_v11  ;;  %v2979_v2 = vld [vmem:[%s3131_s4] ss:$0 sm:$0xff] }
 0x8b2   :  { %v1141_v39 = vpop.permute.xlu2 %1140 }
 0x8b3   :  { %v1143_v29 = vmul.f32 %v1141_v39, %v1137_v59  ;;  %v3195_v39 = vld [vmem:[#allocation16_spill] sm:$0xff] }
 0x8b5   :  { %1145 = vrot.lane.b32.xlu0 %v1143_v29, %s2364_s5 }
 0x927   :  { %v1146_v48 = vpop.permute.xlu0 %1145 }
 0x928   :  { %v2953_v54 = vadd.f32 %v1146_v48, %v1138_v27 }
 0x92a   :  { %3193 = vst [vmem:[#allocation3_spill] sm:$0xff] %v2953_v54  ;;  %2325 = vtanh.f32 %v2953_v54  ;;  %v1338_v54 = vpop.f32.mrf.mxu0 }
 0x930   :  { %v2326_v32 = vpop.eup %2325 }
 0x931   :  { %1151 = vrot.lane.b32.xlu2 %v2326_v32, %s2365_s16  ;;  %v1207_v32 = vpop.f32.mrf.mxu2 }
 0x98b   :  { %v1152_v60 = vpop.permute.xlu2 %1151 }
 0x98c   :  { %v2957_v14 = vmul.f32 %v1152_v60, %v1137_v59  ;;  %v1248_v60 = vpop.f32.mrf.mxu3 }
 0x98e   :  { %v1155_v63 = vmul.f32 %v2957_v14, %v3194_v28 }
 0x990   :  { %1157 = vrot.lane.b32.xlu0 %v1155_v63, %s2364_s5  ;;  %v1278_v63 = vpop.f32.mrf.mxu2 }
 0x994   :  { %v1305_v43 = vpop.f32.mrf.mxu3 }
 0xa02   :  { %v1158_v23 = vpop.permute.xlu0 %1157 }
 0xa03   :  { %v1160_v61 = vsel %vm66_vm0, %v1158_v23, 0.0  ;;  %v1249_v23 = vadd.f32 %v1248_v60, %v1207_v32 }
 0xa04   :  { %1161 = vadd.xlane.f32.xlu2 %v1160_v61 }
 0xa05   :  { %v1279_v61 = vadd.f32 %v1278_v63, %v1249_v23 }
 0xa07   :  { %v1306_v28 = vadd.f32 %v1305_v43, %v1279_v61 }
 0xa09   :  { %v1339_v7 = vadd.f32 %v1338_v54, %v1306_v28 }
 0xa0b   :  { %v1364_v56 = vadd.f32 %v1363_v19, %v1339_v7 }
 0xa77   :  { %v1162_v59 = vpop.xlane.xlu2 %1161 }
 0xa78   :  { %v2973_v29 = vadd.f32 %v3195_v39, %v1162_v59  ;;  %v2985_v59 = vld [vmem:[%s3132_s6] ss:$0 sm:$0xff] }
 0xa7a   :  { %v1171_v27 = vmul.f32 %v1170_v58, %v2973_v29 }
 0xa7c   :  { %v1172_v48 = vadd.f32 %v1171_v27, %v1168_v33 }
 0xa7e   :  { %1175 = vperm.xlu1 %2286, %v1172_v48  }
 0xaf0   :  { %v1176_v9 = vpop.permute.xlu1 %1175 }
 0xaf1   :  { %v1178_v11 = vmul.f32 %v2979_v2, %v1176_v9 }
 0xaf3   :  { %v1366_v58 = vadd.f32 %v1364_v56, %v1178_v11 }
 0xaf5   :  { %v1367_v33 = vadd.f32 %v2985_v59, %v1366_v58 }
 0xaf7   :  { %v2272_v27 = vmul.f32 -1.442695, %v1367_v33 }
 0xaf9   :  { %2327 = vpow2.f32 %v2272_v27 }
 0xaff   :  { %v2328_v54 = vpop.eup %2327 }
 0xb00   :  { %v1372_v28 = vadd.f32 1.0, %v2328_v54 }
 0xb02   :  { %2329 = vrcp.f32 %v1372_v28  ;;  %v1384_v32 = vand.u32 2147483648, %v1372_v28  ;;  %v1382_v56 = vand.u32 2147483647, %v1372_v28  ;;  %vm1378_vm9 = vweird.f32 %v1372_v28 }
 0xb03   :  { %2331 = vtanh.f32 %v1367_v33 }
 0xb04   :  { %v1385_v23 = vor.u32 1.1754944e-38, %v1384_v32  ;;  %vm1383_vm11 = vcmp.eq.f32.partialorder %v1382_v56, 8.507059e+37 }
 0xb08   :  { %v2330_v19 = vpop.eup %2329 }
 0xb09   :  { %v1374_v7 = vmul.f32 %v2330_v19, %v1372_v28  ;;  %vm1379_vm7 = vweird.f32 %v2330_v19  ;;  %v2332_v43 = vpop.eup %2331 }
 0xb0a   :  { %vm1380_vm10 = vmor %vm1378_vm9, %vm1379_vm7 }
 0xb0b   :  { %v1375_v48 = vsub.f32 1.0, %v1374_v7 }
 0xb0d   :  { %v1376_v60 = vmul.f32 %v2330_v19, %v1375_v48 }
 0xb0f   :  { %v1377_v63 = vadd.f32 %v2330_v19, %v1376_v60 }
 0xb11   :  { %v1381_v61 = vsel %vm1380_vm10, %v2330_v19, %v1377_v63  ;;  %vm2254_vm10 = vcmask 15360  }
 0xb12   :  { %v1386_v9 = vsel %vm1383_vm11, %v1385_v23, %v1381_v61  ;;  %vm2256_vm11 = vcmask 23552  }
 0xb13   :  { %v1388_v11 = vsel %vm2537_vm4, %v2332_v43, %v1386_v9 }
 0xb14   :  { %1391 = vrot.lane.b32.xlu0 %v1388_v11, %s2365_s16  ;;  %v1389_v33 = vmul.f32 %v1388_v11, %v2865_v37 }
 0xb86   :  { %v1392_v58 = vpop.permute.xlu0 %1391 }
 0xb87   :  { %v1394_v27 = vmul.f32 %v1392_v58, %v1388_v11 }
 0xb89   :  { %1396 = vrot.lane.b32.xlu0 %v1394_v27, %s2364_s5 }
 0xbfb   :  { %v1397_v54 = vpop.permute.xlu0 %1396 }
 0xbfc   :  { %v2993_v7 = vadd.f32 %v1397_v54, %v1389_v33 }
 0xbfe   :  { %2333 = vtanh.f32 %v2993_v7 }
 0xc04   :  { %v2334_v28 = vpop.eup %2333 }
 0xc05   :  { %1402 = vrot.lane.b32.xlu0 %v2334_v28, %s2365_s16 }
 0xc0d   :  { %1411 = vrot.lane.b32.xlu0 %v2957_v14, %s2365_s16 }
 0xc77   :  { %v1403_v19 = vpop.permute.xlu0 %1402 }
 0xc78   :  { %v1405_v48 = vmul.f32 %v1403_v19, %v1388_v11  ;;  %v3202_v19 = vld [vmem:[#allocation15_spill] sm:$0xff] }
 0xc7a   :  { %1407 = vrot.lane.b32.xlu1 %v1405_v48, %s2364_s5 }
 0xc7f   :  { %v1412_v32 = vpop.permute.xlu0 %1411 }
 0xcec   :  { %v1408_v60 = vpop.permute.xlu1 %1407 }
 0xced   :  { %v1414_v56 = vsel %vm66_vm0, %v1408_v60, %v1412_v32  ;;  %v1717_v37 = vsel %vm66_vm0, %v1408_v60, 0 }
 0xcee   :  { %v1416_v63 = vsel %vm324_vm8, %v1414_v56, 0  ;;  %v1739_v23 = vand.u32 4294901760, %v1717_v37  ;;  %v1702_v56 = vld [vmem:[%s3137_s0 + $0x2] sm:$0x1] }
 0xcef   :  { %v1442_v61 = vand.u32 4294901760, %v1416_v63 }
 0xcf0   :  { %v1740_v43 = vsub.f32 %v1717_v37, %v1739_v23  ;;  %v1707_v37 = vsub.f32 1.0, %v1702_v56 }
 0xcf1   :  { %v1443_v9 = vsub.f32 %v1416_v63, %v1442_v61  ;;  %1508 = vmatmul.f32.vlgmr.msra.gmra.mxu3 %v1442_v61  ;;  %v2294_v63 = vld [vmem:[%s3137_s0 + $0x2] ss:$0 sm:$0xff] }
 0xcf2   :  { %v1741_v58 = vand.u32 4294901760, %v1740_v43  ;;  %1892 = vmatpush.msra.mxu3 %v2439_v4 }
 0xcf3   :  { %1546 = vmatmul.f32.vlgmr.msrb.gmra.mxu0 %v1443_v9  ;;  %v1444_v14 = vand.u32 4294901760, %v1443_v9 }
 0xcf4   :  { %1803 = vmatpush.msrb.mxu0 %v2462_v13  ;;  %1894 = vmatpush.msra.mxu3 %v2441_v5  ;;  %v1742_v11 = vsub.f32 %v1740_v43, %v1741_v58 }
 0xcf5   :  { %1577 = vmatmul.f32.vlgmr.msrb.gmra.mxu1 %v1444_v14  ;;  %v1445_v27 = vsub.f32 %v1443_v9, %v1444_v14 }
 0xcf6   :  { %1806 = vmatpush.msrb.mxu0 %v2465_v15  ;;  %1832 = vmatpush.msrb.mxu1 %v2439_v4  ;;  %v1743_v54 = vand.u32 4294901760, %v1742_v11  ;;  %v3196_v4 = vld [vmem:[#allocation9_spill] sm:$0xff] }
 0xcf7   :  { %v1446_v33 = vand.u32 4294901760, %v1445_v27  ;;  %1896 = vmatpush.msra.mxu3 %v2443_v6 }
 0xcf8   :  { %1809 = vmatpush.msrb.mxu0 %v2468_v16  ;;  %1834 = vmatpush.msrb.mxu1 %v2441_v5  ;;  %v3197_v5 = vld [vmem:[#allocation10_spill] sm:$0xff]  ;;  %v3200_v16 = vld [vmem:[#allocation13_spill] sm:$0xff] }
 0xcf9   :  { %1447 = vmatmul.f32.vlgmr.msra.gmra.mxu2 %v1446_v33  ;;  %1651 = vmatmul.f32.vlgmr.msrb.gmra.mxu3 %v1442_v61 }
 0xcfa   :  { %1898 = vmatpush.msra.mxu3 %v2454_v10  ;;  %1812 = vmatpush.msrb.mxu0 %v2472_v17 }
 0xcfb   :  { %1744 = vmatmul.f32.vlgmr.msra.gmra.mxu0 %v1743_v54  ;;  %1836 = vmatpush.msrb.mxu1 %v2443_v6  ;;  %v3198_v6 = vld [vmem:[#allocation11_spill] sm:$0xff] }
 0xcfc   :  { %1861 = vmatpush.msra.mxu2 %v2477_v18  ;;  %1965 = vmatpush.msra.mxu0 %v2567_v30 }
 0xcfd   :  { %1785 = vmatmul.f32.vlgmr.msra.gmra.mxu1 %v1739_v23  ;;  %2097 = vmatpush.msrb.mxu3 %v2567_v30 }
 0xcfe   :  { %1838 = vmatpush.msrb.mxu1 %v2454_v10  ;;  %1865 = vmatpush.msra.mxu2 %v2480_v20  ;;  %v3199_v10 = vld [vmem:[#allocation12_spill] sm:$0xff] }
 0xcff   :  { %1967 = vmatpush.msra.mxu0 %v2569_v31  ;;  %2099 = vmatpush.msrb.mxu3 %v2569_v31 }
 0xd00   :  { %2002 = vmatpush.msra.mxu1 %v2651_v0  ;;  %1869 = vmatpush.msra.mxu2 %v2483_v21 }
 0xd01   :  { %1622 = vmatmul.f32.vlgmr.msrb.gmra.mxu2 %v1442_v61  ;;  %1900 = vmatmul.f32.vlgmr.msra.gmra.mxu3 %v1739_v23  ;;  %v1708_v61 = vperm.slane %v1707_v37, 0 }
 0xd02   :  { %1873 = vmatpush.msra.mxu2 %v2487_v22  ;;  %2008 = vmatpush.msra.mxu1 %v2653_v1 }
 0xd03   :  { %1815 = vmatmul.f32.vlgmr.msrb.gmra.mxu0 %v1740_v43  ;;  %2101 = vmatpush.msrb.mxu3 %v2571_v34 }
 0xd04   :  { %2060 = vmatpush.msrb.mxu2 %v2595_v44  ;;  %2014 = vmatpush.msra.mxu1 %v2664_v8 }
 0xd05   :  { %1969 = vmatpush.msra.mxu0 %v2571_v34  ;;  %1842 = vmatmul.f32.vlgmr.msrb.gmra.mxu1 %v1741_v58 }
 0xd06   :  { %2063 = vmatpush.msrb.mxu2 %v2598_v45  ;;  %2020 = vmatpush.msra.mxu1 %v2675_v12 }
 0xd07   :  { %1971 = vmatpush.msra.mxu0 %v2582_v38  ;;  %2103 = vmatpush.msrb.mxu3 %v2582_v38 }
 0xd08   :  { %2066 = vmatpush.msrb.mxu2 %v2601_v46  ;;  %2026 = vmatpush.msra.mxu1 %v2686_v24  ;;  %v3201_v24 = vld [vmem:[#allocation3_spill] sm:$0xff] }
 0xd09   :  { %1973 = vmatpush.msra.mxu0 %v2584_v40  ;;  %1875 = vmatmul.f32.vlgmr.msra.gmra.mxu2 %v1739_v23  ;;  %v2274_v23 = vld [vmem:[%s3129_s1 + $0x18] sm:$0xff] }
 0xd0a   :  { %2032 = vmatpush.msra.mxu1 %v2694_v26  ;;  %2069 = vmatpush.msrb.mxu2 %v2608_v49  ;;  %v1706_v58 = vmul.f32 %v2294_v63, %v2274_v23 }
 0xd0b   :  { %1975 = vmatpush.msra.mxu0 %v2586_v41  ;;  %2105 = vmatpush.msrb.mxu3 %v2584_v40 }
 0xd0c   :  { %2038 = vmatpush.msra.mxu1 %v2702_v35  ;;  %2072 = vmatpush.msrb.mxu2 %v2611_v50 }
 0xd0d   :  { %1977 = vmatpush.msra.mxu0 %v2605_v47  ;;  %2107 = vmatpush.msrb.mxu3 %v2586_v41 }
 0xd0e   :  { %2044 = vmatpush.msra.mxu1 %v2708_v36  ;;  %2075 = vmatpush.msrb.mxu2 %v2614_v51 }
 0xd0f   :  { %1979 = vmatpush.msra.mxu0 %v2627_v55  ;;  %2109 = vmatpush.msrb.mxu3 %v2605_v47 }
 0xd10   :  { %2173 = vmatpush.msrb.mxu1 %v2567_v30  ;;  %2078 = vmatpush.msrb.mxu2 %v2633_v57 }
 0xd11   :  { %2130 = vmatpush.msrb.mxu0 %v2617_v52  ;;  %2111 = vmatpush.msrb.mxu3 %v2627_v55 }
 0xd12   :  { %2175 = vmatpush.msrb.mxu1 %v2569_v31  ;;  %2081 = vmatpush.msrb.mxu2 %v2660_v3 }
 0xd13   :  { %2134 = vmatpush.msrb.mxu0 %v2620_v53 }
 0xd14   :  { %2177 = vmatpush.msrb.mxu1 %v2571_v34 }
 0xd15   :  { %2138 = vmatpush.msrb.mxu0 %v3182_v42 }
 0xd16   :  { %2179 = vmatpush.msrb.mxu1 %v2582_v38 }
 0xd17   :  { %2142 = vmatpush.msrb.mxu0 %v3184_v25 }
 0xd18   :  { %2181 = vmatpush.msrb.mxu1 %v2584_v40 }
 0xd19   :  { %2146 = vmatpush.msrb.mxu0 %v3196_v4 }
 0xd1a   :  { %2183 = vmatpush.msrb.mxu1 %v2586_v41 }
 0xd1b   :  { %2150 = vmatpush.msrb.mxu0 %v3197_v5 }
 0xd1c   :  { %2185 = vmatpush.msrb.mxu1 %v2605_v47 }
 0xd1d   :  { %2154 = vmatpush.msrb.mxu0 %v3198_v6 }
 0xd1e   :  { %2187 = vmatpush.msrb.mxu1 %v2627_v55 }
 0xd1f   :  { %2158 = vmatpush.msrb.mxu0 %v3199_v10 }
 0xd70   :  { %v1547_v20 = vpop.f32.mrf.mxu0 }
 0xd72   :  { %v1578_v22 = vpop.f32.mrf.mxu1 }
 0xd74   :  { %v1509_v13 = vpop.f32.mrf.mxu3 }
 0xd78   :  { %v1745_v27 = vpop.f32.mrf.mxu0 }
 0xd7a   :  { %v1786_v33 = vpop.f32.mrf.mxu1 }
 0xd7b   :  { %v1787_v4 = vadd.f32 %v1786_v33, %v1745_v27 }
 0xd7c   :  { %v1448_v15 = vpop.f32.mrf.mxu2  ;;  %v1652_v38 = vpop.f32.mrf.mxu3 }
 0xd7d   :  { %v1449_v17 = vadd.f32 %v3200_v16, %v1448_v15 }
 0xd7f   :  { %v1510_v18 = vadd.f32 %v1509_v13, %v1449_v17 }
 0xd80   :  { %v1816_v54 = vpop.f32.mrf.mxu0 }
 0xd81   :  { %v1548_v21 = vadd.f32 %v1547_v20, %v1510_v18  ;;  %v1817_v5 = vadd.f32 %v1816_v54, %v1787_v4 }
 0xd82   :  { %v1843_v6 = vpop.f32.mrf.mxu1 }
 0xd83   :  { %v1579_v30 = vadd.f32 %v1578_v22, %v1548_v21  ;;  %v1844_v13 = vadd.f32 %v1843_v6, %v1817_v5 }
 0xd84   :  { %v1623_v31 = vpop.f32.mrf.mxu2  ;;  %v1901_v16 = vpop.f32.mrf.mxu3 }
 0xd85   :  { %v1624_v34 = vadd.f32 %v1623_v31, %v1579_v30 }
 0xd87   :  { %v1653_v40 = vadd.f32 %v1652_v38, %v1624_v34 }
 0xd89   :  { %v2273_v41 = vmul.f32 -1.442695, %v1653_v40 }
 0xd8b   :  { %2335 = vpow2.f32 %v2273_v41 }
 0xd8c   :  { %v1876_v10 = vpop.f32.mrf.mxu2 }
 0xd8d   :  { %v1877_v15 = vadd.f32 %v1876_v10, %v1844_v13 }
 0xd8f   :  { %v1902_v18 = vadd.f32 %v1901_v16, %v1877_v15 }
 0xd91   :  { %v2336_v44 = vpop.eup %2335 }
 0xd92   :  { %v1659_v45 = vadd.f32 1.0, %v2336_v44 }
 0xd94   :  { %2337 = vrcp.f32 %v1659_v45  ;;  %v1671_v50 = vand.u32 2147483648, %v1659_v45  ;;  %v1669_v52 = vand.u32 2147483647, %v1659_v45  ;;  %vm1665_vm13 = vweird.f32 %v1659_v45 }
 0xd95   :  { %2339 = vtanh.f32 %v1653_v40 }
 0xd96   :  { %v1672_v55 = vor.u32 1.1754944e-38, %v1671_v50  ;;  %vm1670_vm15 = vcmp.eq.f32.partialorder %v1669_v52, 8.507059e+37 }
 0xd9a   :  { %v2338_v46 = vpop.eup %2337 }
 0xd9b   :  { %v1661_v47 = vmul.f32 %v2338_v46, %v1659_v45  ;;  %vm1666_vm12 = vweird.f32 %v2338_v46  ;;  %v2340_v0 = vpop.eup %2339 }
 0xd9c   :  { %vm1667_vm14 = vmor %vm1665_vm13, %vm1666_vm12  ;;  %vm2258_vm12 = vcmask 31744  }
 0xd9d   :  { %v1662_v49 = vsub.f32 1.0, %v1661_v47 }
 0xd9f   :  { %v1663_v51 = vmul.f32 %v2338_v46, %v1662_v49 }
 0xda1   :  { %v1664_v53 = vadd.f32 %v2338_v46, %v1663_v51 }
 0xda3   :  { %v1668_v57 = vsel %vm1667_vm14, %v2338_v46, %v1664_v53 }
 0xda4   :  { %v1673_v1 = vsel %vm1670_vm15, %v1672_v55, %v1668_v57 }
 0xda5   :  { %v1675_v3 = vsel %vm2537_vm4, %v2340_v0, %v1673_v1 }
 0xda6   :  { %1678 = vrot.lane.b32.xlu1 %v1675_v3, %s2365_s16  ;;  %v1676_v26 = vmul.f32 %v1675_v3, %v3201_v24 }
 0xe18   :  { %v1679_v8 = vpop.permute.xlu1 %1678 }
 0xe19   :  { %v1681_v12 = vmul.f32 %v1679_v8, %v1675_v3 }
 0xe1b   :  { %1683 = vrot.lane.b32.xlu0 %v1681_v12, %s2364_s5 }
 0xe8d   :  { %v1684_v35 = vpop.permute.xlu0 %1683 }
 0xe8e   :  { %v3073_v36 = vadd.f32 %v1684_v35, %v1676_v26 }
 0xe90   :  { %2341 = vtanh.f32 %v3073_v36 }
 0xe96   :  { %v2342_v42 = vpop.eup %2341 }
 0xe97   :  { %1689 = vrot.lane.b32.xlu2 %v2342_v42, %s2365_s16 }
 0xef1   :  { %v1690_v25 = vpop.permute.xlu2 %1689 }
 0xef2   :  { %v3077_v28 = vmul.f32 %v1690_v25, %v1675_v3 }
 0xef4   :  { %v1693_v48 = vmul.f32 %v3077_v28, %v3202_v19 }
 0xef6   :  { %1695 = vrot.lane.b32.xlu1 %v1693_v48, %s2364_s5 }
 0xf68   :  { %v1696_v32 = vpop.permute.xlu1 %1695 }
 0xf69   :  { %v1698_v60 = vsel %vm66_vm0, %v1696_v32, 0.0 }
 0xf6a   :  { %1699 = vadd.xlane.f32.xlu0 %v1698_v60  ;;  %v2361_v60 = vld [vmem:[%s3134_s8] ss:$0 sm:$0xff]  ;;  %s2367_s8 = smov 1  }
 0xfdd   :  { %v1700_v43 = vpop.xlane.xlu0 %1699 }
 0xfde   :  { %v3093_v9 = vadd.f32 %v3195_v39, %v1700_v43 }
 0xfe0   :  { %v1709_v14 = vmul.f32 %v1708_v61, %v3093_v9 }
 0xfe2   :  { %v1710_v11 = vadd.f32 %v1709_v14, %v1706_v58 }
 0xfe4   :  { %1713 = vperm.xlu1 %2286, %v1710_v11  }
0x1056   :  { %v1714_v17 = vpop.permute.xlu1 %1713 }
0x1057   :  { %v1716_v39 = vmul.f32 %v2979_v2, %v1714_v17 }
0x1059   :  { %v1904_v20 = vadd.f32 %v1902_v18, %v1716_v39 }
0x105b   :  { %v1905_v21 = vadd.f32 %v2985_v59, %v1904_v20 }
0x105d   :  { %v2275_v22 = vmul.f32 -1.442695, %v1905_v21 }
0x105f   :  { %2343 = vpow2.f32 %v2275_v22 }
0x1065   :  { %v2344_v30 = vpop.eup %2343 }
0x1066   :  { %v1910_v31 = vadd.f32 1.0, %v2344_v30 }
0x1068   :  { %2345 = vrcp.f32 %v1910_v31  ;;  %v1922_v41 = vand.u32 2147483648, %v1910_v31  ;;  %v1920_v45 = vand.u32 2147483647, %v1910_v31  ;;  %vm1916_vm2 = vweird.f32 %v1910_v31 }
0x1069   :  { %2347 = vtanh.f32 %v1905_v21 }
0x106a   :  { %v1923_v2 = vor.u32 1.1754944e-38, %v1922_v41  ;;  %vm1921_vm5 = vcmp.eq.f32.partialorder %v1920_v45, 8.507059e+37 }
0x106e   :  { %v2346_v34 = vpop.eup %2345 }
0x106f   :  { %v1912_v38 = vmul.f32 %v2346_v34, %v1910_v31  ;;  %vm1917_vm1 = vweird.f32 %v2346_v34  ;;  %v2348_v59 = vpop.eup %2347 }
0x1070   :  { %vm1918_vm3 = vmor %vm1916_vm2, %vm1917_vm1 }
0x1071   :  { %v1913_v40 = vsub.f32 1.0, %v1912_v38 }
0x1073   :  { %v1914_v44 = vmul.f32 %v2346_v34, %v1913_v40 }
0x1075   :  { %v1915_v46 = vadd.f32 %v2346_v34, %v1914_v44 }
0x1077   :  { %v1919_v47 = vsel %vm1918_vm3, %v2346_v34, %v1915_v46 }
0x1078   :  { %v1924_v49 = vsel %vm1921_vm5, %v1923_v2, %v1919_v47  ;;  %v2362_v47 = vld [vmem:[#allocation2] ss:$0 sm:$0xff] }
0x1079   :  { %v1926_v50 = vsel %vm2537_vm4, %v2348_v59, %v1924_v49 }
0x107a   :  { %1929 = vrot.lane.b32.xlu1 %v1926_v50, %s2365_s16  ;;  %v1927_v53 = vmul.f32 %v1926_v50, %v2993_v7 }
0x10ec   :  { %v1930_v51 = vpop.permute.xlu1 %1929 }
0x10ed   :  { %v1932_v52 = vmul.f32 %v1930_v51, %v1926_v50 }
0x10ef   :  { %1934 = vrot.lane.b32.xlu2 %v1932_v52, %s2364_s5 }
0x1149   :  { %v1935_v55 = vpop.permute.xlu2 %1934 }
0x114a   :  { %v1937_v57 = vadd.f32 %v1935_v55, %v1927_v53 }
0x114c   :  { %2349 = vtanh.f32 %v1937_v57 }
0x1152   :  { %v2350_v0 = vpop.eup %2349 }
0x1153   :  { %1940 = vrot.lane.b32.xlu1 %v2350_v0, %s2365_s16 }
0x115b   :  { %1949 = vrot.lane.b32.xlu1 %v3077_v28, %s2365_s16 }
0x11c5   :  { %v1941_v1 = vpop.permute.xlu1 %1940 }
0x11c6   :  { %v1943_v3 = vmul.f32 %v1941_v1, %v1926_v50 }
0x11c8   :  { %1945 = vrot.lane.b32.xlu2 %v1943_v3, %s2364_s5 }
0x11cd   :  { %v1950_v8 = vpop.permute.xlu1 %1949 }
0x1222   :  { %v1946_v12 = vpop.permute.xlu2 %1945 }
0x1223   :  { %v1952_v24 = vsel %vm66_vm0, %v1946_v12, %v1950_v8 }
0x1224   :  { %v1954_v26 = vsel %vm324_vm8, %v1952_v24, 0 }
0x1225   :  { %v1980_v7 = vand.u32 4294901760, %v1954_v26 }
0x1227   :  { %v1981_v35 = vsub.f32 %v1954_v26, %v1980_v7  ;;  %2046 = vmatmul.f32.vlgmr.msra.gmra.mxu1 %v1980_v7 }
0x1229   :  { %2084 = vmatmul.f32.vlgmr.msrb.gmra.mxu2 %v1981_v35  ;;  %v1982_v42 = vand.u32 4294901760, %v1981_v35 }
0x122b   :  { %2115 = vmatmul.f32.vlgmr.msrb.gmra.mxu3 %v1982_v42  ;;  %v1983_v25 = vsub.f32 %v1981_v35, %v1982_v42 }
0x122d   :  { %v1984_v48 = vand.u32 4294901760, %v1983_v25 }
0x122f   :  { %1985 = vmatmul.f32.vlgmr.msra.gmra.mxu0 %v1984_v48  ;;  %2189 = vmatmul.f32.vlgmr.msrb.gmra.mxu1 %v1980_v7 }
0x1237   :  { %2160 = vmatmul.f32.vlgmr.msrb.gmra.mxu0 %v1980_v7 }
0x12a4   :  { %v2047_v28 = vpop.f32.mrf.mxu1 }
0x12ac   :  { %v1986_v32 = vpop.f32.mrf.mxu0  ;;  %v2085_v63 = vpop.f32.mrf.mxu2 }
0x12ad   :  { %v1987_v56 = vadd.f32 %v2361_v60, %v1986_v32  ;;  %v2190_v11 = vpop.f32.mrf.mxu1 }
0x12ae   :  { %v2116_v61 = vpop.f32.mrf.mxu3 }
0x12af   :  { %v2048_v37 = vadd.f32 %v2047_v28, %v1987_v56 }
0x12b1   :  { %v2086_v23 = vadd.f32 %v2085_v63, %v2048_v37 }
0x12b3   :  { %v2117_v43 = vadd.f32 %v2116_v61, %v2086_v23 }
0x12b4   :  { %v2161_v58 = vpop.f32.mrf.mxu0 }
0x12b5   :  { %v2162_v14 = vadd.f32 %v2161_v58, %v2117_v43 }
0x12b7   :  { %v2191_v27 = vadd.f32 %v2190_v11, %v2162_v14 }
0x12b9   :  { %v2276_v33 = vmul.f32 -1.442695, %v2191_v27 }
0x12bb   :  { %2351 = vpow2.f32 %v2276_v33 }
0x12c1   :  { %v2352_v54 = vpop.eup %2351 }
0x12c2   :  { %v2197_v4 = vadd.f32 1.0, %v2352_v54 }
0x12c4   :  { %2353 = vrcp.f32 %v2197_v4  ;;  %v2209_v13 = vand.u32 2147483648, %v2197_v4  ;;  %v2207_v16 = vand.u32 2147483647, %v2197_v4  ;;  %vm2203_vm6 = vweird.f32 %v2197_v4 }
0x12c5   :  { %2355 = vtanh.f32 %v2191_v27 }
0x12c6   :  { %v2210_v18 = vor.u32 1.1754944e-38, %v2209_v13  ;;  %vm2208_vm9 = vcmp.eq.f32.partialorder %v2207_v16, 8.507059e+37 }
0x12ca   :  { %v2354_v5 = vpop.eup %2353 }
0x12cb   :  { %v2199_v6 = vmul.f32 %v2354_v5, %v2197_v4  ;;  %vm2204_vm8 = vweird.f32 %v2354_v5  ;;  %v2356_v20 = vpop.eup %2355 }
0x12cc   :  { %vm2205_vm7 = vmor %vm2203_vm6, %vm2204_vm8 }
0x12cd   :  { %v2200_v10 = vsub.f32 1.0, %v2199_v6 }
0x12cf   :  { %v2201_v15 = vmul.f32 %v2354_v5, %v2200_v10 }
0x12d1   :  { %v2202_v17 = vadd.f32 %v2354_v5, %v2201_v15 }
0x12d3   :  { %v2206_v39 = vsel %vm2205_vm7, %v2354_v5, %v2202_v17 }
0x12d4   :  { %v2211_v21 = vsel %vm2208_vm9, %v2210_v18, %v2206_v39 }
0x12d5   :  { %v2213_v22 = vsel %vm2537_vm4, %v2356_v20, %v2211_v21  ;;  %vm2252_vm4 = vcmask 7168  }
0x12d6   :  { %2216 = vrot.lane.b32.xlu2 %v2213_v22, %s2365_s16  ;;  %v2214_v34 = vmul.f32 %v2213_v22, %v3073_v36 }
0x1330   :  { %v2217_v30 = vpop.permute.xlu2 %2216 }
0x1331   :  { %v2219_v31 = vmul.f32 %v2217_v30, %v2213_v22 }
0x1333   :  { %2221 = vrot.lane.b32.xlu1 %v2219_v31, %s2364_s5 }
0x13a5   :  { %v2222_v38 = vpop.permute.xlu1 %2221 }
0x13a6   :  { %v2224_v40 = vadd.f32 %v2222_v38, %v2214_v34 }
0x13a8   :  { %2357 = vtanh.f32 %v2224_v40 }
0x13ae   :  { %v2358_v41 = vpop.eup %2357 }
0x13af   :  { %2227 = vrot.lane.b32.xlu2 %v2358_v41, %s2365_s16  ;;  %s2369_s16 = smov 3  }
0x13b7   :  { %2241 = vrot.lane.b32.xlu2 %v2973_v29, %s2367_s8 }
0x13bf   :  { %2245 = vrot.lane.b32.xlu2 %v3093_v9, %s2368_s20  ;;  %v3203_v9 = vld [vmem:[#allocation17_spill] sm:$0xff] }
0x1409   :  { %v2228_v62 = vpop.permute.xlu2 %2227 }
0x140a   :  { %v2230_v44 = vmul.f32 %v2228_v62, %v2213_v22 }
0x140c   :  { %v2231_v45 = vmul.f32 %v2230_v44, %v3202_v19 }
0x140e   :  { %2233 = vrot.lane.b32.xlu0 %v2231_v45, %s2364_s5 }
0x1411   :  { %v2242_v49 = vpop.permute.xlu2 %2241 }
0x1412   :  { %v2253_v50 = vsel %vm2252_vm4, %v3203_v9, %v2242_v49 }
0x1419   :  { %v2246_v29 = vpop.permute.xlu2 %2245 }
0x141a   :  { %v2255_v19 = vsel %vm2254_vm10, %v2253_v50, %v2246_v29 }
0x1480   :  { %v2234_v46 = vpop.permute.xlu0 %2233 }
0x1481   :  { %v2236_v36 = vsel %vm66_vm0, %v2234_v46, 0.0 }
0x1482   :  { %2237 = vadd.xlane.f32.xlu1 %v2236_v36 }
0x14f5   :  { %v2238_v2 = vpop.xlane.xlu1 %2237 }
0x14f6   :  { %v2239_v59 = vadd.f32 %v2362_v47, %v2238_v2 }
0x14f8   :  { %2249 = vrot.lane.b32.xlu0 %v2239_v59, %s2369_s16 }
0x156a   :  { %v2250_v51 = vpop.permute.xlu0 %2249 }
0x156b   :  { %v2257_v52 = vsel %vm2256_vm11, %v2255_v19, %v2250_v51 }
0x156c   :  { %2259 = vst.msk [vmem:[%s3138_s11] sm:$0xff] %vm2258_vm12, %v2257_v52 }

// kernel: seq2seq_forward_pallas.2
= control target key start
LH: loop header
LB: loop body
LE: loop exit
PB: predicated region body
PF: predicated region fallthrough
CT: control target
= control target key end

     0   :  { %v4344_v22 = vmov 0.0   ;;  %v19_v41 = vlaneseq  ;;  %s4345_s27 = smov 64   ;;  %s4346_s28 = smov 32   ;;  %vm29_vm7 = vcmask 261120   ;;  %vm274_vm8 = vcmask 523264   ;;  %s5386_s1 = inlined_call_operand.vmem [shape: f32[32,128], index: 1, kind: input, shape index: {}]   ;;  %s5387_s0 = inlined_call_operand.vmem [shape: f32[8,8,128], index: 0, kind: input, shape index: {}]   ;;  %s5388_s2 = inlined_call_operand.vmem [shape: f32[64,128], index: 2, kind: input, shape index: {}]   ;;  %s5389_s3 = inlined_call_operand.vmem [shape: f32[1,128], index: 3, kind: input, shape index: {}]   ;;  %s5390_s4 = inlined_call_operand.vmem [shape: f32[2,8,32], index: 4, kind: output, shape index: {0}]   ;;  %s5391_s5 = inlined_call_operand.vmem [shape: f32[2,8,32], index: 5, kind: output, shape index: {1}]  }
   0x1   :  { %v28_v0 = vld [vmem:[%s5386_s1 + $0x18] sm:$0xff]  ;;  %v27_v1 = vld [vmem:[%s5386_s1 + $0x10] sm:$0xff]  ;;  %v26_v2 = vld [vmem:[%s5386_s1 + $0x8] sm:$0xff]  ;;  %s4347_s15 = smov 96  }
   0x2   :  { %v4387_v3 = vand.u32 4294901760, %v28_v0  ;;  %v4389_v4 = vand.u32 4294901760, %v27_v1  ;;  %v4391_v5 = vand.u32 4294901760, %v26_v2  ;;  %v25_v6 = vld [vmem:[%s5386_s1] sm:$0xff]  ;;  %v20_v43 = vand.u32 127, %v19_v41  ;;  %v269_v62 = vld [vmem:[%s5388_s2 + $0x38] sm:$0xff] }
   0x3   :  { %v4396_v7 = vand.u32 4294901760, %v25_v6  ;;  %v24_v35 = vld [vmem:[%s5387_s0] sm:$0xff]  ;;  %v268_v63 = vld [vmem:[%s5388_s2 + $0x30] sm:$0xff] }
   0x4   :  { %46 = vmatpush.msra.mxu2 %v4387_v3  ;;  %v4400_v8 = vsub.f32 %v28_v0, %v4387_v3  ;;  %v4403_v9 = vsub.f32 %v27_v1, %v4389_v4  ;;  %v4406_v10 = vsub.f32 %v26_v2, %v4391_v5  ;;  %206 = vmatpush.msra.mxu1 %v4387_v3  ;;  %vm21_vm0 = vcmp.ge.s32.totalorder %v20_v43, 64  ;;  %v267_v0 = vld [vmem:[%s5388_s2 + $0x28] sm:$0xff] }
   0x5   :  { %v4410_v11 = vsub.f32 %v25_v6, %v4396_v7  ;;  %vm22_vm1 = vcmp.lt.s32.totalorder %v20_v43, 96  ;;  %v4491_v1 = vand.u32 4294901760, %v269_v62  ;;  %v4493_v2 = vand.u32 4294901760, %v268_v63 }
   0x6   :  { %48 = vmatpush.msra.mxu2 %v4389_v4  ;;  %v4414_v12 = vand.u32 4294901760, %v4400_v8  ;;  %v4417_v13 = vand.u32 4294901760, %v4403_v9  ;;  %v4420_v14 = vand.u32 4294901760, %v4406_v10  ;;  %208 = vmatpush.msra.mxu1 %v4389_v4  ;;  %vm4465_vm3 = vmand %vm21_vm0, %vm22_vm1  ;;  %v4495_v6 = vand.u32 4294901760, %v267_v0 }
   0x7   :  { %v4424_v15 = vand.u32 4294901760, %v4410_v11 }
   0x8   :  { %50 = vmatpush.msra.mxu2 %v4391_v5  ;;  %v77_v16 = vsub.f32 %v4400_v8, %v4414_v12  ;;  %v83_v17 = vsub.f32 %v4403_v9, %v4417_v13  ;;  %v89_v18 = vsub.f32 %v4406_v10, %v4420_v14  ;;  %175 = vmatpush.msra.mxu0 %v4414_v12 }
   0x9   :  { %210 = vmatpush.msra.mxu1 %v4391_v5  ;;  %v95_v21 = vsub.f32 %v4410_v11, %v4424_v15 }
   0xa   :  { %52 = vmatpush.msra.mxu2 %v4396_v7  ;;  %v4436_v19 = vand.u32 4294901760, %v77_v16  ;;  %v4438_v20 = vand.u32 4294901760, %v83_v17  ;;  %179 = vmatpush.msra.mxu0 %v4417_v13  ;;  %v4446_v23 = vand.u32 4294901760, %v89_v18  ;;  %v266_v16 = vld [vmem:[%s5388_s2 + $0x20] sm:$0xff]  ;;  %v265_v17 = vld [vmem:[%s5388_s2 + $0x18] sm:$0xff]  ;;  %v264_v18 = vld [vmem:[%s5388_s2 + $0x10] sm:$0xff] }
   0xb   :  { %58 = vmatmul.f32.vlgmr.msra.gmra.mxu2 %v4344_v22  ;;  %212 = vmatpush.msra.mxu1 %v4396_v7  ;;  %v4451_v24 = vand.u32 4294901760, %v95_v21  ;;  %v4506_v21 = vand.u32 4294901760, %v266_v16 }
   0xc   :  { %5418 = vst [vmem:[#allocation2_spill] sm:$0xff] %v4436_v19  ;;  %79 = vmatpush.msra.mxu3 %v4436_v19  ;;  %117 = vmatpush.msrb.mxu2 %v4400_v8 }
   0xd   :  { %5419 = vst [vmem:[#allocation3_spill] sm:$0xff] %v4438_v20  ;;  %183 = vmatpush.msra.mxu0 %v4420_v14  ;;  %214 = vmatmul.f32.vlgmr.msra.gmra.mxu1 %v4344_v22 }
   0xe   :  { %5420 = vst [vmem:[#allocation4_spill] sm:$0xff] %v4446_v23  ;;  %85 = vmatpush.msra.mxu3 %v4438_v20  ;;  %120 = vmatpush.msrb.mxu2 %v4403_v9 }
   0xf   :  { %5421 = vst [vmem:[#allocation5_spill] sm:$0xff] %v4451_v24  ;;  %187 = vmatpush.msra.mxu0 %v4424_v15  ;;  %419 = vmatpush.msrb.mxu1 %v4491_v1 }
  0x10   :  { %91 = vmatpush.msra.mxu3 %v4446_v23  ;;  %123 = vmatpush.msrb.mxu2 %v4406_v10 }
  0x11   :  { %189 = vmatmul.f32.vlgmr.msra.gmra.mxu0 %v4344_v22  ;;  %421 = vmatpush.msrb.mxu1 %v4493_v2 }
  0x12   :  { %97 = vmatpush.msra.mxu3 %v4451_v24  ;;  %126 = vmatpush.msrb.mxu2 %v4410_v11 }
  0x13   :  { %99 = vmatmul.f32.vlgmr.msra.gmra.mxu3 %v4344_v22  ;;  %129 = vmatmul.f32.vlgmr.msrb.gmra.mxu2 %v4344_v22 }
  0x14   :  { %146 = vmatpush.msrb.mxu3 %v4387_v3  ;;  %287 = vmatpush.msra.mxu2 %v4491_v1 }
  0x15   :  { %423 = vmatpush.msrb.mxu1 %v4495_v6 }
  0x16   :  { %148 = vmatpush.msrb.mxu3 %v4389_v4  ;;  %289 = vmatpush.msra.mxu2 %v4493_v2 }
  0x17   :  { %425 = vmatpush.msrb.mxu1 %v4506_v21 }
  0x18   :  { %150 = vmatpush.msrb.mxu3 %v4391_v5  ;;  %291 = vmatpush.msra.mxu2 %v4495_v6 }
  0x1a   :  { %152 = vmatpush.msrb.mxu3 %v4396_v7  ;;  %293 = vmatpush.msra.mxu2 %v4506_v21 }
  0x1b   :  { %156 = vmatmul.f32.vlgmr.msrb.gmra.mxu3 %v4344_v22  ;;  %v4508_v22 = vand.u32 4294901760, %v265_v17 }
  0x1d   :  { %295 = vmatpush.msra.mxu2 %v4508_v22  ;;  %427 = vmatpush.msrb.mxu1 %v4508_v22 }
  0x8a   :  { %v215_v33 = vpop.f32.mrf.mxu1 }
  0x8e   :  { %v59_v25 = vpop.f32.mrf.mxu2  ;;  %v190_v31 = vpop.f32.mrf.mxu0 }
  0x96   :  { %v100_v26 = vpop.f32.mrf.mxu3  ;;  %v130_v28 = vpop.f32.mrf.mxu2 }
  0x97   :  { %v101_v27 = vadd.f32 %v100_v26, %v59_v25  ;;  %v4510_v25 = vand.u32 4294901760, %v264_v18  ;;  %v263_v26 = vld [vmem:[%s5388_s2 + $0x8] sm:$0xff] }
  0x99   :  { %v131_v29 = vadd.f32 %v130_v28, %v101_v27  ;;  %v262_v27 = vld [vmem:[%s5388_s2] sm:$0xff]  ;;  %v4519_v28 = vsub.f32 %v269_v62, %v4491_v1  ;;  %297 = vmatpush.msra.mxu2 %v4510_v25  ;;  %429 = vmatpush.msrb.mxu1 %v4510_v25 }
  0x9b   :  { %382 = vmatpush.msrb.mxu0 %v4519_v28 }
  0x9e   :  { %v157_v30 = vpop.f32.mrf.mxu3 }
  0x9f   :  { %v158_v32 = vadd.f32 %v157_v30, %v131_v29  ;;  %v4522_v29 = vsub.f32 %v268_v63, %v4493_v2  ;;  %v4525_v30 = vsub.f32 %v267_v0, %v4495_v6 }
  0xa1   :  { %v191_v34 = vadd.f32 %v190_v31, %v158_v32  ;;  %v4529_v31 = vand.u32 4294901760, %v263_v26  ;;  %v4532_v32 = vsub.f32 %v266_v16, %v4506_v21  ;;  %385 = vmatpush.msrb.mxu0 %v4522_v29 }
  0xa3   :  { %v216_v36 = vadd.f32 %v215_v33, %v191_v34  ;;  %v4535_v33 = vsub.f32 %v265_v17, %v4508_v22  ;;  %v4538_v34 = vsub.f32 %v264_v18, %v4510_v25  ;;  %388 = vmatpush.msrb.mxu0 %v4525_v30  ;;  %299 = vmatpush.msra.mxu2 %v4529_v31 }
  0xa4   :  { %431 = vmatpush.msrb.mxu1 %v4529_v31 }
  0xa5   :  { %v218_v37 = vadd.f32 %v216_v36, %v24_v35  ;;  %v4541_v35 = vand.u32 4294901760, %v4519_v28  ;;  %v4544_v36 = vand.u32 4294901760, %v4522_v29  ;;  %391 = vmatpush.msrb.mxu0 %v4532_v32 }
  0xa7   :  { %v4184_v38 = vmul.f32 -1.442695, %v218_v37  ;;  %5424 = vst [vmem:[#allocation6_spill] sm:$0xff] %v4544_v36  ;;  %v322_v41 = vsub.f32 %v4519_v28, %v4541_v35  ;;  %394 = vmatpush.msrb.mxu0 %v4535_v33 }
  0xa9   :  { %4214 = vpow2.f32 %v4184_v38  ;;  %v4551_v38 = vand.u32 4294901760, %v262_v27  ;;  %397 = vmatpush.msrb.mxu0 %v4538_v34 }
  0xab   :  { %301 = vmatpush.msra.mxu2 %v4551_v38  ;;  %433 = vmatpush.msrb.mxu1 %v4551_v38 }
  0xad   :  { %452 = vmatpush.msrb.mxu2 %v4541_v35  ;;  %603 = vmatpush.msra.mxu1 %v4436_v19 }
  0xaf   :  { %v4215_v39 = vpop.eup %4214  ;;  %456 = vmatpush.msrb.mxu2 %v4544_v36  ;;  %609 = vmatpush.msra.mxu1 %v4438_v20 }
  0xb0   :  { %v223_v40 = vadd.f32 1.0, %v4215_v39  ;;  %v4554_v39 = vand.u32 4294901760, %v4532_v32 }
  0xb1   :  { %615 = vmatpush.msra.mxu1 %v4446_v23 }
  0xb2   :  { %4216 = vrcp.f32 %v223_v40  ;;  %v235_v46 = vand.u32 2147483648, %v223_v40  ;;  %v233_v48 = vand.u32 2147483647, %v223_v40  ;;  %vm229_vm4 = vweird.f32 %v223_v40  ;;  %5426 = vst [vmem:[#allocation8_spill] sm:$0xff] %v4554_v39 }
  0xb3   :  { %4218 = vtanh.f32 %v218_v37  ;;  %v4547_v37 = vand.u32 4294901760, %v4525_v30  ;;  %621 = vmatpush.msra.mxu1 %v4451_v24 }
  0xb4   :  { %v236_v51 = vor.u32 1.1754944e-38, %v235_v46  ;;  %vm234_vm6 = vcmp.eq.f32.partialorder %v233_v48, 8.507059e+37  ;;  %v4575_v46 = vand.u32 4294901760, %v322_v41  ;;  %v340_v48 = vsub.f32 %v4532_v32, %v4554_v39 }
  0xb5   :  { %5425 = vst [vmem:[#allocation7_spill] sm:$0xff] %v4547_v37  ;;  %v334_v43 = vsub.f32 %v4525_v30, %v4547_v37  ;;  %460 = vmatpush.msrb.mxu2 %v4547_v37 }
  0xb6   :  { %324 = vmatpush.msra.mxu3 %v4575_v46 }
  0xb7   :  { %464 = vmatpush.msrb.mxu2 %v4554_v39 }
  0xb8   :  { %v4217_v42 = vpop.eup %4216 }
  0xb9   :  { %v225_v44 = vmul.f32 %v4217_v42, %v223_v40  ;;  %vm230_vm2 = vweird.f32 %v4217_v42  ;;  %v4219_v53 = vpop.eup %4218  ;;  %v4557_v40 = vsub.f32 %v263_v26, %v4529_v31 }
  0xba   :  { %vm231_vm5 = vmor %vm229_vm4, %vm230_vm2 }
  0xbb   :  { %v226_v45 = vsub.f32 1.0, %v225_v44  ;;  %v4567_v44 = vand.u32 4294901760, %v4535_v33  ;;  %400 = vmatpush.msrb.mxu0 %v4557_v40 }
  0xbd   :  { %v227_v47 = vmul.f32 %v4217_v42, %v226_v45  ;;  %5427 = vst [vmem:[#allocation9_spill] sm:$0xff] %v4567_v44  ;;  %v4572_v45 = vand.u32 4294901760, %v4538_v34  ;;  %468 = vmatpush.msrb.mxu2 %v4567_v44 }
  0xbf   :  { %v228_v50 = vadd.f32 %v4217_v42, %v227_v47  ;;  %5428 = vst [vmem:[#allocation10_spill] sm:$0xff] %v4572_v45  ;;  %472 = vmatpush.msrb.mxu2 %v4572_v45 }
  0xc1   :  { %v232_v52 = vsel %vm231_vm5, %v4217_v42, %v228_v50  ;;  %v328_v42 = vsub.f32 %v4522_v29, %v4544_v36  ;;  %v4584_v50 = vsub.f32 %v262_v27, %v4551_v38 }
  0xc2   :  { %v237_v54 = vsel %vm234_vm6, %v236_v51, %v232_v52  ;;  %v4588_v51 = vand.u32 4294901760, %v334_v43  ;;  %v346_v52 = vsub.f32 %v4535_v33, %v4567_v44 }
  0xc3   :  { %v4471_v55 = vsel %vm4465_vm3, %v4219_v53, %v237_v54  ;;  %v4577_v47 = vand.u32 4294901760, %v328_v42  ;;  %v4593_v53 = vand.u32 4294901760, %v4557_v40  ;;  %v4599_v54 = vand.u32 4294901760, %v340_v48  ;;  %403 = vmatpush.msrb.mxu0 %v4584_v50 }
  0xc4   :  { %242 = vrot.lane.b32.xlu0 %v4471_v55, %s4345_s27  ;;  %v240_v58 = vmul.f32 0.0, %v4471_v55 }
  0xc5   :  { %5429 = vst [vmem:[#allocation11_spill] sm:$0xff] %v4593_v53  ;;  %330 = vmatpush.msra.mxu3 %v4577_v47  ;;  %570 = vmatpush.msra.mxu0 %v4387_v3 }
  0xc6   :  { %476 = vmatpush.msrb.mxu2 %v4593_v53 }
  0xc7   :  { %336 = vmatpush.msra.mxu3 %v4588_v51  ;;  %572 = vmatpush.msra.mxu0 %v4389_v4 }
  0xc9   :  { %342 = vmatpush.msra.mxu3 %v4599_v54  ;;  %574 = vmatpush.msra.mxu0 %v4391_v5 }
  0xcb   :  { %576 = vmatpush.msra.mxu0 %v4396_v7 }
 0x136   :  { %v243_v56 = vpop.permute.xlu0 %242 }
 0x137   :  { %v245_v57 = vmul.f32 %v243_v56, %v4471_v55  ;;  %v352_v56 = vsub.f32 %v4538_v34, %v4572_v45 }
 0x139   :  { %247 = vrot.lane.b32.xlu0 %v245_v57, %s4346_s28  ;;  %v4604_v57 = vand.u32 4294901760, %v4584_v50 }
 0x13b   :  { %5430 = vst [vmem:[#allocation12_spill] sm:$0xff] %v4604_v57  ;;  %v364_v62 = vsub.f32 %v4584_v50, %v4604_v57  ;;  %480 = vmatpush.msrb.mxu2 %v4604_v57 }
 0x13d   :  { %v4632_v0 = vand.u32 4294901760, %v364_v62 }
 0x1ab   :  { %v248_v59 = vpop.permute.xlu0 %247 }
 0x1ac   :  { %v4478_v60 = vadd.f32 %v248_v59, %v240_v58  ;;  %v4610_v58 = vand.u32 4294901760, %v346_v52  ;;  %v358_v59 = vsub.f32 %v4557_v40, %v4593_v53 }
 0x1ae   :  { %4220 = vtanh.f32 %v4478_v60  ;;  %348 = vmatpush.msra.mxu3 %v4610_v58  ;;  %v4626_v63 = vand.u32 4294901760, %v358_v59 }
 0x1b4   :  { %v4221_v61 = vpop.eup %4220 }
 0x1b5   :  { %253 = vrot.lane.b32.xlu1 %v4221_v61, %s4345_s27  ;;  %v4618_v61 = vand.u32 4294901760, %v352_v56 }
 0x1b7   :  { %354 = vmatpush.msra.mxu3 %v4618_v61 }
 0x1b9   :  { %360 = vmatpush.msra.mxu3 %v4626_v63 }
 0x1bb   :  { %366 = vmatpush.msra.mxu3 %v4632_v0 }
 0x1bd   :  { %495 = vmatpush.msrb.mxu3 %v4491_v1 }
 0x1bf   :  { %497 = vmatpush.msrb.mxu3 %v4493_v2 }
 0x1c1   :  { %499 = vmatpush.msrb.mxu3 %v4495_v6 }
 0x1c3   :  { %501 = vmatpush.msrb.mxu3 %v4506_v21 }
 0x1c5   :  { %503 = vmatpush.msrb.mxu3 %v4508_v22 }
 0x1c7   :  { %505 = vmatpush.msrb.mxu3 %v4510_v25 }
 0x1c9   :  { %507 = vmatpush.msrb.mxu3 %v4529_v31 }
 0x1cb   :  { %509 = vmatpush.msrb.mxu3 %v4551_v38 }
 0x227   :  { %v254_v16 = vpop.permute.xlu1 %253 }
 0x228   :  { %v256_v17 = vmul.f32 %v254_v16, %v4471_v55 }
 0x22a   :  { %258 = vrot.lane.b32.xlu1 %v256_v17, %s4346_s28 }
 0x29c   :  { %v259_v55 = vpop.permute.xlu1 %258 }
 0x29d   :  { %v261_v18 = vsel %vm29_vm7, %v259_v55, 0.0  ;;  %v555_v26 = vsel %vm29_vm7, %v259_v55, 0 }
 0x29e   :  { %v276_v27 = vsel %vm274_vm8, %v261_v18, 0  ;;  %v577_v41 = vand.u32 4294901760, %v555_v26 }
 0x29f   :  { %v302_v42 = vand.u32 4294901760, %v276_v27 }
 0x2a0   :  { %v578_v43 = vsub.f32 %v555_v26, %v577_v41 }
 0x2a1   :  { %v303_v48 = vsub.f32 %v276_v27, %v302_v42  ;;  %368 = vmatmul.f32.vlgmr.msra.gmra.mxu3 %v302_v42  ;;  %v4738_v27 = vld [vmem:[%s5389_s3] ss:$0 sm:$0xff] }
 0x2a2   :  { %v579_v52 = vand.u32 4294901760, %v578_v43  ;;  %730 = vmatpush.msra.mxu3 %v4387_v3  ;;  %5431 = vst [vmem:[#allocation13_spill] sm:$0xff] %v4738_v27 }
 0x2a3   :  { %406 = vmatmul.f32.vlgmr.msrb.gmra.mxu0 %v303_v48  ;;  %v304_v56 = vand.u32 4294901760, %v303_v48 }
 0x2a4   :  { %641 = vmatpush.msrb.mxu0 %v4400_v8  ;;  %732 = vmatpush.msra.mxu3 %v4389_v4  ;;  %v580_v59 = vsub.f32 %v578_v43, %v579_v52 }
 0x2a5   :  { %v305_v62 = vsub.f32 %v303_v48, %v304_v56  ;;  %437 = vmatmul.f32.vlgmr.msrb.gmra.mxu1 %v304_v56 }
 0x2a6   :  { %644 = vmatpush.msrb.mxu0 %v4403_v9  ;;  %670 = vmatpush.msrb.mxu1 %v4387_v3  ;;  %v581_v17 = vand.u32 4294901760, %v580_v59 }
 0x2a7   :  { %v306_v16 = vand.u32 4294901760, %v305_v62  ;;  %734 = vmatpush.msra.mxu3 %v4391_v5 }
 0x2a8   :  { %647 = vmatpush.msrb.mxu0 %v4406_v10  ;;  %672 = vmatpush.msrb.mxu1 %v4389_v4 }
 0x2a9   :  { %307 = vmatmul.f32.vlgmr.msra.gmra.mxu2 %v306_v16  ;;  %511 = vmatmul.f32.vlgmr.msrb.gmra.mxu3 %v302_v42 }
 0x2aa   :  { %736 = vmatpush.msra.mxu3 %v4396_v7  ;;  %699 = vmatpush.msra.mxu2 %v4414_v12 }
 0x2ab   :  { %582 = vmatmul.f32.vlgmr.msra.gmra.mxu0 %v581_v17  ;;  %674 = vmatpush.msrb.mxu1 %v4391_v5 }
 0x2ac   :  { %650 = vmatpush.msrb.mxu0 %v4410_v11  ;;  %703 = vmatpush.msra.mxu2 %v4417_v13 }
 0x2ad   :  { %623 = vmatmul.f32.vlgmr.msra.gmra.mxu1 %v577_v41  ;;  %934 = vmatpush.msrb.mxu3 %v4491_v1 }
 0x2ae   :  { %802 = vmatpush.msra.mxu0 %v4491_v1  ;;  %676 = vmatpush.msrb.mxu1 %v4396_v7 }
 0x2af   :  { %707 = vmatpush.msra.mxu2 %v4420_v14  ;;  %936 = vmatpush.msrb.mxu3 %v4493_v2 }
 0x2b0   :  { %839 = vmatpush.msra.mxu1 %v4575_v46  ;;  %804 = vmatpush.msra.mxu0 %v4493_v2 }
 0x2b1   :  { %711 = vmatpush.msra.mxu2 %v4424_v15  ;;  %738 = vmatmul.f32.vlgmr.msra.gmra.mxu3 %v577_v41 }
 0x2b2   :  { %482 = vmatmul.f32.vlgmr.msrb.gmra.mxu2 %v302_v42  ;;  %845 = vmatpush.msra.mxu1 %v4577_v47 }
 0x2b3   :  { %897 = vmatpush.msrb.mxu2 %v4519_v28  ;;  %653 = vmatmul.f32.vlgmr.msrb.gmra.mxu0 %v578_v43 }
 0x2b4   :  { %851 = vmatpush.msra.mxu1 %v4588_v51  ;;  %806 = vmatpush.msra.mxu0 %v4495_v6 }
 0x2b5   :  { %900 = vmatpush.msrb.mxu2 %v4522_v29  ;;  %680 = vmatmul.f32.vlgmr.msrb.gmra.mxu1 %v579_v52 }
 0x2b6   :  { %857 = vmatpush.msra.mxu1 %v4599_v54  ;;  %808 = vmatpush.msra.mxu0 %v4506_v21 }
 0x2b7   :  { %903 = vmatpush.msrb.mxu2 %v4525_v30  ;;  %938 = vmatpush.msrb.mxu3 %v4495_v6 }
 0x2b8   :  { %863 = vmatpush.msra.mxu1 %v4610_v58  ;;  %810 = vmatpush.msra.mxu0 %v4508_v22 }
 0x2b9   :  { %906 = vmatpush.msrb.mxu2 %v4532_v32  ;;  %940 = vmatpush.msrb.mxu3 %v4506_v21 }
 0x2ba   :  { %713 = vmatmul.f32.vlgmr.msra.gmra.mxu2 %v577_v41  ;;  %869 = vmatpush.msra.mxu1 %v4618_v61 }
 0x2bb   :  { %909 = vmatpush.msrb.mxu2 %v4535_v33  ;;  %812 = vmatpush.msra.mxu0 %v4510_v25 }
 0x2bc   :  { %875 = vmatpush.msra.mxu1 %v4626_v63  ;;  %942 = vmatpush.msrb.mxu3 %v4508_v22 }
 0x2bd   :  { %912 = vmatpush.msrb.mxu2 %v4538_v34  ;;  %814 = vmatpush.msra.mxu0 %v4529_v31 }
 0x2be   :  { %881 = vmatpush.msra.mxu1 %v4632_v0  ;;  %944 = vmatpush.msrb.mxu3 %v4510_v25 }
 0x2bf   :  { %915 = vmatpush.msrb.mxu2 %v4557_v40  ;;  %816 = vmatpush.msra.mxu0 %v4551_v38 }
 0x2c0   :  { %1010 = vmatpush.msrb.mxu1 %v4491_v1  ;;  %946 = vmatpush.msrb.mxu3 %v4529_v31 }
 0x2c1   :  { %918 = vmatpush.msrb.mxu2 %v4584_v50  ;;  %967 = vmatpush.msrb.mxu0 %v4541_v35 }
 0x2c2   :  { %1012 = vmatpush.msrb.mxu1 %v4493_v2  ;;  %948 = vmatpush.msrb.mxu3 %v4551_v38 }
 0x2c3   :  { %1085 = vmatpush.msra.mxu2 %v4387_v3  ;;  %971 = vmatpush.msrb.mxu0 %v4544_v36 }
 0x2c4   :  { %1014 = vmatpush.msrb.mxu1 %v4495_v6  ;;  %1118 = vmatpush.msra.mxu3 %v4436_v19 }
 0x2c5   :  { %1087 = vmatpush.msra.mxu2 %v4389_v4  ;;  %975 = vmatpush.msrb.mxu0 %v4547_v37 }
 0x2c6   :  { %1016 = vmatpush.msrb.mxu1 %v4506_v21  ;;  %1124 = vmatpush.msra.mxu3 %v4438_v20 }
 0x2c7   :  { %1089 = vmatpush.msra.mxu2 %v4391_v5  ;;  %979 = vmatpush.msrb.mxu0 %v4554_v39 }
 0x2c8   :  { %1018 = vmatpush.msrb.mxu1 %v4508_v22  ;;  %1130 = vmatpush.msra.mxu3 %v4446_v23 }
 0x2c9   :  { %1091 = vmatpush.msra.mxu2 %v4396_v7  ;;  %983 = vmatpush.msrb.mxu0 %v4567_v44 }
 0x2ca   :  { %1020 = vmatpush.msrb.mxu1 %v4510_v25  ;;  %1136 = vmatpush.msra.mxu3 %v4451_v24 }
 0x2cb   :  { %987 = vmatpush.msrb.mxu0 %v4572_v45 }
 0x2cc   :  { %1022 = vmatpush.msrb.mxu1 %v4529_v31 }
 0x2cd   :  { %991 = vmatpush.msrb.mxu0 %v4593_v53 }
 0x2ce   :  { %1024 = vmatpush.msrb.mxu1 %v4551_v38 }
 0x2cf   :  { %995 = vmatpush.msrb.mxu0 %v4604_v57 }
 0x320   :  { %v407_v55 = vpop.f32.mrf.mxu0 }
 0x322   :  { %v438_v18 = vpop.f32.mrf.mxu1 }
 0x324   :  { %v369_v26 = vpop.f32.mrf.mxu3 }
 0x328   :  { %v583_v41 = vpop.f32.mrf.mxu0 }
 0x32a   :  { %v624_v48 = vpop.f32.mrf.mxu1 }
 0x32b   :  { %v625_v57 = vadd.f32 %v624_v48, %v583_v41 }
 0x32c   :  { %v308_v42 = vpop.f32.mrf.mxu2  ;;  %v512_v59 = vpop.f32.mrf.mxu3 }
 0x32d   :  { %v309_v43 = vadd.f32 %v4738_v27, %v308_v42 }
 0x32f   :  { %v370_v52 = vadd.f32 %v369_v26, %v309_v43  ;;  %v4186_v26 = vld [vmem:[%s5387_s0 + $0x8] sm:$0xff] }
 0x330   :  { %v654_v16 = vpop.f32.mrf.mxu0 }
 0x331   :  { %v408_v56 = vadd.f32 %v407_v55, %v370_v52  ;;  %v655_v45 = vadd.f32 %v654_v16, %v625_v57 }
 0x332   :  { %v681_v44 = vpop.f32.mrf.mxu1 }
 0x333   :  { %v439_v62 = vadd.f32 %v438_v18, %v408_v56  ;;  %v682_v39 = vadd.f32 %v681_v44, %v655_v45 }
 0x334   :  { %v739_v19 = vpop.f32.mrf.mxu3 }
 0x335   :  { %v483_v17 = vpop.f32.mrf.mxu2 }
 0x336   :  { %v484_v53 = vadd.f32 %v483_v17, %v439_v62 }
 0x338   :  { %v513_v24 = vadd.f32 %v512_v59, %v484_v53 }
 0x33a   :  { %v4185_v23 = vmul.f32 -1.442695, %v513_v24 }
 0x33c   :  { %4222 = vpow2.f32 %v4185_v23 }
 0x33d   :  { %v714_v20 = vpop.f32.mrf.mxu2 }
 0x33e   :  { %v715_v37 = vadd.f32 %v714_v20, %v682_v39 }
 0x340   :  { %v740_v55 = vadd.f32 %v739_v19, %v715_v37 }
 0x342   :  { %v4223_v42 = vpop.eup %4222  ;;  %v742_v18 = vadd.f32 %v4186_v26, %v740_v55 }
 0x343   :  { %v519_v43 = vadd.f32 1.0, %v4223_v42 }
 0x344   :  { %v4187_v52 = vmul.f32 -1.442695, %v742_v18 }
 0x345   :  { %4224 = vrcp.f32 %v519_v43  ;;  %v531_v20 = vand.u32 2147483648, %v519_v43  ;;  %v529_v44 = vand.u32 2147483647, %v519_v43  ;;  %vm525_vm10 = vweird.f32 %v519_v43 }
 0x346   :  { %4226 = vpow2.f32 %v4187_v52 }
 0x347   :  { %4228 = vtanh.f32 %v513_v24  ;;  %v532_v19 = vor.u32 1.1754944e-38, %v531_v20  ;;  %vm530_vm12 = vcmp.eq.f32.partialorder %v529_v44, 8.507059e+37 }
 0x34b   :  { %v4225_v57 = vpop.eup %4224 }
 0x34c   :  { %v4227_v53 = vpop.eup %4226  ;;  %v521_v41 = vmul.f32 %v4225_v57, %v519_v43  ;;  %vm526_vm9 = vweird.f32 %v4225_v57 }
 0x34d   :  { %v747_v48 = vadd.f32 1.0, %v4227_v53  ;;  %vm527_vm11 = vmor %vm525_vm10, %vm526_vm9  ;;  %v4229_v37 = vpop.eup %4228 }
 0x34e   :  { %v522_v23 = vsub.f32 1.0, %v521_v41 }
 0x34f   :  { %4230 = vrcp.f32 %v747_v48  ;;  %v759_v26 = vand.u32 2147483648, %v747_v48  ;;  %v757_v42 = vand.u32 2147483647, %v747_v48  ;;  %vm753_vm14 = vweird.f32 %v747_v48 }
 0x350   :  { %v523_v39 = vmul.f32 %v4225_v57, %v522_v23  ;;  %4232 = vtanh.f32 %v742_v18 }
 0x351   :  { %v760_v52 = vor.u32 1.1754944e-38, %v759_v26  ;;  %vm758_vm0 = vcmp.eq.f32.partialorder %v757_v42, 8.507059e+37 }
 0x352   :  { %v524_v45 = vadd.f32 %v4225_v57, %v523_v39 }
 0x354   :  { %v528_v56 = vsel %vm527_vm11, %v4225_v57, %v524_v45 }
 0x355   :  { %v4231_v59 = vpop.eup %4230  ;;  %v533_v62 = vsel %vm530_vm12, %v532_v19, %v528_v56 }
 0x356   :  { %v535_v16 = vsel %vm4465_vm3, %v4229_v37, %v533_v62  ;;  %v749_v17 = vmul.f32 %v4231_v59, %v747_v48  ;;  %vm754_vm13 = vweird.f32 %v4231_v59  ;;  %v4233_v53 = vpop.eup %4232 }
 0x357   :  { %538 = vrot.lane.b32.xlu2 %v535_v16, %s4345_s27  ;;  %vm755_vm15 = vmor %vm753_vm14, %vm754_vm13  ;;  %v536_v48 = vmul.f32 0.0, %v535_v16 }
 0x358   :  { %v750_v24 = vsub.f32 1.0, %v749_v17 }
 0x35a   :  { %v751_v55 = vmul.f32 %v4231_v59, %v750_v24 }
 0x35c   :  { %v752_v43 = vadd.f32 %v4231_v59, %v751_v55 }
 0x35e   :  { %v756_v57 = vsel %vm755_vm15, %v4231_v59, %v752_v43 }
 0x35f   :  { %v761_v41 = vsel %vm758_vm0, %v760_v52, %v756_v57 }
 0x360   :  { %v763_v23 = vsel %vm4465_vm3, %v4233_v53, %v761_v41 }
 0x361   :  { %766 = vrot.lane.b32.xlu2 %v763_v23, %s4345_s27  ;;  %v764_v56 = vmul.f32 %v763_v23, %v4478_v60 }
 0x3b1   :  { %v539_v20 = vpop.permute.xlu2 %538 }
 0x3b2   :  { %v541_v39 = vmul.f32 %v539_v20, %v535_v16 }
 0x3b4   :  { %543 = vrot.lane.b32.xlu0 %v541_v39, %s4346_s28 }
 0x3bb   :  { %v767_v18 = vpop.permute.xlu2 %766 }
 0x3bc   :  { %v769_v44 = vmul.f32 %v767_v18, %v763_v23 }
 0x3be   :  { %771 = vrot.lane.b32.xlu1 %v769_v44, %s4346_s28 }
 0x426   :  { %v544_v45 = vpop.permute.xlu0 %543 }
 0x427   :  { %v4752_v19 = vadd.f32 %v544_v45, %v536_v48 }
 0x429   :  { %4234 = vtanh.f32 %v4752_v19 }
 0x42f   :  { %v4235_v37 = vpop.eup %4234 }
 0x430   :  { %549 = vrot.lane.b32.xlu2 %v4235_v37, %s4345_s27  ;;  %v772_v59 = vpop.permute.xlu1 %771 }
 0x431   :  { %v4757_v62 = vadd.f32 %v772_v59, %v764_v56  ;;  %v5432_v56 = vld [vmem:[#allocation2_spill] sm:$0xff]  ;;  %v5433_v59 = vld [vmem:[#allocation7_spill] sm:$0xff] }
 0x433   :  { %4236 = vtanh.f32 %v4757_v62 }
 0x439   :  { %v4237_v17 = vpop.eup %4236 }
 0x43a   :  { %777 = vrot.lane.b32.xlu0 %v4237_v17, %s4345_s27  ;;  %v5434_v17 = vld [vmem:[#allocation3_spill] sm:$0xff] }
 0x48a   :  { %v550_v24 = vpop.permute.xlu2 %549 }
 0x48b   :  { %v552_v26 = vmul.f32 %v550_v24, %v535_v16  ;;  %v5435_v24 = vld [vmem:[#allocation8_spill] sm:$0xff] }
 0x48d   :  { %786 = vrot.lane.b32.xlu2 %v552_v26, %s4345_s27  ;;  %v5436_v26 = vld [vmem:[#allocation4_spill] sm:$0xff] }
 0x4ac   :  { %v778_v55 = vpop.permute.xlu0 %777 }
 0x4ad   :  { %v780_v42 = vmul.f32 %v778_v55, %v763_v23  ;;  %v5437_v55 = vld [vmem:[#allocation9_spill] sm:$0xff] }
 0x4af   :  { %782 = vrot.lane.b32.xlu1 %v780_v42, %s4346_s28  ;;  %v5438_v42 = vld [vmem:[#allocation5_spill] sm:$0xff] }
 0x4e7   :  { %v787_v43 = vpop.permute.xlu2 %786 }
 0x521   :  { %v783_v60 = vpop.permute.xlu1 %782 }
 0x522   :  { %v789_v52 = vsel %vm29_vm7, %v783_v60, %v787_v43  ;;  %v1070_v57 = vsel %vm29_vm7, %v783_v60, 0  ;;  %v5439_v43 = vld [vmem:[#allocation10_spill] sm:$0xff]  ;;  %v5440_v60 = vld [vmem:[#allocation11_spill] sm:$0xff] }
 0x523   :  { %v791_v53 = vsel %vm274_vm8, %v789_v52, 0  ;;  %v1092_v41 = vand.u32 4294901760, %v1070_v57  ;;  %v5441_v52 = vld [vmem:[#allocation12_spill] sm:$0xff] }
 0x524   :  { %v817_v20 = vand.u32 4294901760, %v791_v53 }
 0x525   :  { %v1093_v39 = vsub.f32 %v1070_v57, %v1092_v41 }
 0x526   :  { %v818_v18 = vsub.f32 %v791_v53, %v817_v20  ;;  %883 = vmatmul.f32.vlgmr.msra.gmra.mxu1 %v817_v20 }
 0x527   :  { %v1094_v16 = vand.u32 4294901760, %v1093_v39  ;;  %1245 = vmatpush.msra.mxu1 %v4387_v3 }
 0x528   :  { %921 = vmatmul.f32.vlgmr.msrb.gmra.mxu2 %v818_v18  ;;  %v819_v23 = vand.u32 4294901760, %v818_v18 }
 0x529   :  { %1156 = vmatpush.msrb.mxu2 %v4400_v8  ;;  %1247 = vmatpush.msra.mxu1 %v4389_v4  ;;  %v1095_v44 = vsub.f32 %v1093_v39, %v1094_v16 }
 0x52a   :  { %952 = vmatmul.f32.vlgmr.msrb.gmra.mxu3 %v819_v23  ;;  %v820_v48 = vsub.f32 %v818_v18, %v819_v23 }
 0x52b   :  { %1159 = vmatpush.msrb.mxu2 %v4403_v9  ;;  %1185 = vmatpush.msrb.mxu3 %v4387_v3  ;;  %v1096_v37 = vand.u32 4294901760, %v1095_v44 }
 0x52c   :  { %v821_v45 = vand.u32 4294901760, %v820_v48  ;;  %1249 = vmatpush.msra.mxu1 %v4391_v5 }
 0x52d   :  { %1162 = vmatpush.msrb.mxu2 %v4406_v10  ;;  %1187 = vmatpush.msrb.mxu3 %v4389_v4 }
 0x52e   :  { %822 = vmatmul.f32.vlgmr.msra.gmra.mxu0 %v821_v45  ;;  %1026 = vmatmul.f32.vlgmr.msrb.gmra.mxu1 %v817_v20 }
 0x52f   :  { %1251 = vmatpush.msra.mxu1 %v4396_v7  ;;  %1165 = vmatpush.msrb.mxu2 %v4410_v11 }
 0x530   :  { %1097 = vmatmul.f32.vlgmr.msra.gmra.mxu2 %v1096_v37  ;;  %1189 = vmatpush.msrb.mxu3 %v4391_v5 }
 0x531   :  { %1214 = vmatpush.msra.mxu0 %v4414_v12  ;;  %1317 = vmatpush.msra.mxu2 %v4491_v1 }
 0x532   :  { %1138 = vmatmul.f32.vlgmr.msra.gmra.mxu3 %v1092_v41  ;;  %1449 = vmatpush.msrb.mxu1 %v4491_v1 }
 0x533   :  { %1191 = vmatpush.msrb.mxu3 %v4396_v7  ;;  %1218 = vmatpush.msra.mxu0 %v4417_v13 }
 0x534   :  { %1319 = vmatpush.msra.mxu2 %v4493_v2  ;;  %1451 = vmatpush.msrb.mxu1 %v4493_v2 }
 0x535   :  { %1354 = vmatpush.msra.mxu3 %v4575_v46  ;;  %1222 = vmatpush.msra.mxu0 %v4420_v14 }
 0x536   :  { %997 = vmatmul.f32.vlgmr.msrb.gmra.mxu0 %v817_v20  ;;  %1253 = vmatmul.f32.vlgmr.msra.gmra.mxu1 %v1092_v41 }
 0x537   :  { %1226 = vmatpush.msra.mxu0 %v4424_v15  ;;  %1360 = vmatpush.msra.mxu3 %v4577_v47 }
 0x538   :  { %1168 = vmatmul.f32.vlgmr.msrb.gmra.mxu2 %v1093_v39  ;;  %1453 = vmatpush.msrb.mxu1 %v4495_v6 }
 0x539   :  { %1412 = vmatpush.msrb.mxu0 %v4519_v28  ;;  %1366 = vmatpush.msra.mxu3 %v4588_v51 }
 0x53a   :  { %1321 = vmatpush.msra.mxu2 %v4495_v6  ;;  %1195 = vmatmul.f32.vlgmr.msrb.gmra.mxu3 %v1094_v16 }
 0x53b   :  { %1415 = vmatpush.msrb.mxu0 %v4522_v29  ;;  %1372 = vmatpush.msra.mxu3 %v4599_v54 }
 0x53c   :  { %1323 = vmatpush.msra.mxu2 %v4506_v21  ;;  %1455 = vmatpush.msrb.mxu1 %v4506_v21 }
 0x53d   :  { %1418 = vmatpush.msrb.mxu0 %v4525_v30  ;;  %1378 = vmatpush.msra.mxu3 %v4610_v58 }
 0x53e   :  { %1325 = vmatpush.msra.mxu2 %v4508_v22  ;;  %1228 = vmatmul.f32.vlgmr.msra.gmra.mxu0 %v1092_v41 }
 0x53f   :  { %1384 = vmatpush.msra.mxu3 %v4618_v61  ;;  %1421 = vmatpush.msrb.mxu0 %v4532_v32 }
 0x540   :  { %1327 = vmatpush.msra.mxu2 %v4510_v25  ;;  %1457 = vmatpush.msrb.mxu1 %v4508_v22 }
 0x541   :  { %1390 = vmatpush.msra.mxu3 %v4626_v63  ;;  %1424 = vmatpush.msrb.mxu0 %v4535_v33 }
 0x542   :  { %1329 = vmatpush.msra.mxu2 %v4529_v31  ;;  %1459 = vmatpush.msrb.mxu1 %v4510_v25 }
 0x543   :  { %1396 = vmatpush.msra.mxu3 %v4632_v0  ;;  %1427 = vmatpush.msrb.mxu0 %v4538_v34 }
 0x544   :  { %1331 = vmatpush.msra.mxu2 %v4551_v38  ;;  %1461 = vmatpush.msrb.mxu1 %v4529_v31 }
 0x545   :  { %1525 = vmatpush.msrb.mxu3 %v4491_v1  ;;  %1430 = vmatpush.msrb.mxu0 %v4557_v40 }
 0x546   :  { %1482 = vmatpush.msrb.mxu2 %v4541_v35  ;;  %1463 = vmatpush.msrb.mxu1 %v4551_v38 }
 0x547   :  { %1527 = vmatpush.msrb.mxu3 %v4493_v2  ;;  %1433 = vmatpush.msrb.mxu0 %v4584_v50 }
 0x548   :  { %1486 = vmatpush.msrb.mxu2 %v4544_v36  ;;  %1633 = vmatpush.msra.mxu1 %v5432_v56 }
 0x549   :  { %1529 = vmatpush.msrb.mxu3 %v4495_v6  ;;  %1600 = vmatpush.msra.mxu0 %v4387_v3 }
 0x54a   :  { %1490 = vmatpush.msrb.mxu2 %v5433_v59  ;;  %1639 = vmatpush.msra.mxu1 %v5434_v17 }
 0x54b   :  { %1531 = vmatpush.msrb.mxu3 %v4506_v21  ;;  %1602 = vmatpush.msra.mxu0 %v4389_v4 }
 0x54c   :  { %1494 = vmatpush.msrb.mxu2 %v5435_v24  ;;  %1645 = vmatpush.msra.mxu1 %v5436_v26 }
 0x54d   :  { %1533 = vmatpush.msrb.mxu3 %v4508_v22  ;;  %1604 = vmatpush.msra.mxu0 %v4391_v5 }
 0x54e   :  { %1498 = vmatpush.msrb.mxu2 %v5437_v55  ;;  %1651 = vmatpush.msra.mxu1 %v5438_v42 }
 0x54f   :  { %1535 = vmatpush.msrb.mxu3 %v4510_v25  ;;  %1606 = vmatpush.msra.mxu0 %v4396_v7 }
 0x550   :  { %1502 = vmatpush.msrb.mxu2 %v5439_v43 }
 0x551   :  { %1537 = vmatpush.msrb.mxu3 %v4529_v31 }
 0x552   :  { %1506 = vmatpush.msrb.mxu2 %v5440_v60 }
 0x553   :  { %1539 = vmatpush.msrb.mxu3 %v4551_v38 }
 0x554   :  { %1510 = vmatpush.msrb.mxu2 %v5441_v52 }
 0x5a3   :  { %v884_v57 = vpop.f32.mrf.mxu1 }
 0x5ab   :  { %v823_v53 = vpop.f32.mrf.mxu0  ;;  %v922_v41 = vpop.f32.mrf.mxu2 }
 0x5ac   :  { %v824_v20 = vadd.f32 %v4738_v27, %v823_v53  ;;  %v1027_v37 = vpop.f32.mrf.mxu1 }
 0x5ad   :  { %v953_v39 = vpop.f32.mrf.mxu3 }
 0x5ae   :  { %v885_v18 = vadd.f32 %v884_v57, %v824_v20 }
 0x5b0   :  { %v923_v16 = vadd.f32 %v922_v41, %v885_v18  ;;  %v4189_v41 = vld [vmem:[%s5387_s0 + $0x10] sm:$0xff] }
 0x5b2   :  { %v954_v23 = vadd.f32 %v953_v39, %v923_v16 }
 0x5b3   :  { %v998_v44 = vpop.f32.mrf.mxu0  ;;  %v1098_v48 = vpop.f32.mrf.mxu2 }
 0x5b4   :  { %v999_v45 = vadd.f32 %v998_v44, %v954_v23  ;;  %v1254_v57 = vpop.f32.mrf.mxu1 }
 0x5b5   :  { %v1139_v43 = vpop.f32.mrf.mxu3 }
 0x5b6   :  { %v1028_v42 = vadd.f32 %v1027_v37, %v999_v45  ;;  %v1140_v60 = vadd.f32 %v1139_v43, %v1098_v48 }
 0x5b8   :  { %v4188_v55 = vmul.f32 -1.442695, %v1028_v42 }
 0x5ba   :  { %4238 = vpow2.f32 %v4188_v55 }
 0x5bb   :  { %v1169_v26 = vpop.f32.mrf.mxu2  ;;  %v1229_v59 = vpop.f32.mrf.mxu0 }
 0x5bc   :  { %v1170_v52 = vadd.f32 %v1169_v26, %v1140_v60 }
 0x5bd   :  { %v1196_v24 = vpop.f32.mrf.mxu3 }
 0x5be   :  { %v1197_v17 = vadd.f32 %v1196_v24, %v1170_v52 }
 0x5c0   :  { %v4239_v56 = vpop.eup %4238  ;;  %v1230_v53 = vadd.f32 %v1229_v59, %v1197_v17 }
 0x5c1   :  { %v1034_v27 = vadd.f32 1.0, %v4239_v56 }
 0x5c2   :  { %v1255_v20 = vadd.f32 %v1254_v57, %v1230_v53 }
 0x5c3   :  { %4240 = vrcp.f32 %v1034_v27  ;;  %v1046_v26 = vand.u32 2147483648, %v1034_v27  ;;  %v1044_v59 = vand.u32 2147483647, %v1034_v27  ;;  %vm1040_vm2 = vweird.f32 %v1034_v27 }
 0x5c4   :  { %v1257_v39 = vadd.f32 %v4189_v41, %v1255_v20 }
 0x5c5   :  { %v1047_v52 = vor.u32 1.1754944e-38, %v1046_v26  ;;  %vm1045_vm5 = vcmp.eq.f32.partialorder %v1044_v59, 8.507059e+37 }
 0x5c6   :  { %v4190_v18 = vmul.f32 -1.442695, %v1257_v39 }
 0x5c8   :  { %4242 = vpow2.f32 %v4190_v18 }
 0x5c9   :  { %v4241_v55 = vpop.eup %4240  ;;  %4244 = vtanh.f32 %v1028_v42 }
 0x5ca   :  { %v1036_v43 = vmul.f32 %v4241_v55, %v1034_v27  ;;  %vm1041_vm1 = vweird.f32 %v4241_v55 }
 0x5cb   :  { %vm1042_vm4 = vmor %vm1040_vm2, %vm1041_vm1 }
 0x5cc   :  { %v1037_v16 = vsub.f32 1.0, %v1036_v43 }
 0x5ce   :  { %v4243_v24 = vpop.eup %4242  ;;  %v1038_v60 = vmul.f32 %v4241_v55, %v1037_v16 }
 0x5cf   :  { %v1262_v56 = vadd.f32 1.0, %v4243_v24  ;;  %v4245_v44 = vpop.eup %4244 }
 0x5d0   :  { %v1039_v17 = vadd.f32 %v4241_v55, %v1038_v60 }
 0x5d1   :  { %4246 = vrcp.f32 %v1262_v56  ;;  %v1274_v57 = vand.u32 2147483648, %v1262_v56  ;;  %v1272_v27 = vand.u32 2147483647, %v1262_v56  ;;  %vm1268_vm9 = vweird.f32 %v1262_v56 }
 0x5d2   :  { %v1043_v23 = vsel %vm1042_vm4, %v4241_v55, %v1039_v17  ;;  %4248 = vtanh.f32 %v1257_v39 }
 0x5d3   :  { %v1048_v48 = vsel %vm1045_vm5, %v1047_v52, %v1043_v23  ;;  %v1275_v18 = vor.u32 1.1754944e-38, %v1274_v57  ;;  %vm1273_vm11 = vcmp.eq.f32.partialorder %v1272_v27, 8.507059e+37 }
 0x5d4   :  { %v1050_v45 = vsel %vm4465_vm3, %v4245_v44, %v1048_v48 }
 0x5d5   :  { %1053 = vrot.lane.b32.xlu0 %v1050_v45, %s4345_s27 }
 0x5d7   :  { %v4247_v42 = vpop.eup %4246 }
 0x5d8   :  { %v1264_v37 = vmul.f32 %v4247_v42, %v1262_v56  ;;  %vm1269_vm6 = vweird.f32 %v4247_v42  ;;  %v4249_v43 = vpop.eup %4248  ;;  %v1051_v56 = vmul.f32 %v1050_v45, %v4752_v19 }
 0x5d9   :  { %vm1270_vm10 = vmor %vm1268_vm9, %vm1269_vm6 }
 0x5da   :  { %v1265_v53 = vsub.f32 1.0, %v1264_v37 }
 0x5dc   :  { %v1266_v41 = vmul.f32 %v4247_v42, %v1265_v53 }
 0x5de   :  { %v1267_v20 = vadd.f32 %v4247_v42, %v1266_v41 }
 0x5e0   :  { %v1271_v55 = vsel %vm1270_vm10, %v4247_v42, %v1267_v20 }
 0x5e1   :  { %v1276_v16 = vsel %vm1273_vm11, %v1275_v18, %v1271_v55 }
 0x5e2   :  { %v1278_v26 = vsel %vm4465_vm3, %v4249_v43, %v1276_v16 }
 0x5e3   :  { %1281 = vrot.lane.b32.xlu1 %v1278_v26, %s4345_s27  ;;  %v1279_v44 = vmul.f32 %v1278_v26, %v4757_v62 }
 0x647   :  { %v1054_v24 = vpop.permute.xlu0 %1053 }
 0x648   :  { %v1056_v60 = vmul.f32 %v1054_v24, %v1050_v45 }
 0x64a   :  { %1058 = vrot.lane.b32.xlu2 %v1056_v60, %s4346_s28 }
 0x655   :  { %v1282_v39 = vpop.permute.xlu1 %1281 }
 0x656   :  { %v1284_v59 = vmul.f32 %v1282_v39, %v1278_v26 }
 0x658   :  { %1286 = vrot.lane.b32.xlu0 %v1284_v59, %s4346_s28 }
 0x6a4   :  { %v1059_v17 = vpop.permute.xlu2 %1058 }
 0x6a5   :  { %v4851_v52 = vadd.f32 %v1059_v17, %v1051_v56 }
 0x6a7   :  { %4250 = vtanh.f32 %v4851_v52 }
 0x6ad   :  { %v4251_v23 = vpop.eup %4250 }
 0x6ae   :  { %1064 = vrot.lane.b32.xlu1 %v4251_v23, %s4345_s27  ;;  %v5442_v23 = vld [vmem:[#allocation2_spill] sm:$0xff] }
 0x6ca   :  { %v1287_v48 = vpop.permute.xlu0 %1286 }
 0x6cb   :  { %v4856_v42 = vadd.f32 %v1287_v48, %v1279_v44  ;;  %v5443_v44 = vld [vmem:[#allocation7_spill] sm:$0xff] }
 0x6cc   :  { %v5444_v48 = vld [vmem:[#allocation3_spill] sm:$0xff] }
 0x6cd   :  { %4252 = vtanh.f32 %v4856_v42 }
 0x6d3   :  { %v4253_v37 = vpop.eup %4252 }
 0x6d4   :  { %1292 = vrot.lane.b32.xlu2 %v4253_v37, %s4345_s27  ;;  %v5445_v37 = vld [vmem:[#allocation8_spill] sm:$0xff] }
 0x720   :  { %v1065_v53 = vpop.permute.xlu1 %1064 }
 0x721   :  { %v1067_v19 = vmul.f32 %v1065_v53, %v1050_v45  ;;  %v5446_v53 = vld [vmem:[#allocation4_spill] sm:$0xff] }
 0x723   :  { %1301 = vrot.lane.b32.xlu1 %v1067_v19, %s4345_s27  ;;  %v5447_v19 = vld [vmem:[#allocation9_spill] sm:$0xff] }
 0x72e   :  { %v1293_v57 = vpop.permute.xlu2 %1292 }
 0x72f   :  { %v1295_v41 = vmul.f32 %v1293_v57, %v1278_v26  ;;  %v5448_v57 = vld [vmem:[#allocation5_spill] sm:$0xff] }
 0x731   :  { %1297 = vrot.lane.b32.xlu0 %v1295_v41, %s4346_s28  ;;  %v5449_v41 = vld [vmem:[#allocation10_spill] sm:$0xff] }
 0x795   :  { %v1302_v27 = vpop.permute.xlu1 %1301 }
 0x7a3   :  { %v1298_v20 = vpop.permute.xlu0 %1297 }
 0x7a4   :  { %v1304_v62 = vsel %vm29_vm7, %v1298_v20, %v1302_v27  ;;  %v1585_v18 = vsel %vm29_vm7, %v1298_v20, 0  ;;  %v5450_v27 = vld [vmem:[#allocation11_spill] sm:$0xff]  ;;  %v5451_v20 = vld [vmem:[#allocation12_spill] sm:$0xff] }
 0x7a5   :  { %v1306_v55 = vsel %vm274_vm8, %v1304_v62, 0  ;;  %v1607_v43 = vand.u32 4294901760, %v1585_v18 }
 0x7a6   :  { %v1332_v16 = vand.u32 4294901760, %v1306_v55 }
 0x7a7   :  { %v1608_v24 = vsub.f32 %v1585_v18, %v1607_v43 }
 0x7a8   :  { %v1333_v60 = vsub.f32 %v1306_v55, %v1332_v16  ;;  %1398 = vmatmul.f32.vlgmr.msra.gmra.mxu3 %v1332_v16 }
 0x7a9   :  { %v1609_v45 = vand.u32 4294901760, %v1608_v24  ;;  %1760 = vmatpush.msra.mxu3 %v4387_v3 }
 0x7aa   :  { %1436 = vmatmul.f32.vlgmr.msrb.gmra.mxu0 %v1333_v60  ;;  %v1334_v26 = vand.u32 4294901760, %v1333_v60 }
 0x7ab   :  { %1671 = vmatpush.msrb.mxu0 %v4400_v8  ;;  %1762 = vmatpush.msra.mxu3 %v4389_v4  ;;  %v1610_v39 = vsub.f32 %v1608_v24, %v1609_v45 }
 0x7ac   :  { %1467 = vmatmul.f32.vlgmr.msrb.gmra.mxu1 %v1334_v26  ;;  %v1335_v59 = vsub.f32 %v1333_v60, %v1334_v26 }
 0x7ad   :  { %1674 = vmatpush.msrb.mxu0 %v4403_v9  ;;  %1700 = vmatpush.msrb.mxu1 %v4387_v3  ;;  %v1611_v17 = vand.u32 4294901760, %v1610_v39 }
 0x7ae   :  { %v1336_v56 = vand.u32 4294901760, %v1335_v59  ;;  %1764 = vmatpush.msra.mxu3 %v4391_v5 }
 0x7af   :  { %1677 = vmatpush.msrb.mxu0 %v4406_v10  ;;  %1702 = vmatpush.msrb.mxu1 %v4389_v4 }
 0x7b0   :  { %1337 = vmatmul.f32.vlgmr.msra.gmra.mxu2 %v1336_v56  ;;  %1541 = vmatmul.f32.vlgmr.msrb.gmra.mxu3 %v1332_v16 }
 0x7b1   :  { %1766 = vmatpush.msra.mxu3 %v4396_v7  ;;  %1680 = vmatpush.msrb.mxu0 %v4410_v11 }
 0x7b2   :  { %1612 = vmatmul.f32.vlgmr.msra.gmra.mxu0 %v1611_v17  ;;  %1704 = vmatpush.msrb.mxu1 %v4391_v5 }
 0x7b3   :  { %1729 = vmatpush.msra.mxu2 %v4414_v12  ;;  %1832 = vmatpush.msra.mxu0 %v4491_v1 }
 0x7b4   :  { %1653 = vmatmul.f32.vlgmr.msra.gmra.mxu1 %v1607_v43  ;;  %1964 = vmatpush.msrb.mxu3 %v4491_v1 }
 0x7b5   :  { %1706 = vmatpush.msrb.mxu1 %v4396_v7  ;;  %1733 = vmatpush.msra.mxu2 %v4417_v13 }
 0x7b6   :  { %1834 = vmatpush.msra.mxu0 %v4493_v2  ;;  %1966 = vmatpush.msrb.mxu3 %v4493_v2 }
 0x7b7   :  { %1869 = vmatpush.msra.mxu1 %v4575_v46  ;;  %1737 = vmatpush.msra.mxu2 %v4420_v14 }
 0x7b8   :  { %1512 = vmatmul.f32.vlgmr.msrb.gmra.mxu2 %v1332_v16  ;;  %1768 = vmatmul.f32.vlgmr.msra.gmra.mxu3 %v1607_v43 }
 0x7b9   :  { %1741 = vmatpush.msra.mxu2 %v4424_v15  ;;  %1875 = vmatpush.msra.mxu1 %v4577_v47 }
 0x7ba   :  { %1683 = vmatmul.f32.vlgmr.msrb.gmra.mxu0 %v1608_v24  ;;  %1968 = vmatpush.msrb.mxu3 %v4495_v6  ;;  %v5452_v24 = vld [vmem:[#allocation13_spill] sm:$0xff] }
 0x7bb   :  { %1927 = vmatpush.msrb.mxu2 %v4519_v28  ;;  %1881 = vmatpush.msra.mxu1 %v4588_v51 }
 0x7bc   :  { %1836 = vmatpush.msra.mxu0 %v4495_v6  ;;  %1710 = vmatmul.f32.vlgmr.msrb.gmra.mxu1 %v1609_v45 }
 0x7bd   :  { %1930 = vmatpush.msrb.mxu2 %v4522_v29  ;;  %1887 = vmatpush.msra.mxu1 %v4599_v54 }
 0x7be   :  { %1838 = vmatpush.msra.mxu0 %v4506_v21  ;;  %1970 = vmatpush.msrb.mxu3 %v4506_v21 }
 0x7bf   :  { %1933 = vmatpush.msrb.mxu2 %v4525_v30  ;;  %1893 = vmatpush.msra.mxu1 %v4610_v58 }
 0x7c0   :  { %1840 = vmatpush.msra.mxu0 %v4508_v22  ;;  %1743 = vmatmul.f32.vlgmr.msra.gmra.mxu2 %v1607_v43 }
 0x7c1   :  { %1899 = vmatpush.msra.mxu1 %v4618_v61  ;;  %1936 = vmatpush.msrb.mxu2 %v4532_v32 }
 0x7c2   :  { %1842 = vmatpush.msra.mxu0 %v4510_v25  ;;  %1972 = vmatpush.msrb.mxu3 %v4508_v22 }
 0x7c3   :  { %1905 = vmatpush.msra.mxu1 %v4626_v63  ;;  %1939 = vmatpush.msrb.mxu2 %v4535_v33 }
 0x7c4   :  { %1844 = vmatpush.msra.mxu0 %v4529_v31  ;;  %1974 = vmatpush.msrb.mxu3 %v4510_v25 }
 0x7c5   :  { %1911 = vmatpush.msra.mxu1 %v4632_v0  ;;  %1942 = vmatpush.msrb.mxu2 %v4538_v34 }
 0x7c6   :  { %1846 = vmatpush.msra.mxu0 %v4551_v38  ;;  %1976 = vmatpush.msrb.mxu3 %v4529_v31 }
 0x7c7   :  { %2040 = vmatpush.msrb.mxu1 %v4491_v1  ;;  %1945 = vmatpush.msrb.mxu2 %v4557_v40 }
 0x7c8   :  { %1997 = vmatpush.msrb.mxu0 %v4541_v35  ;;  %1978 = vmatpush.msrb.mxu3 %v4551_v38 }
 0x7c9   :  { %2042 = vmatpush.msrb.mxu1 %v4493_v2  ;;  %1948 = vmatpush.msrb.mxu2 %v4584_v50 }
 0x7ca   :  { %2001 = vmatpush.msrb.mxu0 %v4544_v36  ;;  %2148 = vmatpush.msra.mxu3 %v5442_v23 }
 0x7cb   :  { %2044 = vmatpush.msrb.mxu1 %v4495_v6  ;;  %2115 = vmatpush.msra.mxu2 %v4387_v3 }
 0x7cc   :  { %2005 = vmatpush.msrb.mxu0 %v5443_v44  ;;  %2154 = vmatpush.msra.mxu3 %v5444_v48 }
 0x7cd   :  { %2046 = vmatpush.msrb.mxu1 %v4506_v21  ;;  %2117 = vmatpush.msra.mxu2 %v4389_v4 }
 0x7ce   :  { %2009 = vmatpush.msrb.mxu0 %v5445_v37  ;;  %2160 = vmatpush.msra.mxu3 %v5446_v53 }
 0x7cf   :  { %2048 = vmatpush.msrb.mxu1 %v4508_v22  ;;  %2119 = vmatpush.msra.mxu2 %v4391_v5 }
 0x7d0   :  { %2013 = vmatpush.msrb.mxu0 %v5447_v19  ;;  %2166 = vmatpush.msra.mxu3 %v5448_v57 }
 0x7d1   :  { %2050 = vmatpush.msrb.mxu1 %v4510_v25  ;;  %2121 = vmatpush.msra.mxu2 %v4396_v7 }
 0x7d2   :  { %2017 = vmatpush.msrb.mxu0 %v5449_v41 }
 0x7d3   :  { %2052 = vmatpush.msrb.mxu1 %v4529_v31 }
 0x7d4   :  { %2021 = vmatpush.msrb.mxu0 %v5450_v27 }
 0x7d5   :  { %2054 = vmatpush.msrb.mxu1 %v4551_v38 }
 0x7d6   :  { %2025 = vmatpush.msrb.mxu0 %v5451_v20 }
 0x827   :  { %v1437_v62 = vpop.f32.mrf.mxu0 }
 0x829   :  { %v1468_v18 = vpop.f32.mrf.mxu1 }
 0x82b   :  { %v1399_v55 = vpop.f32.mrf.mxu3 }
 0x82f   :  { %v1613_v43 = vpop.f32.mrf.mxu0 }
 0x831   :  { %v1654_v45 = vpop.f32.mrf.mxu1 }
 0x832   :  { %v1655_v57 = vadd.f32 %v1654_v45, %v1613_v43 }
 0x833   :  { %v1338_v16 = vpop.f32.mrf.mxu2  ;;  %v1542_v59 = vpop.f32.mrf.mxu3 }
 0x834   :  { %v1339_v60 = vadd.f32 %v5452_v24, %v1338_v16 }
 0x836   :  { %v1400_v26 = vadd.f32 %v1399_v55, %v1339_v60  ;;  %v4192_v55 = vld [vmem:[%s5387_s0 + $0x18] sm:$0xff] }
 0x837   :  { %v1684_v17 = vpop.f32.mrf.mxu0 }
 0x838   :  { %v1438_v39 = vadd.f32 %v1437_v62, %v1400_v26  ;;  %v1685_v53 = vadd.f32 %v1684_v17, %v1655_v57 }
 0x839   :  { %v1711_v37 = vpop.f32.mrf.mxu1 }
 0x83a   :  { %v1469_v56 = vadd.f32 %v1468_v18, %v1438_v39  ;;  %v1712_v48 = vadd.f32 %v1711_v37, %v1685_v53 }
 0x83b   :  { %v1513_v41 = vpop.f32.mrf.mxu2  ;;  %v1769_v36 = vpop.f32.mrf.mxu3 }
 0x83c   :  { %v1514_v19 = vadd.f32 %v1513_v41, %v1469_v56 }
 0x83e   :  { %v1543_v27 = vadd.f32 %v1542_v59, %v1514_v19 }
 0x840   :  { %v4191_v20 = vmul.f32 -1.442695, %v1543_v27 }
 0x842   :  { %4254 = vpow2.f32 %v4191_v20 }
 0x843   :  { %v1744_v44 = vpop.f32.mrf.mxu2 }
 0x844   :  { %v1745_v23 = vadd.f32 %v1744_v44, %v1712_v48 }
 0x846   :  { %v1770_v62 = vadd.f32 %v1769_v36, %v1745_v23 }
 0x848   :  { %v4255_v16 = vpop.eup %4254  ;;  %v1772_v18 = vadd.f32 %v4192_v55, %v1770_v62 }
 0x849   :  { %v1549_v24 = vadd.f32 1.0, %v4255_v16 }
 0x84a   :  { %v4193_v60 = vmul.f32 -1.442695, %v1772_v18 }
 0x84b   :  { %4256 = vrcp.f32 %v1549_v24  ;;  %v1561_v44 = vand.u32 2147483648, %v1549_v24  ;;  %v1559_v53 = vand.u32 2147483647, %v1549_v24  ;;  %vm1555_vm13 = vweird.f32 %v1549_v24 }
 0x84c   :  { %4258 = vpow2.f32 %v4193_v60 }
 0x84d   :  { %4260 = vtanh.f32 %v1543_v27  ;;  %v1562_v36 = vor.u32 1.1754944e-38, %v1561_v44  ;;  %vm1560_vm15 = vcmp.eq.f32.partialorder %v1559_v53, 8.507059e+37 }
 0x851   :  { %v4257_v57 = vpop.eup %4256 }
 0x852   :  { %v4259_v19 = vpop.eup %4258  ;;  %v1551_v41 = vmul.f32 %v4257_v57, %v1549_v24  ;;  %vm1556_vm12 = vweird.f32 %v4257_v57 }
 0x853   :  { %v1777_v43 = vadd.f32 1.0, %v4259_v19  ;;  %vm1557_vm14 = vmor %vm1555_vm13, %vm1556_vm12  ;;  %v4261_v23 = vpop.eup %4260 }
 0x854   :  { %v1552_v37 = vsub.f32 1.0, %v1551_v41 }
 0x855   :  { %4262 = vrcp.f32 %v1777_v43  ;;  %v1789_v17 = vand.u32 2147483648, %v1777_v43  ;;  %v1787_v62 = vand.u32 2147483647, %v1777_v43  ;;  %vm1783_vm1 = vweird.f32 %v1777_v43 }
 0x856   :  { %v1553_v48 = vmul.f32 %v4257_v57, %v1552_v37  ;;  %4264 = vtanh.f32 %v1772_v18 }
 0x857   :  { %v1790_v24 = vor.u32 1.1754944e-38, %v1789_v17  ;;  %vm1788_vm4 = vcmp.eq.f32.partialorder %v1787_v62, 8.507059e+37 }
 0x858   :  { %v1554_v20 = vadd.f32 %v4257_v57, %v1553_v48 }
 0x85a   :  { %v1558_v45 = vsel %vm1557_vm14, %v4257_v57, %v1554_v20 }
 0x85b   :  { %v4263_v26 = vpop.eup %4262  ;;  %v1563_v39 = vsel %vm1560_vm15, %v1562_v36, %v1558_v45 }
 0x85c   :  { %v1565_v59 = vsel %vm4465_vm3, %v4261_v23, %v1563_v39  ;;  %v1779_v56 = vmul.f32 %v4263_v26, %v1777_v43  ;;  %vm1784_vm0 = vweird.f32 %v4263_v26  ;;  %v4265_v57 = vpop.eup %4264 }
 0x85d   :  { %1568 = vrot.lane.b32.xlu2 %v1565_v59, %s4345_s27  ;;  %vm1785_vm2 = vmor %vm1783_vm1, %vm1784_vm0  ;;  %v1566_v43 = vmul.f32 %v1565_v59, %v4851_v52 }
 0x85e   :  { %v1780_v27 = vsub.f32 1.0, %v1779_v56 }
 0x860   :  { %v1781_v55 = vmul.f32 %v4263_v26, %v1780_v27 }
 0x862   :  { %v1782_v16 = vadd.f32 %v4263_v26, %v1781_v55 }
 0x864   :  { %v1786_v60 = vsel %vm1785_vm2, %v4263_v26, %v1782_v16 }
 0x865   :  { %v1791_v19 = vsel %vm1788_vm4, %v1790_v24, %v1786_v60 }
 0x866   :  { %v1793_v41 = vsel %vm4465_vm3, %v4265_v57, %v1791_v19 }
 0x867   :  { %1796 = vrot.lane.b32.xlu0 %v1793_v41, %s4345_s27  ;;  %v1794_v23 = vmul.f32 %v1793_v41, %v4856_v42 }
 0x8b7   :  { %v1569_v37 = vpop.permute.xlu2 %1568 }
 0x8b8   :  { %v1571_v44 = vmul.f32 %v1569_v37, %v1565_v59 }
 0x8ba   :  { %1573 = vrot.lane.b32.xlu1 %v1571_v44, %s4346_s28 }
 0x8d9   :  { %v1797_v18 = vpop.permute.xlu0 %1796 }
 0x8da   :  { %v1799_v48 = vmul.f32 %v1797_v18, %v1793_v41 }
 0x8dc   :  { %1801 = vrot.lane.b32.xlu2 %v1799_v48, %s4346_s28 }
 0x92c   :  { %v1574_v53 = vpop.permute.xlu1 %1573 }
 0x92d   :  { %v4950_v20 = vadd.f32 %v1574_v53, %v1566_v43  ;;  %v5453_v53 = vld [vmem:[#allocation6_spill] sm:$0xff] }
 0x92f   :  { %4266 = vtanh.f32 %v4950_v20 }
 0x935   :  { %v4267_v36 = vpop.eup %4266 }
 0x936   :  { %1579 = vrot.lane.b32.xlu0 %v4267_v36, %s4345_s27  ;;  %v1802_v45 = vpop.permute.xlu2 %1801  ;;  %v5454_v36 = vld [vmem:[#allocation2_spill] sm:$0xff] }
 0x937   :  { %v4955_v26 = vadd.f32 %v1802_v45, %v1794_v23  ;;  %v5455_v23 = vld [vmem:[#allocation7_spill] sm:$0xff] }
 0x938   :  { %v5456_v45 = vld [vmem:[#allocation3_spill] sm:$0xff] }
 0x939   :  { %4268 = vtanh.f32 %v4955_v26 }
 0x93f   :  { %v4269_v39 = vpop.eup %4268 }
 0x940   :  { %1807 = vrot.lane.b32.xlu1 %v4269_v39, %s4345_s27  ;;  %v5457_v39 = vld [vmem:[#allocation8_spill] sm:$0xff] }
 0x9a8   :  { %v1580_v56 = vpop.permute.xlu0 %1579 }
 0x9a9   :  { %v1582_v52 = vmul.f32 %v1580_v56, %v1565_v59  ;;  %v5458_v56 = vld [vmem:[#allocation4_spill] sm:$0xff] }
 0x9ab   :  { %1816 = vrot.lane.b32.xlu0 %v1582_v52, %s4345_s27  ;;  %v5459_v52 = vld [vmem:[#allocation9_spill] sm:$0xff] }
 0x9b2   :  { %v1808_v27 = vpop.permute.xlu1 %1807 }
 0x9b3   :  { %v1810_v17 = vmul.f32 %v1808_v27, %v1793_v41  ;;  %v5460_v27 = vld [vmem:[#allocation5_spill] sm:$0xff] }
 0x9b5   :  { %1812 = vrot.lane.b32.xlu2 %v1810_v17, %s4346_s28  ;;  %v5461_v17 = vld [vmem:[#allocation10_spill] sm:$0xff] }
 0xa0f   :  { %v1813_v55 = vpop.permute.xlu2 %1812 }
 0xa10   :  { %v2100_v42 = vsel %vm29_vm7, %v1813_v55, 0 }
 0xa11   :  { %v2122_v62 = vand.u32 4294901760, %v2100_v42 }
 0xa13   :  { %v2123_v24 = vsub.f32 %v2100_v42, %v2122_v62  ;;  %v5463_v42 = vld [vmem:[#allocation12_spill] sm:$0xff] }
 0xa15   :  { %v2124_v37 = vand.u32 4294901760, %v2123_v24 }
 0xa17   :  { %v2125_v41 = vsub.f32 %v2123_v24, %v2124_v37 }
 0xa19   :  { %v2126_v43 = vand.u32 4294901760, %v2125_v41 }
 0xa1d   :  { %v1817_v16 = vpop.permute.xlu0 %1816 }
 0xa1e   :  { %v1819_v60 = vsel %vm29_vm7, %v1813_v55, %v1817_v16  ;;  %v5462_v55 = vld [vmem:[#allocation11_spill] sm:$0xff] }
 0xa1f   :  { %v1821_v57 = vsel %vm274_vm8, %v1819_v60, 0  ;;  %v5039_v60 = vld [vmem:[%s5389_s3] ss:$0 sm:$0xff] }
 0xa20   :  { %v1847_v19 = vand.u32 4294901760, %v1821_v57  ;;  %5464 = vst [vmem:[#allocation13_spill] sm:$0xff] %v5039_v60 }
 0xa22   :  { %v1848_v44 = vsub.f32 %v1821_v57, %v1847_v19  ;;  %1913 = vmatmul.f32.vlgmr.msra.gmra.mxu1 %v1847_v19 }
 0xa23   :  { %2275 = vmatpush.msra.mxu1 %v4387_v3 }
 0xa24   :  { %1951 = vmatmul.f32.vlgmr.msrb.gmra.mxu2 %v1848_v44  ;;  %v1849_v59 = vand.u32 4294901760, %v1848_v44 }
 0xa25   :  { %2186 = vmatpush.msrb.mxu2 %v4400_v8  ;;  %2277 = vmatpush.msra.mxu1 %v4389_v4 }
 0xa26   :  { %1982 = vmatmul.f32.vlgmr.msrb.gmra.mxu3 %v1849_v59  ;;  %v1850_v18 = vsub.f32 %v1848_v44, %v1849_v59 }
 0xa27   :  { %2189 = vmatpush.msrb.mxu2 %v4403_v9  ;;  %2215 = vmatpush.msrb.mxu3 %v4387_v3 }
 0xa28   :  { %v1851_v48 = vand.u32 4294901760, %v1850_v18  ;;  %2279 = vmatpush.msra.mxu1 %v4391_v5 }
 0xa29   :  { %2192 = vmatpush.msrb.mxu2 %v4406_v10  ;;  %2217 = vmatpush.msrb.mxu3 %v4389_v4 }
 0xa2a   :  { %1852 = vmatmul.f32.vlgmr.msra.gmra.mxu0 %v1851_v48  ;;  %2056 = vmatmul.f32.vlgmr.msrb.gmra.mxu1 %v1847_v19 }
 0xa2b   :  { %2281 = vmatpush.msra.mxu1 %v4396_v7  ;;  %2195 = vmatpush.msrb.mxu2 %v4410_v11 }
 0xa2c   :  { %2127 = vmatmul.f32.vlgmr.msra.gmra.mxu2 %v2126_v43  ;;  %2219 = vmatpush.msrb.mxu3 %v4391_v5 }
 0xa2d   :  { %2244 = vmatpush.msra.mxu0 %v4414_v12  ;;  %2347 = vmatpush.msra.mxu2 %v4491_v1 }
 0xa2e   :  { %2168 = vmatmul.f32.vlgmr.msra.gmra.mxu3 %v2122_v62  ;;  %2479 = vmatpush.msrb.mxu1 %v4491_v1 }
 0xa2f   :  { %2221 = vmatpush.msrb.mxu3 %v4396_v7  ;;  %2248 = vmatpush.msra.mxu0 %v4417_v13 }
 0xa30   :  { %2349 = vmatpush.msra.mxu2 %v4493_v2  ;;  %2481 = vmatpush.msrb.mxu1 %v4493_v2 }
 0xa31   :  { %2384 = vmatpush.msra.mxu3 %v4575_v46  ;;  %2252 = vmatpush.msra.mxu0 %v4420_v14 }
 0xa32   :  { %2027 = vmatmul.f32.vlgmr.msrb.gmra.mxu0 %v1847_v19  ;;  %2283 = vmatmul.f32.vlgmr.msra.gmra.mxu1 %v2122_v62 }
 0xa33   :  { %2256 = vmatpush.msra.mxu0 %v4424_v15  ;;  %2390 = vmatpush.msra.mxu3 %v4577_v47 }
 0xa34   :  { %2198 = vmatmul.f32.vlgmr.msrb.gmra.mxu2 %v2123_v24  ;;  %2483 = vmatpush.msrb.mxu1 %v4495_v6 }
 0xa35   :  { %2442 = vmatpush.msrb.mxu0 %v4519_v28  ;;  %2396 = vmatpush.msra.mxu3 %v4588_v51 }
 0xa36   :  { %2351 = vmatpush.msra.mxu2 %v4495_v6  ;;  %2225 = vmatmul.f32.vlgmr.msrb.gmra.mxu3 %v2124_v37 }
 0xa37   :  { %2445 = vmatpush.msrb.mxu0 %v4522_v29  ;;  %2402 = vmatpush.msra.mxu3 %v4599_v54 }
 0xa38   :  { %2353 = vmatpush.msra.mxu2 %v4506_v21  ;;  %2485 = vmatpush.msrb.mxu1 %v4506_v21 }
 0xa39   :  { %2448 = vmatpush.msrb.mxu0 %v4525_v30  ;;  %2408 = vmatpush.msra.mxu3 %v4610_v58 }
 0xa3a   :  { %2355 = vmatpush.msra.mxu2 %v4508_v22  ;;  %2258 = vmatmul.f32.vlgmr.msra.gmra.mxu0 %v2122_v62 }
 0xa3b   :  { %2414 = vmatpush.msra.mxu3 %v4618_v61  ;;  %2451 = vmatpush.msrb.mxu0 %v4532_v32 }
 0xa3c   :  { %2357 = vmatpush.msra.mxu2 %v4510_v25  ;;  %2487 = vmatpush.msrb.mxu1 %v4508_v22 }
 0xa3d   :  { %2420 = vmatpush.msra.mxu3 %v4626_v63  ;;  %2454 = vmatpush.msrb.mxu0 %v4535_v33 }
 0xa3e   :  { %2359 = vmatpush.msra.mxu2 %v4529_v31  ;;  %2489 = vmatpush.msrb.mxu1 %v4510_v25 }
 0xa3f   :  { %2426 = vmatpush.msra.mxu3 %v4632_v0  ;;  %2457 = vmatpush.msrb.mxu0 %v4538_v34 }
 0xa40   :  { %2361 = vmatpush.msra.mxu2 %v4551_v38  ;;  %2491 = vmatpush.msrb.mxu1 %v4529_v31 }
 0xa41   :  { %2555 = vmatpush.msrb.mxu3 %v4491_v1  ;;  %2460 = vmatpush.msrb.mxu0 %v4557_v40 }
 0xa42   :  { %2512 = vmatpush.msrb.mxu2 %v4541_v35  ;;  %2493 = vmatpush.msrb.mxu1 %v4551_v38 }
 0xa43   :  { %2557 = vmatpush.msrb.mxu3 %v4493_v2  ;;  %2463 = vmatpush.msrb.mxu0 %v4584_v50 }
 0xa44   :  { %2516 = vmatpush.msrb.mxu2 %v5453_v53  ;;  %2663 = vmatpush.msra.mxu1 %v5454_v36 }
 0xa45   :  { %2559 = vmatpush.msrb.mxu3 %v4495_v6  ;;  %2630 = vmatpush.msra.mxu0 %v4387_v3 }
 0xa46   :  { %2520 = vmatpush.msrb.mxu2 %v5455_v23  ;;  %2669 = vmatpush.msra.mxu1 %v5456_v45 }
 0xa47   :  { %2561 = vmatpush.msrb.mxu3 %v4506_v21  ;;  %2632 = vmatpush.msra.mxu0 %v4389_v4 }
 0xa48   :  { %2524 = vmatpush.msrb.mxu2 %v5457_v39  ;;  %2675 = vmatpush.msra.mxu1 %v5458_v56 }
 0xa49   :  { %2563 = vmatpush.msrb.mxu3 %v4508_v22  ;;  %2634 = vmatpush.msra.mxu0 %v4391_v5 }
 0xa4a   :  { %2528 = vmatpush.msrb.mxu2 %v5459_v52  ;;  %2681 = vmatpush.msra.mxu1 %v5460_v27 }
 0xa4b   :  { %2565 = vmatpush.msrb.mxu3 %v4510_v25  ;;  %2636 = vmatpush.msra.mxu0 %v4396_v7 }
 0xa4c   :  { %2532 = vmatpush.msrb.mxu2 %v5461_v17 }
 0xa4d   :  { %2567 = vmatpush.msrb.mxu3 %v4529_v31 }
 0xa4e   :  { %2536 = vmatpush.msrb.mxu2 %v5462_v55 }
 0xa4f   :  { %2569 = vmatpush.msrb.mxu3 %v4551_v38 }
 0xa50   :  { %2540 = vmatpush.msrb.mxu2 %v5463_v42 }
 0xa9f   :  { %v1914_v62 = vpop.f32.mrf.mxu1 }
 0xaa7   :  { %v1853_v16 = vpop.f32.mrf.mxu0  ;;  %v1952_v24 = vpop.f32.mrf.mxu2 }
 0xaa8   :  { %v1854_v57 = vadd.f32 %v5039_v60, %v1853_v16  ;;  %v2057_v43 = vpop.f32.mrf.mxu1 }
 0xaa9   :  { %v1983_v19 = vpop.f32.mrf.mxu3 }
 0xaaa   :  { %v1915_v37 = vadd.f32 %v1914_v62, %v1854_v57 }
 0xaac   :  { %v1953_v44 = vadd.f32 %v1952_v24, %v1915_v37  ;;  %v4195_v24 = vld [vmem:[%s5387_s0 + $0x20] sm:$0xff] }
 0xaae   :  { %v1984_v59 = vadd.f32 %v1983_v19, %v1953_v44 }
 0xaaf   :  { %v2028_v41 = vpop.f32.mrf.mxu0  ;;  %v2128_v18 = vpop.f32.mrf.mxu2 }
 0xab0   :  { %v2029_v48 = vadd.f32 %v2028_v41, %v1984_v59  ;;  %v2284_v62 = vpop.f32.mrf.mxu1 }
 0xab1   :  { %v2169_v55 = vpop.f32.mrf.mxu3 }
 0xab2   :  { %v2058_v42 = vadd.f32 %v2057_v43, %v2029_v48  ;;  %v2170_v27 = vadd.f32 %v2169_v55, %v2128_v18 }
 0xab4   :  { %v4194_v17 = vmul.f32 -1.442695, %v2058_v42 }
 0xab6   :  { %4270 = vpow2.f32 %v4194_v17 }
 0xab7   :  { %v2199_v52 = vpop.f32.mrf.mxu2  ;;  %v2259_v23 = vpop.f32.mrf.mxu0 }
 0xab8   :  { %v2200_v56 = vadd.f32 %v2199_v52, %v2170_v27 }
 0xab9   :  { %v2226_v39 = vpop.f32.mrf.mxu3 }
 0xaba   :  { %v2227_v45 = vadd.f32 %v2226_v39, %v2200_v56 }
 0xabc   :  { %v4271_v36 = vpop.eup %4270  ;;  %v2260_v16 = vadd.f32 %v2259_v23, %v2227_v45 }
 0xabd   :  { %v2064_v60 = vadd.f32 1.0, %v4271_v36 }
 0xabe   :  { %v2285_v57 = vadd.f32 %v2284_v62, %v2260_v16 }
 0xabf   :  { %4272 = vrcp.f32 %v2064_v60  ;;  %v2076_v52 = vand.u32 2147483648, %v2064_v60  ;;  %v2074_v23 = vand.u32 2147483647, %v2064_v60  ;;  %vm2070_vm6 = vweird.f32 %v2064_v60 }
 0xac0   :  { %v2287_v19 = vadd.f32 %v4195_v24, %v2285_v57 }
 0xac1   :  { %v2077_v27 = vor.u32 1.1754944e-38, %v2076_v52  ;;  %vm2075_vm10 = vcmp.eq.f32.partialorder %v2074_v23, 8.507059e+37 }
 0xac2   :  { %v4196_v37 = vmul.f32 -1.442695, %v2287_v19 }
 0xac4   :  { %4274 = vpow2.f32 %v4196_v37 }
 0xac5   :  { %v4273_v17 = vpop.eup %4272  ;;  %4276 = vtanh.f32 %v2058_v42 }
 0xac6   :  { %v2066_v55 = vmul.f32 %v4273_v17, %v2064_v60  ;;  %vm2071_vm5 = vweird.f32 %v4273_v17 }
 0xac7   :  { %vm2072_vm9 = vmor %vm2070_vm6, %vm2071_vm5 }
 0xac8   :  { %v2067_v44 = vsub.f32 1.0, %v2066_v55 }
 0xaca   :  { %v4275_v39 = vpop.eup %4274  ;;  %v2068_v56 = vmul.f32 %v4273_v17, %v2067_v44 }
 0xacb   :  { %v2292_v36 = vadd.f32 1.0, %v4275_v39  ;;  %v4277_v41 = vpop.eup %4276 }
 0xacc   :  { %v2069_v45 = vadd.f32 %v4273_v17, %v2068_v56 }
 0xacd   :  { %4278 = vrcp.f32 %v2292_v36  ;;  %v2304_v62 = vand.u32 2147483648, %v2292_v36  ;;  %v2302_v60 = vand.u32 2147483647, %v2292_v36  ;;  %vm2298_vm12 = vweird.f32 %v2292_v36 }
 0xace   :  { %v2073_v59 = vsel %vm2072_vm9, %v4273_v17, %v2069_v45  ;;  %4280 = vtanh.f32 %v2287_v19 }
 0xacf   :  { %v2078_v18 = vsel %vm2075_vm10, %v2077_v27, %v2073_v59  ;;  %v2305_v37 = vor.u32 1.1754944e-38, %v2304_v62  ;;  %vm2303_vm14 = vcmp.eq.f32.partialorder %v2302_v60, 8.507059e+37 }
 0xad0   :  { %v2080_v48 = vsel %vm4465_vm3, %v4277_v41, %v2078_v18 }
 0xad1   :  { %2083 = vrot.lane.b32.xlu1 %v2080_v48, %s4345_s27  ;;  %v2081_v41 = vmul.f32 %v2080_v48, %v4950_v20 }
 0xad3   :  { %v4279_v42 = vpop.eup %4278 }
 0xad4   :  { %v2294_v43 = vmul.f32 %v4279_v42, %v2292_v36  ;;  %vm2299_vm11 = vweird.f32 %v4279_v42  ;;  %v4281_v55 = vpop.eup %4280 }
 0xad5   :  { %vm2300_vm13 = vmor %vm2298_vm12, %vm2299_vm11 }
 0xad6   :  { %v2295_v16 = vsub.f32 1.0, %v2294_v43 }
 0xad8   :  { %v2296_v24 = vmul.f32 %v4279_v42, %v2295_v16 }
 0xada   :  { %v2297_v57 = vadd.f32 %v4279_v42, %v2296_v24 }
 0xadc   :  { %v2301_v17 = vsel %vm2300_vm13, %v4279_v42, %v2297_v57 }
 0xadd   :  { %v2306_v44 = vsel %vm2303_vm14, %v2305_v37, %v2301_v17 }
 0xade   :  { %v2308_v52 = vsel %vm4465_vm3, %v4281_v55, %v2306_v44 }
 0xadf   :  { %2311 = vrot.lane.b32.xlu2 %v2308_v52, %s4345_s27  ;;  %v2309_v36 = vmul.f32 %v2308_v52, %v4955_v26 }
 0xb39   :  { %v2312_v39 = vpop.permute.xlu2 %2311 }
 0xb3a   :  { %v2314_v56 = vmul.f32 %v2312_v39, %v2308_v52 }
 0xb3c   :  { %2316 = vrot.lane.b32.xlu1 %v2314_v56, %s4346_s28 }
 0xb43   :  { %v2084_v19 = vpop.permute.xlu1 %2083 }
 0xb44   :  { %v2086_v23 = vmul.f32 %v2084_v19, %v2080_v48 }
 0xb46   :  { %2088 = vrot.lane.b32.xlu0 %v2086_v23, %s4346_s28 }
 0xbae   :  { %v2317_v45 = vpop.permute.xlu1 %2316 }
 0xbaf   :  { %v5054_v27 = vadd.f32 %v2317_v45, %v2309_v36 }
 0xbb1   :  { %4282 = vtanh.f32 %v5054_v27 }
 0xbb7   :  { %v4283_v59 = vpop.eup %4282 }
 0xbb8   :  { %v2089_v18 = vpop.permute.xlu0 %2088  ;;  %2322 = vrot.lane.b32.xlu0 %v4283_v59, %s4345_s27  ;;  %v5465_v59 = vld [vmem:[#allocation2_spill] sm:$0xff] }
 0xbb9   :  { %v5059_v42 = vadd.f32 %v2089_v18, %v2081_v41  ;;  %v5466_v41 = vld [vmem:[#allocation7_spill] sm:$0xff] }
 0xbba   :  { %v5467_v18 = vld [vmem:[#allocation3_spill] sm:$0xff] }
 0xbbb   :  { %4284 = vtanh.f32 %v5059_v42 }
 0xbc1   :  { %v4285_v43 = vpop.eup %4284 }
 0xbc2   :  { %2094 = vrot.lane.b32.xlu2 %v4285_v43, %s4345_s27  ;;  %v5468_v43 = vld [vmem:[#allocation8_spill] sm:$0xff] }
 0xc1c   :  { %v2095_v16 = vpop.permute.xlu2 %2094 }
 0xc1d   :  { %v2097_v26 = vmul.f32 %v2095_v16, %v2080_v48  ;;  %v5469_v16 = vld [vmem:[#allocation4_spill] sm:$0xff] }
 0xc1f   :  { %2331 = vrot.lane.b32.xlu2 %v2097_v26, %s4345_s27  ;;  %v5470_v26 = vld [vmem:[#allocation9_spill] sm:$0xff] }
 0xc2a   :  { %v2323_v62 = vpop.permute.xlu0 %2322 }
 0xc2b   :  { %v2325_v24 = vmul.f32 %v2323_v62, %v2308_v52  ;;  %v5471_v62 = vld [vmem:[#allocation5_spill] sm:$0xff] }
 0xc2d   :  { %2327 = vrot.lane.b32.xlu1 %v2325_v24, %s4346_s28  ;;  %v5472_v24 = vld [vmem:[#allocation10_spill] sm:$0xff] }
 0xc79   :  { %v2332_v60 = vpop.permute.xlu2 %2331 }
 0xc9f   :  { %v2328_v20 = vpop.permute.xlu1 %2327 }
 0xca0   :  { %v2334_v57 = vsel %vm29_vm7, %v2328_v20, %v2332_v60  ;;  %v2615_v37 = vsel %vm29_vm7, %v2328_v20, 0  ;;  %v5473_v60 = vld [vmem:[#allocation11_spill] sm:$0xff]  ;;  %v5474_v20 = vld [vmem:[#allocation12_spill] sm:$0xff] }
 0xca1   :  { %v2336_v17 = vsel %vm274_vm8, %v2334_v57, 0  ;;  %v2637_v55 = vand.u32 4294901760, %v2615_v37 }
 0xca2   :  { %v2362_v44 = vand.u32 4294901760, %v2336_v17 }
 0xca3   :  { %v2638_v39 = vsub.f32 %v2615_v37, %v2637_v55 }
 0xca4   :  { %v2363_v56 = vsub.f32 %v2336_v17, %v2362_v44  ;;  %2428 = vmatmul.f32.vlgmr.msra.gmra.mxu3 %v2362_v44 }
 0xca5   :  { %v2639_v48 = vand.u32 4294901760, %v2638_v39  ;;  %2790 = vmatpush.msra.mxu3 %v4387_v3 }
 0xca6   :  { %2466 = vmatmul.f32.vlgmr.msrb.gmra.mxu0 %v2363_v56  ;;  %v2364_v52 = vand.u32 4294901760, %v2363_v56 }
 0xca7   :  { %2701 = vmatpush.msrb.mxu0 %v4400_v8  ;;  %2792 = vmatpush.msra.mxu3 %v4389_v4  ;;  %v2640_v19 = vsub.f32 %v2638_v39, %v2639_v48 }
 0xca8   :  { %2497 = vmatmul.f32.vlgmr.msrb.gmra.mxu1 %v2364_v52  ;;  %v2365_v23 = vsub.f32 %v2363_v56, %v2364_v52 }
 0xca9   :  { %2704 = vmatpush.msrb.mxu0 %v4403_v9  ;;  %2730 = vmatpush.msrb.mxu1 %v4387_v3  ;;  %v2641_v45 = vand.u32 4294901760, %v2640_v19 }
 0xcaa   :  { %v2366_v36 = vand.u32 4294901760, %v2365_v23  ;;  %2794 = vmatpush.msra.mxu3 %v4391_v5 }
 0xcab   :  { %2707 = vmatpush.msrb.mxu0 %v4406_v10  ;;  %2732 = vmatpush.msrb.mxu1 %v4389_v4 }
 0xcac   :  { %2367 = vmatmul.f32.vlgmr.msra.gmra.mxu2 %v2366_v36  ;;  %2571 = vmatmul.f32.vlgmr.msrb.gmra.mxu3 %v2362_v44 }
 0xcad   :  { %2796 = vmatpush.msra.mxu3 %v4396_v7  ;;  %2759 = vmatpush.msra.mxu2 %v4414_v12 }
 0xcae   :  { %2642 = vmatmul.f32.vlgmr.msra.gmra.mxu0 %v2641_v45  ;;  %2734 = vmatpush.msrb.mxu1 %v4391_v5 }
 0xcaf   :  { %2710 = vmatpush.msrb.mxu0 %v4410_v11  ;;  %2763 = vmatpush.msra.mxu2 %v4417_v13 }
 0xcb0   :  { %2683 = vmatmul.f32.vlgmr.msra.gmra.mxu1 %v2637_v55  ;;  %2994 = vmatpush.msrb.mxu3 %v4491_v1 }
 0xcb1   :  { %2862 = vmatpush.msra.mxu0 %v4491_v1  ;;  %2736 = vmatpush.msrb.mxu1 %v4396_v7 }
 0xcb2   :  { %2767 = vmatpush.msra.mxu2 %v4420_v14  ;;  %2996 = vmatpush.msrb.mxu3 %v4493_v2 }
 0xcb3   :  { %2899 = vmatpush.msra.mxu1 %v4575_v46  ;;  %2864 = vmatpush.msra.mxu0 %v4493_v2 }
 0xcb4   :  { %2771 = vmatpush.msra.mxu2 %v4424_v15  ;;  %2798 = vmatmul.f32.vlgmr.msra.gmra.mxu3 %v2637_v55 }
 0xcb5   :  { %2542 = vmatmul.f32.vlgmr.msrb.gmra.mxu2 %v2362_v44  ;;  %2905 = vmatpush.msra.mxu1 %v4577_v47 }
 0xcb6   :  { %2957 = vmatpush.msrb.mxu2 %v4519_v28  ;;  %2713 = vmatmul.f32.vlgmr.msrb.gmra.mxu0 %v2638_v39  ;;  %v5475_v39 = vld [vmem:[#allocation13_spill] sm:$0xff] }
 0xcb7   :  { %2911 = vmatpush.msra.mxu1 %v4588_v51  ;;  %2866 = vmatpush.msra.mxu0 %v4495_v6 }
 0xcb8   :  { %2960 = vmatpush.msrb.mxu2 %v4522_v29  ;;  %2740 = vmatmul.f32.vlgmr.msrb.gmra.mxu1 %v2639_v48 }
 0xcb9   :  { %2917 = vmatpush.msra.mxu1 %v4599_v54  ;;  %2868 = vmatpush.msra.mxu0 %v4506_v21 }
 0xcba   :  { %2963 = vmatpush.msrb.mxu2 %v4525_v30  ;;  %2998 = vmatpush.msrb.mxu3 %v4495_v6 }
 0xcbb   :  { %2923 = vmatpush.msra.mxu1 %v4610_v58  ;;  %2870 = vmatpush.msra.mxu0 %v4508_v22 }
 0xcbc   :  { %2966 = vmatpush.msrb.mxu2 %v4532_v32  ;;  %3000 = vmatpush.msrb.mxu3 %v4506_v21 }
 0xcbd   :  { %2773 = vmatmul.f32.vlgmr.msra.gmra.mxu2 %v2637_v55  ;;  %2929 = vmatpush.msra.mxu1 %v4618_v61 }
 0xcbe   :  { %2969 = vmatpush.msrb.mxu2 %v4535_v33  ;;  %2872 = vmatpush.msra.mxu0 %v4510_v25 }
 0xcbf   :  { %2935 = vmatpush.msra.mxu1 %v4626_v63  ;;  %3002 = vmatpush.msrb.mxu3 %v4508_v22 }
 0xcc0   :  { %2972 = vmatpush.msrb.mxu2 %v4538_v34  ;;  %2874 = vmatpush.msra.mxu0 %v4529_v31 }
 0xcc1   :  { %2941 = vmatpush.msra.mxu1 %v4632_v0  ;;  %3004 = vmatpush.msrb.mxu3 %v4510_v25 }
 0xcc2   :  { %2975 = vmatpush.msrb.mxu2 %v4557_v40  ;;  %2876 = vmatpush.msra.mxu0 %v4551_v38 }
 0xcc3   :  { %3070 = vmatpush.msrb.mxu1 %v4491_v1  ;;  %3006 = vmatpush.msrb.mxu3 %v4529_v31 }
 0xcc4   :  { %2978 = vmatpush.msrb.mxu2 %v4584_v50  ;;  %3027 = vmatpush.msrb.mxu0 %v4541_v35 }
 0xcc5   :  { %3072 = vmatpush.msrb.mxu1 %v4493_v2  ;;  %3008 = vmatpush.msrb.mxu3 %v4551_v38 }
 0xcc6   :  { %3145 = vmatpush.msra.mxu2 %v4387_v3  ;;  %3031 = vmatpush.msrb.mxu0 %v5453_v53 }
 0xcc7   :  { %3074 = vmatpush.msrb.mxu1 %v4495_v6  ;;  %3178 = vmatpush.msra.mxu3 %v5465_v59 }
 0xcc8   :  { %3147 = vmatpush.msra.mxu2 %v4389_v4  ;;  %3035 = vmatpush.msrb.mxu0 %v5466_v41 }
 0xcc9   :  { %3076 = vmatpush.msrb.mxu1 %v4506_v21  ;;  %3184 = vmatpush.msra.mxu3 %v5467_v18 }
 0xcca   :  { %3149 = vmatpush.msra.mxu2 %v4391_v5  ;;  %3039 = vmatpush.msrb.mxu0 %v5468_v43 }
 0xccb   :  { %3078 = vmatpush.msrb.mxu1 %v4508_v22  ;;  %3190 = vmatpush.msra.mxu3 %v5469_v16 }
 0xccc   :  { %3151 = vmatpush.msra.mxu2 %v4396_v7  ;;  %3043 = vmatpush.msrb.mxu0 %v5470_v26 }
 0xccd   :  { %3080 = vmatpush.msrb.mxu1 %v4510_v25  ;;  %3196 = vmatpush.msra.mxu3 %v5471_v62 }
 0xcce   :  { %3047 = vmatpush.msrb.mxu0 %v5472_v24 }
 0xccf   :  { %3082 = vmatpush.msrb.mxu1 %v4529_v31 }
 0xcd0   :  { %3051 = vmatpush.msrb.mxu0 %v5473_v60 }
 0xcd1   :  { %3084 = vmatpush.msrb.mxu1 %v4551_v38 }
 0xcd2   :  { %3055 = vmatpush.msrb.mxu0 %v5474_v20 }
 0xd23   :  { %v2467_v57 = vpop.f32.mrf.mxu0 }
 0xd25   :  { %v2498_v37 = vpop.f32.mrf.mxu1 }
 0xd27   :  { %v2429_v17 = vpop.f32.mrf.mxu3 }
 0xd2b   :  { %v2643_v55 = vpop.f32.mrf.mxu0 }
 0xd2d   :  { %v2684_v48 = vpop.f32.mrf.mxu1 }
 0xd2e   :  { %v2685_v62 = vadd.f32 %v2684_v48, %v2643_v55 }
 0xd2f   :  { %v2368_v44 = vpop.f32.mrf.mxu2  ;;  %v2572_v23 = vpop.f32.mrf.mxu3 }
 0xd30   :  { %v2369_v56 = vadd.f32 %v5475_v39, %v2368_v44 }
 0xd32   :  { %v2430_v52 = vadd.f32 %v2429_v17, %v2369_v56  ;;  %v4198_v17 = vld [vmem:[%s5387_s0 + $0x28] sm:$0xff] }
 0xd33   :  { %v2714_v45 = vpop.f32.mrf.mxu0 }
 0xd34   :  { %v2468_v19 = vadd.f32 %v2467_v57, %v2430_v52  ;;  %v2715_v16 = vadd.f32 %v2714_v45, %v2685_v62 }
 0xd35   :  { %v2741_v43 = vpop.f32.mrf.mxu1 }
 0xd36   :  { %v2499_v36 = vadd.f32 %v2498_v37, %v2468_v19  ;;  %v2742_v18 = vadd.f32 %v2741_v43, %v2715_v16 }
 0xd37   :  { %v2799_v53 = vpop.f32.mrf.mxu3 }
 0xd38   :  { %v2543_v24 = vpop.f32.mrf.mxu2 }
 0xd39   :  { %v2544_v26 = vadd.f32 %v2543_v24, %v2499_v36 }
 0xd3b   :  { %v2573_v60 = vadd.f32 %v2572_v23, %v2544_v26 }
 0xd3d   :  { %v4197_v20 = vmul.f32 -1.442695, %v2573_v60 }
 0xd3f   :  { %4286 = vpow2.f32 %v4197_v20 }
 0xd40   :  { %v2774_v41 = vpop.f32.mrf.mxu2 }
 0xd41   :  { %v2775_v59 = vadd.f32 %v2774_v41, %v2742_v18 }
 0xd43   :  { %v2800_v57 = vadd.f32 %v2799_v53, %v2775_v59 }
 0xd45   :  { %v4287_v44 = vpop.eup %4286  ;;  %v2802_v37 = vadd.f32 %v4198_v17, %v2800_v57 }
 0xd46   :  { %v2579_v56 = vadd.f32 1.0, %v4287_v44 }
 0xd47   :  { %v4199_v52 = vmul.f32 -1.442695, %v2802_v37 }
 0xd48   :  { %4288 = vrcp.f32 %v2579_v56  ;;  %v2591_v41 = vand.u32 2147483648, %v2579_v56  ;;  %v2589_v16 = vand.u32 2147483647, %v2579_v56  ;;  %vm2585_vm0 = vweird.f32 %v2579_v56 }
 0xd49   :  { %4290 = vpow2.f32 %v4199_v52 }
 0xd4a   :  { %4292 = vtanh.f32 %v2573_v60  ;;  %v2592_v53 = vor.u32 1.1754944e-38, %v2591_v41  ;;  %vm2590_vm2 = vcmp.eq.f32.partialorder %v2589_v16, 8.507059e+37 }
 0xd4e   :  { %v4289_v62 = vpop.eup %4288 }
 0xd4f   :  { %v4291_v26 = vpop.eup %4290  ;;  %v2581_v24 = vmul.f32 %v4289_v62, %v2579_v56  ;;  %vm2586_vm15 = vweird.f32 %v4289_v62 }
 0xd50   :  { %v2807_v55 = vadd.f32 1.0, %v4291_v26  ;;  %vm2587_vm1 = vmor %vm2585_vm0, %vm2586_vm15  ;;  %v4293_v59 = vpop.eup %4292 }
 0xd51   :  { %v2582_v43 = vsub.f32 1.0, %v2581_v24 }
 0xd52   :  { %4294 = vrcp.f32 %v2807_v55  ;;  %v2819_v17 = vand.u32 2147483648, %v2807_v55  ;;  %v2817_v44 = vand.u32 2147483647, %v2807_v55  ;;  %vm2813_vm5 = vweird.f32 %v2807_v55 }
 0xd53   :  { %v2583_v18 = vmul.f32 %v4289_v62, %v2582_v43  ;;  %4296 = vtanh.f32 %v2802_v37 }
 0xd54   :  { %v2820_v52 = vor.u32 1.1754944e-38, %v2819_v17  ;;  %vm2818_vm9 = vcmp.eq.f32.partialorder %v2817_v44, 8.507059e+37 }
 0xd55   :  { %v2584_v20 = vadd.f32 %v4289_v62, %v2583_v18 }
 0xd57   :  { %v2588_v48 = vsel %vm2587_vm1, %v4289_v62, %v2584_v20 }
 0xd58   :  { %v4295_v19 = vpop.eup %4294  ;;  %v2593_v23 = vsel %vm2590_vm2, %v2592_v53, %v2588_v48 }
 0xd59   :  { %v2595_v36 = vsel %vm4465_vm3, %v4293_v59, %v2593_v23  ;;  %v2809_v45 = vmul.f32 %v4295_v19, %v2807_v55  ;;  %vm2814_vm4 = vweird.f32 %v4295_v19  ;;  %v4297_v26 = vpop.eup %4296 }
 0xd5a   :  { %2598 = vrot.lane.b32.xlu0 %v2595_v36, %s4345_s27  ;;  %vm2815_vm6 = vmor %vm2813_vm5, %vm2814_vm4  ;;  %v2596_v55 = vmul.f32 %v2595_v36, %v5059_v42 }
 0xd5b   :  { %v2810_v60 = vsub.f32 1.0, %v2809_v45 }
 0xd5d   :  { %v2811_v57 = vmul.f32 %v4295_v19, %v2810_v60 }
 0xd5f   :  { %v2812_v56 = vadd.f32 %v4295_v19, %v2811_v57 }
 0xd61   :  { %v2816_v62 = vsel %vm2815_vm6, %v4295_v19, %v2812_v56 }
 0xd62   :  { %v2821_v24 = vsel %vm2818_vm9, %v2820_v52, %v2816_v62 }
 0xd63   :  { %v2823_v43 = vsel %vm4465_vm3, %v4297_v26, %v2821_v24 }
 0xd64   :  { %2826 = vrot.lane.b32.xlu1 %v2823_v43, %s4345_s27  ;;  %v2824_v48 = vmul.f32 %v2823_v43, %v5054_v27 }
 0xdcc   :  { %v2599_v41 = vpop.permute.xlu0 %2598 }
 0xdcd   :  { %v2601_v18 = vmul.f32 %v2599_v41, %v2595_v36 }
 0xdcf   :  { %2603 = vrot.lane.b32.xlu2 %v2601_v18, %s4346_s28 }
 0xdd6   :  { %v2827_v37 = vpop.permute.xlu1 %2826 }
 0xdd7   :  { %v2829_v16 = vmul.f32 %v2827_v37, %v2823_v43 }
 0xdd9   :  { %2831 = vrot.lane.b32.xlu0 %v2829_v16, %s4346_s28 }
 0xe29   :  { %v2604_v20 = vpop.permute.xlu2 %2603 }
 0xe2a   :  { %v5153_v53 = vadd.f32 %v2604_v20, %v2596_v55 }
 0xe2c   :  { %4298 = vtanh.f32 %v5153_v53 }
 0xe32   :  { %v4299_v59 = vpop.eup %4298 }
 0xe33   :  { %2609 = vrot.lane.b32.xlu1 %v4299_v59, %s4345_s27  ;;  %v5476_v59 = vld [vmem:[#allocation6_spill] sm:$0xff] }
 0xe4b   :  { %v2832_v19 = vpop.permute.xlu0 %2831 }
 0xe4c   :  { %v5158_v23 = vadd.f32 %v2832_v19, %v2824_v48  ;;  %v5477_v48 = vld [vmem:[#allocation2_spill] sm:$0xff]  ;;  %v5478_v19 = vld [vmem:[#allocation7_spill] sm:$0xff] }
 0xe4e   :  { %4300 = vtanh.f32 %v5158_v23 }
 0xe54   :  { %v4301_v45 = vpop.eup %4300 }
 0xe55   :  { %2837 = vrot.lane.b32.xlu2 %v4301_v45, %s4345_s27  ;;  %v5479_v45 = vld [vmem:[#allocation3_spill] sm:$0xff] }
 0xea5   :  { %v2610_v60 = vpop.permute.xlu1 %2609 }
 0xea6   :  { %v2612_v42 = vmul.f32 %v2610_v60, %v2595_v36  ;;  %v5480_v60 = vld [vmem:[#allocation8_spill] sm:$0xff] }
 0xea8   :  { %2846 = vrot.lane.b32.xlu1 %v2612_v42, %s4345_s27  ;;  %v5481_v42 = vld [vmem:[#allocation4_spill] sm:$0xff] }
 0xeaf   :  { %v2838_v17 = vpop.permute.xlu2 %2837 }
 0xeb0   :  { %v2840_v57 = vmul.f32 %v2838_v17, %v2823_v43  ;;  %v5482_v17 = vld [vmem:[#allocation9_spill] sm:$0xff] }
 0xeb2   :  { %2842 = vrot.lane.b32.xlu0 %v2840_v57, %s4346_s28  ;;  %v5483_v57 = vld [vmem:[#allocation5_spill] sm:$0xff] }
 0xf1a   :  { %v2847_v44 = vpop.permute.xlu1 %2846 }
 0xf24   :  { %v2843_v56 = vpop.permute.xlu0 %2842 }
 0xf25   :  { %v2849_v27 = vsel %vm29_vm7, %v2843_v56, %v2847_v44  ;;  %v3130_v52 = vsel %vm29_vm7, %v2843_v56, 0  ;;  %v5484_v44 = vld [vmem:[#allocation10_spill] sm:$0xff]  ;;  %v5485_v56 = vld [vmem:[#allocation11_spill] sm:$0xff] }
 0xf26   :  { %v2851_v62 = vsel %vm274_vm8, %v2849_v27, 0  ;;  %v3152_v26 = vand.u32 4294901760, %v3130_v52  ;;  %v5486_v27 = vld [vmem:[#allocation12_spill] sm:$0xff] }
 0xf27   :  { %v2877_v24 = vand.u32 4294901760, %v2851_v62 }
 0xf28   :  { %v3153_v41 = vsub.f32 %v3130_v52, %v3152_v26 }
 0xf29   :  { %v2878_v18 = vsub.f32 %v2851_v62, %v2877_v24  ;;  %2943 = vmatmul.f32.vlgmr.msra.gmra.mxu1 %v2877_v24 }
 0xf2a   :  { %v3154_v36 = vand.u32 4294901760, %v3153_v41  ;;  %3305 = vmatpush.msra.mxu1 %v4387_v3 }
 0xf2b   :  { %2981 = vmatmul.f32.vlgmr.msrb.gmra.mxu2 %v2878_v18  ;;  %v2879_v43 = vand.u32 4294901760, %v2878_v18 }
 0xf2c   :  { %3216 = vmatpush.msrb.mxu2 %v4400_v8  ;;  %3307 = vmatpush.msra.mxu1 %v4389_v4  ;;  %v3155_v37 = vsub.f32 %v3153_v41, %v3154_v36 }
 0xf2d   :  { %3012 = vmatmul.f32.vlgmr.msrb.gmra.mxu3 %v2879_v43  ;;  %v2880_v16 = vsub.f32 %v2878_v18, %v2879_v43 }
 0xf2e   :  { %3219 = vmatpush.msrb.mxu2 %v4403_v9  ;;  %3245 = vmatpush.msrb.mxu3 %v4387_v3  ;;  %v3156_v20 = vand.u32 4294901760, %v3155_v37 }
 0xf2f   :  { %v2881_v55 = vand.u32 4294901760, %v2880_v16  ;;  %3309 = vmatpush.msra.mxu1 %v4391_v5 }
 0xf30   :  { %3222 = vmatpush.msrb.mxu2 %v4406_v10  ;;  %3247 = vmatpush.msrb.mxu3 %v4389_v4 }
 0xf31   :  { %2882 = vmatmul.f32.vlgmr.msra.gmra.mxu0 %v2881_v55  ;;  %3086 = vmatmul.f32.vlgmr.msrb.gmra.mxu1 %v2877_v24 }
 0xf32   :  { %3311 = vmatpush.msra.mxu1 %v4396_v7  ;;  %3225 = vmatpush.msrb.mxu2 %v4410_v11 }
 0xf33   :  { %3157 = vmatmul.f32.vlgmr.msra.gmra.mxu2 %v3156_v20  ;;  %3249 = vmatpush.msrb.mxu3 %v4391_v5 }
 0xf34   :  { %3274 = vmatpush.msra.mxu0 %v4414_v12  ;;  %3377 = vmatpush.msra.mxu2 %v4491_v1 }
 0xf35   :  { %3198 = vmatmul.f32.vlgmr.msra.gmra.mxu3 %v3152_v26  ;;  %3509 = vmatpush.msrb.mxu1 %v4491_v1 }
 0xf36   :  { %3251 = vmatpush.msrb.mxu3 %v4396_v7  ;;  %3278 = vmatpush.msra.mxu0 %v4417_v13 }
 0xf37   :  { %3379 = vmatpush.msra.mxu2 %v4493_v2  ;;  %3511 = vmatpush.msrb.mxu1 %v4493_v2 }
 0xf38   :  { %3414 = vmatpush.msra.mxu3 %v4575_v46  ;;  %3282 = vmatpush.msra.mxu0 %v4420_v14 }
 0xf39   :  { %3057 = vmatmul.f32.vlgmr.msrb.gmra.mxu0 %v2877_v24  ;;  %3313 = vmatmul.f32.vlgmr.msra.gmra.mxu1 %v3152_v26 }
 0xf3a   :  { %3286 = vmatpush.msra.mxu0 %v4424_v15  ;;  %3420 = vmatpush.msra.mxu3 %v4577_v47 }
 0xf3b   :  { %3228 = vmatmul.f32.vlgmr.msrb.gmra.mxu2 %v3153_v41  ;;  %3513 = vmatpush.msrb.mxu1 %v4495_v6 }
 0xf3c   :  { %3472 = vmatpush.msrb.mxu0 %v4519_v28  ;;  %3426 = vmatpush.msra.mxu3 %v4588_v51 }
 0xf3d   :  { %3381 = vmatpush.msra.mxu2 %v4495_v6  ;;  %3255 = vmatmul.f32.vlgmr.msrb.gmra.mxu3 %v3154_v36 }
 0xf3e   :  { %3475 = vmatpush.msrb.mxu0 %v4522_v29  ;;  %3432 = vmatpush.msra.mxu3 %v4599_v54 }
 0xf3f   :  { %3383 = vmatpush.msra.mxu2 %v4506_v21  ;;  %3515 = vmatpush.msrb.mxu1 %v4506_v21 }
 0xf40   :  { %3478 = vmatpush.msrb.mxu0 %v4525_v30  ;;  %3438 = vmatpush.msra.mxu3 %v4610_v58 }
 0xf41   :  { %3385 = vmatpush.msra.mxu2 %v4508_v22  ;;  %3288 = vmatmul.f32.vlgmr.msra.gmra.mxu0 %v3152_v26 }
 0xf42   :  { %3444 = vmatpush.msra.mxu3 %v4618_v61  ;;  %3481 = vmatpush.msrb.mxu0 %v4532_v32 }
 0xf43   :  { %3387 = vmatpush.msra.mxu2 %v4510_v25  ;;  %3517 = vmatpush.msrb.mxu1 %v4508_v22 }
 0xf44   :  { %3450 = vmatpush.msra.mxu3 %v4626_v63  ;;  %3484 = vmatpush.msrb.mxu0 %v4535_v33 }
 0xf45   :  { %3389 = vmatpush.msra.mxu2 %v4529_v31  ;;  %3519 = vmatpush.msrb.mxu1 %v4510_v25 }
 0xf46   :  { %3456 = vmatpush.msra.mxu3 %v4632_v0  ;;  %3487 = vmatpush.msrb.mxu0 %v4538_v34 }
 0xf47   :  { %3391 = vmatpush.msra.mxu2 %v4551_v38  ;;  %3521 = vmatpush.msrb.mxu1 %v4529_v31 }
 0xf48   :  { %3585 = vmatpush.msrb.mxu3 %v4491_v1  ;;  %3490 = vmatpush.msrb.mxu0 %v4557_v40 }
 0xf49   :  { %3542 = vmatpush.msrb.mxu2 %v4541_v35  ;;  %3523 = vmatpush.msrb.mxu1 %v4551_v38 }
 0xf4a   :  { %3587 = vmatpush.msrb.mxu3 %v4493_v2  ;;  %3493 = vmatpush.msrb.mxu0 %v4584_v50 }
 0xf4b   :  { %3546 = vmatpush.msrb.mxu2 %v5476_v59  ;;  %3693 = vmatpush.msra.mxu1 %v5477_v48 }
 0xf4c   :  { %3589 = vmatpush.msrb.mxu3 %v4495_v6  ;;  %3660 = vmatpush.msra.mxu0 %v4387_v3 }
 0xf4d   :  { %3550 = vmatpush.msrb.mxu2 %v5478_v19  ;;  %3699 = vmatpush.msra.mxu1 %v5479_v45 }
 0xf4e   :  { %3591 = vmatpush.msrb.mxu3 %v4506_v21  ;;  %3662 = vmatpush.msra.mxu0 %v4389_v4 }
 0xf4f   :  { %3554 = vmatpush.msrb.mxu2 %v5480_v60  ;;  %3705 = vmatpush.msra.mxu1 %v5481_v42 }
 0xf50   :  { %3593 = vmatpush.msrb.mxu3 %v4508_v22  ;;  %3664 = vmatpush.msra.mxu0 %v4391_v5 }
 0xf51   :  { %3558 = vmatpush.msrb.mxu2 %v5482_v17  ;;  %3711 = vmatpush.msra.mxu1 %v5483_v57 }
 0xf52   :  { %3595 = vmatpush.msrb.mxu3 %v4510_v25  ;;  %3666 = vmatpush.msra.mxu0 %v4396_v7 }
 0xf53   :  { %3562 = vmatpush.msrb.mxu2 %v5484_v44 }
 0xf54   :  { %3597 = vmatpush.msrb.mxu3 %v4529_v31 }
 0xf55   :  { %3566 = vmatpush.msrb.mxu2 %v5485_v56 }
 0xf56   :  { %3599 = vmatpush.msrb.mxu3 %v4551_v38 }
 0xf57   :  { %3570 = vmatpush.msrb.mxu2 %v5486_v27 }
 0xfa6   :  { %v2944_v52 = vpop.f32.mrf.mxu1 }
 0xfae   :  { %v2883_v62 = vpop.f32.mrf.mxu0  ;;  %v2982_v26 = vpop.f32.mrf.mxu2 }
 0xfaf   :  { %v2884_v24 = vadd.f32 %v5475_v39, %v2883_v62  ;;  %v3087_v20 = vpop.f32.mrf.mxu1 }
 0xfb0   :  { %v3013_v41 = vpop.f32.mrf.mxu3 }
 0xfb1   :  { %v2945_v18 = vadd.f32 %v2944_v52, %v2884_v24 }
 0xfb3   :  { %v2983_v36 = vadd.f32 %v2982_v26, %v2945_v18  ;;  %v4201_v26 = vld [vmem:[%s5387_s0 + $0x30] sm:$0xff] }
 0xfb5   :  { %v3014_v43 = vadd.f32 %v3013_v41, %v2983_v36 }
 0xfb6   :  { %v3058_v37 = vpop.f32.mrf.mxu0  ;;  %v3158_v16 = vpop.f32.mrf.mxu2 }
 0xfb7   :  { %v3059_v55 = vadd.f32 %v3058_v37, %v3014_v43  ;;  %v3314_v52 = vpop.f32.mrf.mxu1 }
 0xfb8   :  { %v3199_v48 = vpop.f32.mrf.mxu3 }
 0xfb9   :  { %v3088_v45 = vadd.f32 %v3087_v20, %v3059_v55  ;;  %v3200_v57 = vadd.f32 %v3199_v48, %v3158_v16 }
 0xfbb   :  { %v4200_v42 = vmul.f32 -1.442695, %v3088_v45 }
 0xfbd   :  { %4302 = vpow2.f32 %v4200_v42 }
 0xfbe   :  { %v3229_v56 = vpop.f32.mrf.mxu2  ;;  %v3289_v60 = vpop.f32.mrf.mxu0 }
 0xfbf   :  { %v3230_v27 = vadd.f32 %v3229_v56, %v3200_v57 }
 0xfc0   :  { %v3256_v44 = vpop.f32.mrf.mxu3 }
 0xfc1   :  { %v3257_v17 = vadd.f32 %v3256_v44, %v3230_v27 }
 0xfc3   :  { %v4303_v19 = vpop.eup %4302  ;;  %v3290_v39 = vadd.f32 %v3289_v60, %v3257_v17 }
 0xfc4   :  { %v3094_v62 = vadd.f32 1.0, %v4303_v19 }
 0xfc5   :  { %v3315_v24 = vadd.f32 %v3314_v52, %v3290_v39 }
 0xfc6   :  { %4304 = vrcp.f32 %v3094_v62  ;;  %v3106_v56 = vand.u32 2147483648, %v3094_v62  ;;  %v3104_v60 = vand.u32 2147483647, %v3094_v62  ;;  %vm3100_vm11 = vweird.f32 %v3094_v62 }
 0xfc7   :  { %v3317_v41 = vadd.f32 %v4201_v26, %v3315_v24 }
 0xfc8   :  { %v3107_v16 = vor.u32 1.1754944e-38, %v3106_v56  ;;  %vm3105_vm13 = vcmp.eq.f32.partialorder %v3104_v60, 8.507059e+37 }
 0xfc9   :  { %v4202_v18 = vmul.f32 -1.442695, %v3317_v41 }
 0xfcb   :  { %4306 = vpow2.f32 %v4202_v18 }
 0xfcc   :  { %v4305_v36 = vpop.eup %4304  ;;  %4308 = vtanh.f32 %v3088_v45 }
 0xfcd   :  { %v3096_v43 = vmul.f32 %v4305_v36, %v3094_v62  ;;  %vm3101_vm10 = vweird.f32 %v4305_v36 }
 0xfce   :  { %vm3102_vm12 = vmor %vm3100_vm11, %vm3101_vm10 }
 0xfcf   :  { %v3097_v37 = vsub.f32 1.0, %v3096_v43 }
 0xfd1   :  { %v4307_v44 = vpop.eup %4306  ;;  %v3098_v27 = vmul.f32 %v4305_v36, %v3097_v37 }
 0xfd2   :  { %v3322_v19 = vadd.f32 1.0, %v4307_v44  ;;  %v4309_v20 = vpop.eup %4308 }
 0xfd3   :  { %v3099_v17 = vadd.f32 %v4305_v36, %v3098_v27 }
 0xfd4   :  { %4310 = vrcp.f32 %v3322_v19  ;;  %v3334_v52 = vand.u32 2147483648, %v3322_v19  ;;  %v3332_v62 = vand.u32 2147483647, %v3322_v19  ;;  %vm3328_vm15 = vweird.f32 %v3322_v19 }
 0xfd5   :  { %v3103_v55 = vsel %vm3102_vm12, %v4305_v36, %v3099_v17  ;;  %4312 = vtanh.f32 %v3317_v41 }
 0xfd6   :  { %v3108_v48 = vsel %vm3105_vm13, %v3107_v16, %v3103_v55  ;;  %v3335_v18 = vor.u32 1.1754944e-38, %v3334_v52  ;;  %vm3333_vm1 = vcmp.eq.f32.partialorder %v3332_v62, 8.507059e+37 }
 0xfd7   :  { %v3110_v42 = vsel %vm4465_vm3, %v4309_v20, %v3108_v48 }
 0xfd8   :  { %3113 = vrot.lane.b32.xlu2 %v3110_v42, %s4345_s27 }
 0xfda   :  { %v4311_v45 = vpop.eup %4310 }
 0xfdb   :  { %v3324_v57 = vmul.f32 %v4311_v45, %v3322_v19  ;;  %vm3329_vm14 = vweird.f32 %v4311_v45  ;;  %v4313_v43 = vpop.eup %4312  ;;  %v3111_v19 = vmul.f32 %v3110_v42, %v5153_v53 }
 0xfdc   :  { %vm3330_vm0 = vmor %vm3328_vm15, %vm3329_vm14 }
 0xfdd   :  { %v3325_v39 = vsub.f32 1.0, %v3324_v57 }
 0xfdf   :  { %v3326_v26 = vmul.f32 %v4311_v45, %v3325_v39 }
 0xfe1   :  { %v3327_v24 = vadd.f32 %v4311_v45, %v3326_v26 }
 0xfe3   :  { %v3331_v36 = vsel %vm3330_vm0, %v4311_v45, %v3327_v24 }
 0xfe4   :  { %v3336_v37 = vsel %vm3333_vm1, %v3335_v18, %v3331_v36 }
 0xfe5   :  { %v3338_v56 = vsel %vm4465_vm3, %v4313_v43, %v3336_v37 }
 0xfe6   :  { %3341 = vrot.lane.b32.xlu0 %v3338_v56, %s4345_s27  ;;  %v3339_v20 = vmul.f32 %v3338_v56, %v5158_v23 }
0x1032   :  { %v3114_v44 = vpop.permute.xlu2 %3113 }
0x1033   :  { %v3116_v27 = vmul.f32 %v3114_v44, %v3110_v42 }
0x1035   :  { %3118 = vrot.lane.b32.xlu1 %v3116_v27, %s4346_s28 }
0x1058   :  { %v3342_v41 = vpop.permute.xlu0 %3341 }
0x1059   :  { %v3344_v60 = vmul.f32 %v3342_v41, %v3338_v56 }
0x105b   :  { %3346 = vrot.lane.b32.xlu2 %v3344_v60, %s4346_s28 }
0x10a7   :  { %v3119_v17 = vpop.permute.xlu1 %3118 }
0x10a8   :  { %v5252_v16 = vadd.f32 %v3119_v17, %v3111_v19 }
0x10aa   :  { %4314 = vtanh.f32 %v5252_v16 }
0x10b0   :  { %v4315_v55 = vpop.eup %4314 }
0x10b1   :  { %3124 = vrot.lane.b32.xlu0 %v4315_v55, %s4345_s27 }
0x10b5   :  { %v3347_v48 = vpop.permute.xlu2 %3346 }
0x10b6   :  { %v5257_v45 = vadd.f32 %v3347_v48, %v3339_v20 }
0x10b8   :  { %4316 = vtanh.f32 %v5257_v45 }
0x10be   :  { %v4317_v57 = vpop.eup %4316 }
0x10bf   :  { %3352 = vrot.lane.b32.xlu1 %v4317_v57, %s4345_s27 }
0x1123   :  { %v3125_v39 = vpop.permute.xlu0 %3124 }
0x1124   :  { %v3127_v53 = vmul.f32 %v3125_v39, %v3110_v42 }
0x1126   :  { %3361 = vrot.lane.b32.xlu0 %v3127_v53, %s4345_s27 }
0x1131   :  { %v3353_v52 = vpop.permute.xlu1 %3352 }
0x1132   :  { %v3355_v26 = vmul.f32 %v3353_v52, %v3338_v56 }
0x1134   :  { %3357 = vrot.lane.b32.xlu2 %v3355_v26, %s4346_s28 }
0x118e   :  { %v3358_v62 = vpop.permute.xlu2 %3357 }
0x118f   :  { %v3645_v24 = vsel %vm29_vm7, %v3358_v62, 0 }
0x1190   :  { %v3667_v23 = vand.u32 4294901760, %v3645_v24 }
0x1192   :  { %v3668_v36 = vsub.f32 %v3645_v24, %v3667_v23 }
0x1194   :  { %v3669_v27 = vand.u32 4294901760, %v3668_v36 }
0x1196   :  { %v3670_v56 = vsub.f32 %v3668_v36, %v3669_v27 }
0x1198   :  { %v3362_v18 = vpop.permute.xlu0 %3361  ;;  %v3671_v17 = vand.u32 4294901760, %v3670_v56 }
0x1199   :  { %v3364_v43 = vsel %vm29_vm7, %v3358_v62, %v3362_v18 }
0x119a   :  { %v3366_v37 = vsel %vm274_vm8, %v3364_v43, 0 }
0x119b   :  { %v3392_v44 = vand.u32 4294901760, %v3366_v37 }
0x119d   :  { %v3393_v41 = vsub.f32 %v3366_v37, %v3392_v44  ;;  %3458 = vmatmul.f32.vlgmr.msra.gmra.mxu3 %v3392_v44 }
0x119e   :  { %3820 = vmatpush.msra.mxu3 %v4387_v3 }
0x119f   :  { %3496 = vmatmul.f32.vlgmr.msrb.gmra.mxu0 %v3393_v41  ;;  %v3394_v42 = vand.u32 4294901760, %v3393_v41 }
0x11a0   :  { %3731 = vmatpush.msrb.mxu0 %v4400_v8  ;;  %3822 = vmatpush.msra.mxu3 %v4389_v4  ;;  %v5491_v8 = vld [vmem:[#allocation11_spill] sm:$0xff] }
0x11a1   :  { %3527 = vmatmul.f32.vlgmr.msrb.gmra.mxu1 %v3394_v42  ;;  %v3395_v60 = vsub.f32 %v3393_v41, %v3394_v42 }
0x11a2   :  { %3734 = vmatpush.msrb.mxu0 %v4403_v9  ;;  %3760 = vmatpush.msrb.mxu1 %v4387_v3  ;;  %v5487_v3 = vld [vmem:[#allocation7_spill] sm:$0xff]  ;;  %v5492_v9 = vld [vmem:[#allocation12_spill] sm:$0xff] }
0x11a3   :  { %v3396_v19 = vand.u32 4294901760, %v3395_v60  ;;  %3824 = vmatpush.msra.mxu3 %v4391_v5 }
0x11a4   :  { %3737 = vmatpush.msrb.mxu0 %v4406_v10  ;;  %3762 = vmatpush.msrb.mxu1 %v4389_v4  ;;  %v5488_v4 = vld [vmem:[#allocation8_spill] sm:$0xff] }
0x11a5   :  { %3397 = vmatmul.f32.vlgmr.msra.gmra.mxu2 %v3396_v19  ;;  %3601 = vmatmul.f32.vlgmr.msrb.gmra.mxu3 %v3392_v44 }
0x11a6   :  { %3826 = vmatpush.msra.mxu3 %v4396_v7  ;;  %3789 = vmatpush.msra.mxu2 %v4414_v12 }
0x11a7   :  { %3672 = vmatmul.f32.vlgmr.msra.gmra.mxu0 %v3671_v17  ;;  %3764 = vmatpush.msrb.mxu1 %v4391_v5  ;;  %v5489_v5 = vld [vmem:[#allocation9_spill] sm:$0xff] }
0x11a8   :  { %3740 = vmatpush.msrb.mxu0 %v4410_v11  ;;  %3793 = vmatpush.msra.mxu2 %v4417_v13 }
0x11a9   :  { %3713 = vmatmul.f32.vlgmr.msra.gmra.mxu1 %v3667_v23  ;;  %4024 = vmatpush.msrb.mxu3 %v4491_v1 }
0x11aa   :  { %3892 = vmatpush.msra.mxu0 %v4491_v1  ;;  %3766 = vmatpush.msrb.mxu1 %v4396_v7  ;;  %v5490_v7 = vld [vmem:[#allocation10_spill] sm:$0xff] }
0x11ab   :  { %3797 = vmatpush.msra.mxu2 %v4420_v14  ;;  %4026 = vmatpush.msrb.mxu3 %v4493_v2 }
0x11ac   :  { %3929 = vmatpush.msra.mxu1 %v4575_v46  ;;  %3894 = vmatpush.msra.mxu0 %v4493_v2 }
0x11ad   :  { %3801 = vmatpush.msra.mxu2 %v4424_v15  ;;  %3828 = vmatmul.f32.vlgmr.msra.gmra.mxu3 %v3667_v23  ;;  %v5333_v15 = vld [vmem:[%s5389_s3] ss:$0 sm:$0xff] }
0x11ae   :  { %3572 = vmatmul.f32.vlgmr.msrb.gmra.mxu2 %v3392_v44  ;;  %3935 = vmatpush.msra.mxu1 %v4577_v47 }
0x11af   :  { %3987 = vmatpush.msrb.mxu2 %v4519_v28  ;;  %3743 = vmatmul.f32.vlgmr.msrb.gmra.mxu0 %v3668_v36 }
0x11b0   :  { %3941 = vmatpush.msra.mxu1 %v4588_v51  ;;  %3896 = vmatpush.msra.mxu0 %v4495_v6 }
0x11b1   :  { %3990 = vmatpush.msrb.mxu2 %v4522_v29  ;;  %3770 = vmatmul.f32.vlgmr.msrb.gmra.mxu1 %v3669_v27 }
0x11b2   :  { %3947 = vmatpush.msra.mxu1 %v4599_v54  ;;  %3898 = vmatpush.msra.mxu0 %v4506_v21 }
0x11b3   :  { %3993 = vmatpush.msrb.mxu2 %v4525_v30  ;;  %4028 = vmatpush.msrb.mxu3 %v4495_v6 }
0x11b4   :  { %3953 = vmatpush.msra.mxu1 %v4610_v58  ;;  %3900 = vmatpush.msra.mxu0 %v4508_v22 }
0x11b5   :  { %3996 = vmatpush.msrb.mxu2 %v4532_v32  ;;  %4030 = vmatpush.msrb.mxu3 %v4506_v21 }
0x11b6   :  { %3803 = vmatmul.f32.vlgmr.msra.gmra.mxu2 %v3667_v23  ;;  %3959 = vmatpush.msra.mxu1 %v4618_v61 }
0x11b7   :  { %3999 = vmatpush.msrb.mxu2 %v4535_v33  ;;  %3902 = vmatpush.msra.mxu0 %v4510_v25 }
0x11b8   :  { %3965 = vmatpush.msra.mxu1 %v4626_v63  ;;  %4032 = vmatpush.msrb.mxu3 %v4508_v22 }
0x11b9   :  { %4002 = vmatpush.msrb.mxu2 %v4538_v34  ;;  %3904 = vmatpush.msra.mxu0 %v4529_v31 }
0x11ba   :  { %3971 = vmatpush.msra.mxu1 %v4632_v0  ;;  %4034 = vmatpush.msrb.mxu3 %v4510_v25 }
0x11bb   :  { %4005 = vmatpush.msrb.mxu2 %v4557_v40  ;;  %3906 = vmatpush.msra.mxu0 %v4551_v38 }
0x11bc   :  { %4100 = vmatpush.msrb.mxu1 %v4491_v1  ;;  %4036 = vmatpush.msrb.mxu3 %v4529_v31 }
0x11bd   :  { %4008 = vmatpush.msrb.mxu2 %v4584_v50  ;;  %4057 = vmatpush.msrb.mxu0 %v4541_v35  ;;  %v4204_v50 = vld [vmem:[%s5387_s0 + $0x38] sm:$0xff] }
0x11be   :  { %4102 = vmatpush.msrb.mxu1 %v4493_v2  ;;  %4038 = vmatpush.msrb.mxu3 %v4551_v38 }
0x11bf   :  { %4061 = vmatpush.msrb.mxu0 %v5476_v59 }
0x11c0   :  { %4104 = vmatpush.msrb.mxu1 %v4495_v6 }
0x11c1   :  { %4065 = vmatpush.msrb.mxu0 %v5487_v3 }
0x11c2   :  { %4106 = vmatpush.msrb.mxu1 %v4506_v21 }
0x11c3   :  { %4069 = vmatpush.msrb.mxu0 %v5488_v4 }
0x11c4   :  { %4108 = vmatpush.msrb.mxu1 %v4508_v22 }
0x11c5   :  { %4073 = vmatpush.msrb.mxu0 %v5489_v5 }
0x11c6   :  { %4110 = vmatpush.msrb.mxu1 %v4510_v25 }
0x11c7   :  { %4077 = vmatpush.msrb.mxu0 %v5490_v7 }
0x11c8   :  { %4112 = vmatpush.msrb.mxu1 %v4529_v31 }
0x11c9   :  { %4081 = vmatpush.msrb.mxu0 %v5491_v8 }
0x11ca   :  { %4114 = vmatpush.msrb.mxu1 %v4551_v38 }
0x11cb   :  { %4085 = vmatpush.msrb.mxu0 %v5492_v9 }
0x121c   :  { %v3497_v10 = vpop.f32.mrf.mxu0 }
0x121e   :  { %v3528_v11 = vpop.f32.mrf.mxu1 }
0x1220   :  { %v3459_v12 = vpop.f32.mrf.mxu3 }
0x1224   :  { %v3673_v13 = vpop.f32.mrf.mxu0 }
0x1226   :  { %v3714_v2 = vpop.f32.mrf.mxu1 }
0x1227   :  { %v3715_v30 = vadd.f32 %v3714_v2, %v3673_v13 }
0x1228   :  { %v3398_v14 = vpop.f32.mrf.mxu2  ;;  %v3602_v22 = vpop.f32.mrf.mxu3 }
0x1229   :  { %v3399_v1 = vadd.f32 %v5333_v15, %v3398_v14 }
0x122b   :  { %v3460_v6 = vadd.f32 %v3459_v12, %v3399_v1 }
0x122c   :  { %v3744_v28 = vpop.f32.mrf.mxu0 }
0x122d   :  { %v3498_v21 = vadd.f32 %v3497_v10, %v3460_v6  ;;  %v3745_v32 = vadd.f32 %v3744_v28, %v3715_v30 }
0x122e   :  { %v3771_v34 = vpop.f32.mrf.mxu1 }
0x122f   :  { %v3529_v25 = vadd.f32 %v3528_v11, %v3498_v21  ;;  %v3772_v38 = vadd.f32 %v3771_v34, %v3745_v32 }
0x1230   :  { %v3829_v47 = vpop.f32.mrf.mxu3 }
0x1231   :  { %v3573_v29 = vpop.f32.mrf.mxu2 }
0x1232   :  { %v3574_v31 = vadd.f32 %v3573_v29, %v3529_v25 }
0x1234   :  { %v3603_v33 = vadd.f32 %v3602_v22, %v3574_v31 }
0x1236   :  { %v4203_v35 = vmul.f32 -1.442695, %v3603_v33 }
0x1238   :  { %4318 = vpow2.f32 %v4203_v35 }
0x1239   :  { %v3804_v40 = vpop.f32.mrf.mxu2 }
0x123a   :  { %v3805_v46 = vadd.f32 %v3804_v40, %v3772_v38 }
0x123c   :  { %v3830_v51 = vadd.f32 %v3829_v47, %v3805_v46 }
0x123e   :  { %v4319_v54 = vpop.eup %4318  ;;  %v3832_v58 = vadd.f32 %v4204_v50, %v3830_v51 }
0x123f   :  { %v3609_v61 = vadd.f32 1.0, %v4319_v54 }
0x1240   :  { %v4205_v63 = vmul.f32 -1.442695, %v3832_v58 }
0x1241   :  { %4320 = vrcp.f32 %v3609_v61  ;;  %v3621_v57 = vand.u32 2147483648, %v3609_v61  ;;  %v3619_v53 = vand.u32 2147483647, %v3609_v61  ;;  %vm3615_vm4 = vweird.f32 %v3609_v61 }
0x1242   :  { %4322 = vpow2.f32 %v4205_v63 }
0x1243   :  { %4324 = vtanh.f32 %v3603_v33  ;;  %v3622_v26 = vor.u32 1.1754944e-38, %v3621_v57  ;;  %vm3620_vm6 = vcmp.eq.f32.partialorder %v3619_v53, 8.507059e+37 }
0x1247   :  { %v4321_v0 = vpop.eup %4320 }
0x1248   :  { %v4323_v59 = vpop.eup %4322  ;;  %v3611_v55 = vmul.f32 %v4321_v0, %v3609_v61  ;;  %vm3616_vm2 = vweird.f32 %v4321_v0 }
0x1249   :  { %v3837_v20 = vadd.f32 1.0, %v4323_v59  ;;  %vm3617_vm5 = vmor %vm3615_vm4, %vm3616_vm2  ;;  %v4325_v62 = vpop.eup %4324 }
0x124a   :  { %v3612_v48 = vsub.f32 1.0, %v3611_v55 }
0x124b   :  { %4326 = vrcp.f32 %v3837_v20  ;;  %v3849_v44 = vand.u32 2147483648, %v3837_v20  ;;  %v3847_v41 = vand.u32 2147483647, %v3837_v20  ;;  %vm3843_vm10 = vweird.f32 %v3837_v20 }
0x124c   :  { %v3613_v39 = vmul.f32 %v4321_v0, %v3612_v48  ;;  %4328 = vtanh.f32 %v3832_v58 }
0x124d   :  { %v3850_v56 = vor.u32 1.1754944e-38, %v3849_v44  ;;  %vm3848_vm12 = vcmp.eq.f32.partialorder %v3847_v41, 8.507059e+37 }
0x124e   :  { %v3614_v52 = vadd.f32 %v4321_v0, %v3613_v39 }
0x1250   :  { %v3618_v24 = vsel %vm3617_vm5, %v4321_v0, %v3614_v52 }
0x1251   :  { %v4327_v23 = vpop.eup %4326  ;;  %v3623_v18 = vsel %vm3620_vm6, %v3622_v26, %v3618_v24 }
0x1252   :  { %v3625_v36 = vsel %vm4465_vm3, %v4325_v62, %v3623_v18  ;;  %v3839_v43 = vmul.f32 %v4327_v23, %v3837_v20  ;;  %vm3844_vm9 = vweird.f32 %v4327_v23  ;;  %v4329_v19 = vpop.eup %4328 }
0x1253   :  { %3628 = vrot.lane.b32.xlu1 %v3625_v36, %s4345_s27  ;;  %vm3845_vm11 = vmor %vm3843_vm10, %vm3844_vm9  ;;  %v3626_v13 = vmul.f32 %v3625_v36, %v5252_v16 }
0x1254   :  { %v3840_v37 = vsub.f32 1.0, %v3839_v43 }
0x1256   :  { %v3841_v27 = vmul.f32 %v4327_v23, %v3840_v37 }
0x1258   :  { %v3842_v42 = vadd.f32 %v4327_v23, %v3841_v27 }
0x125a   :  { %v3846_v60 = vsel %vm3845_vm11, %v4327_v23, %v3842_v42 }
0x125b   :  { %v3851_v17 = vsel %vm3848_vm12, %v3850_v56, %v3846_v60 }
0x125c   :  { %v3853_v3 = vsel %vm4465_vm3, %v4329_v19, %v3851_v17 }
0x125d   :  { %3856 = vrot.lane.b32.xlu2 %v3853_v3, %s4345_s27  ;;  %v3854_v9 = vmul.f32 %v3853_v3, %v5257_v45 }
0x12b7   :  { %v3857_v4 = vpop.permute.xlu2 %3856 }
0x12b8   :  { %v3859_v5 = vmul.f32 %v3857_v4, %v3853_v3 }
0x12ba   :  { %3861 = vrot.lane.b32.xlu1 %v3859_v5, %s4346_s28 }
0x12c5   :  { %v3629_v7 = vpop.permute.xlu1 %3628 }
0x12c6   :  { %v3631_v8 = vmul.f32 %v3629_v7, %v3625_v36 }
0x12c8   :  { %3633 = vrot.lane.b32.xlu0 %v3631_v8, %s4346_s28 }
0x132c   :  { %v3862_v10 = vpop.permute.xlu1 %3861 }
0x132d   :  { %v5348_v11 = vadd.f32 %v3862_v10, %v3854_v9 }
0x132f   :  { %4330 = vtanh.f32 %v5348_v11 }
0x1335   :  { %v4331_v12 = vpop.eup %4330 }
0x1336   :  { %3867 = vrot.lane.b32.xlu0 %v4331_v12, %s4345_s27 }
0x133a   :  { %v3634_v14 = vpop.permute.xlu0 %3633 }
0x133b   :  { %v5353_v1 = vadd.f32 %v3634_v14, %v3626_v13 }
0x133d   :  { %4332 = vtanh.f32 %v5353_v1 }
0x1343   :  { %v4333_v2 = vpop.eup %4332 }
0x1344   :  { %3639 = vrot.lane.b32.xlu2 %v4333_v2, %s4345_s27 }
0x139e   :  { %v3640_v6 = vpop.permute.xlu2 %3639 }
0x139f   :  { %v3642_v45 = vmul.f32 %v3640_v6, %v3625_v36 }
0x13a1   :  { %3876 = vrot.lane.b32.xlu2 %v3642_v45, %s4345_s27 }
0x13a8   :  { %v3868_v21 = vpop.permute.xlu0 %3867 }
0x13a9   :  { %v3870_v22 = vmul.f32 %v3868_v21, %v3853_v3 }
0x13ab   :  { %3872 = vrot.lane.b32.xlu1 %v3870_v22, %s4346_s28 }
0x13fb   :  { %v3877_v25 = vpop.permute.xlu2 %3876 }
0x141d   :  { %v3873_v28 = vpop.permute.xlu1 %3872 }
0x141e   :  { %v3879_v16 = vsel %vm29_vm7, %v3873_v28, %v3877_v25  ;;  %4158 = vst.msk [vmem:[%s5390_s4] sm:$0xff] %vm29_vm7, %v3873_v28 }
0x141f   :  { %v3881_v29 = vsel %vm274_vm8, %v3879_v16, 0 }
0x1420   :  { %v3907_v30 = vand.u32 4294901760, %v3881_v29 }
0x1422   :  { %v3908_v31 = vsub.f32 %v3881_v29, %v3907_v30  ;;  %3973 = vmatmul.f32.vlgmr.msra.gmra.mxu1 %v3907_v30 }
0x1424   :  { %4011 = vmatmul.f32.vlgmr.msrb.gmra.mxu2 %v3908_v31  ;;  %v3909_v32 = vand.u32 4294901760, %v3908_v31 }
0x1426   :  { %4042 = vmatmul.f32.vlgmr.msrb.gmra.mxu3 %v3909_v32  ;;  %v3910_v33 = vsub.f32 %v3908_v31, %v3909_v32 }
0x1428   :  { %v3911_v34 = vand.u32 4294901760, %v3910_v33 }
0x142a   :  { %3912 = vmatmul.f32.vlgmr.msra.gmra.mxu0 %v3911_v34  ;;  %4116 = vmatmul.f32.vlgmr.msrb.gmra.mxu1 %v3907_v30 }
0x1432   :  { %4087 = vmatmul.f32.vlgmr.msrb.gmra.mxu0 %v3907_v30 }
0x149f   :  { %v3974_v35 = vpop.f32.mrf.mxu1 }
0x14a7   :  { %v3913_v38 = vpop.f32.mrf.mxu0  ;;  %v4012_v47 = vpop.f32.mrf.mxu2 }
0x14a8   :  { %v3914_v40 = vadd.f32 %v5333_v15, %v3913_v38  ;;  %v4117_v63 = vpop.f32.mrf.mxu1 }
0x14a9   :  { %v4043_v51 = vpop.f32.mrf.mxu3 }
0x14aa   :  { %v3975_v46 = vadd.f32 %v3974_v35, %v3914_v40 }
0x14ac   :  { %v4013_v50 = vadd.f32 %v4012_v47, %v3975_v46 }
0x14ae   :  { %v4044_v54 = vadd.f32 %v4043_v51, %v4013_v50 }
0x14af   :  { %v4088_v58 = vpop.f32.mrf.mxu0 }
0x14b0   :  { %v4089_v61 = vadd.f32 %v4088_v58, %v4044_v54 }
0x14b2   :  { %v4118_v0 = vadd.f32 %v4117_v63, %v4089_v61 }
0x14b4   :  { %v4206_v59 = vmul.f32 -1.442695, %v4118_v0 }
0x14b6   :  { %4334 = vpow2.f32 %v4206_v59 }
0x14bc   :  { %v4335_v55 = vpop.eup %4334 }
0x14bd   :  { %v4124_v20 = vadd.f32 1.0, %v4335_v55 }
0x14bf   :  { %4336 = vrcp.f32 %v4124_v20  ;;  %v4136_v53 = vand.u32 2147483648, %v4124_v20  ;;  %v4134_v52 = vand.u32 2147483647, %v4124_v20  ;;  %vm4130_vm13 = vweird.f32 %v4124_v20 }
0x14c0   :  { %4338 = vtanh.f32 %v4118_v0 }
0x14c1   :  { %v4137_v62 = vor.u32 1.1754944e-38, %v4136_v53  ;;  %vm4135_vm15 = vcmp.eq.f32.partialorder %v4134_v52, 8.507059e+37 }
0x14c5   :  { %v4337_v48 = vpop.eup %4336 }
0x14c6   :  { %v4126_v57 = vmul.f32 %v4337_v48, %v4124_v20  ;;  %vm4131_vm8 = vweird.f32 %v4337_v48  ;;  %v4339_v23 = vpop.eup %4338 }
0x14c7   :  { %vm4132_vm14 = vmor %vm4130_vm13, %vm4131_vm8 }
0x14c8   :  { %v4127_v39 = vsub.f32 1.0, %v4126_v57 }
0x14ca   :  { %v4128_v15 = vmul.f32 %v4337_v48, %v4127_v39 }
0x14cc   :  { %v4129_v26 = vadd.f32 %v4337_v48, %v4128_v15 }
0x14ce   :  { %v4133_v24 = vsel %vm4132_vm14, %v4337_v48, %v4129_v26 }
0x14cf   :  { %v4138_v18 = vsel %vm4135_vm15, %v4137_v62, %v4133_v24 }
0x14d0   :  { %v4140_v36 = vsel %vm4465_vm3, %v4339_v23, %v4138_v18 }
0x14d1   :  { %4143 = vrot.lane.b32.xlu0 %v4140_v36, %s4345_s27  ;;  %v4141_v27 = vmul.f32 %v4140_v36, %v5353_v1 }
0x14d9   :  { %4160 = vrot.lane.b32.xlu0 %v5348_v11, %s4347_s15 }
0x1543   :  { %v4144_v43 = vpop.permute.xlu0 %4143 }
0x1544   :  { %v4146_v37 = vmul.f32 %v4144_v43, %v4140_v36 }
0x1546   :  { %4148 = vrot.lane.b32.xlu1 %v4146_v37, %s4346_s28 }
0x154b   :  { %v4161_v44 = vpop.permute.xlu0 %4160 }
0x154c   :  { %4163 = vst.msk [vmem:[%s5391_s5] sm:$0xff] %vm29_vm7, %v4161_v44 }
0x15b8   :  { %v4149_v41 = vpop.permute.xlu1 %4148 }
0x15b9   :  { %v4151_v49 = vadd.f32 %v4149_v41, %v4141_v27 }
0x15bb   :  { %4340 = vtanh.f32 %v4151_v49 }
0x15c1   :  { %v4341_v42 = vpop.eup %4340 }
0x15c2   :  { %4154 = vrot.lane.b32.xlu2 %v4341_v42, %s4345_s27 }
0x15ca   :  { %4171 = vrot.lane.b32.xlu2 %v4151_v49, %s4347_s15 }
0x161c   :  { %v4155_v56 = vpop.permute.xlu2 %4154 }
0x161d   :  { %v4157_v60 = vmul.f32 %v4155_v56, %v4140_v36 }
0x161f   :  { %4165 = vrot.lane.b32.xlu1 %v4157_v60, %s4346_s28 }
0x1624   :  { %v4172_v19 = vpop.permute.xlu2 %4171 }
0x1625   :  { %4208 = vst.msk [vmem:[%s5391_s5 + $0x8] sm:$0xff] %vm29_vm7, %v4172_v19 }
0x1691   :  { %v4166_v17 = vpop.permute.xlu1 %4165 }
0x1692   :  { %4207 = vst.msk [vmem:[%s5390_s4 + $0x8] sm:$0xff] %vm29_vm7, %v4166_v17 }

</bundles_post_ra>
